<compile_context>
chip_gen: v7x
topology: tpu7x:2x2x1
jax: 0.10.0
libtpu: 0.0.40
codegen_flags: <defaults>
</compile_context>

<pallas_src>
import functools

import jax
import jax.numpy as jnp
from jax.experimental import pallas as pl
from jax.experimental.pallas import tpu as pltpu


# ----------------------------------------------------------------------------
# Fused kernel: whole MyEncoder forward in one program, everything in VMEM.
# ----------------------------------------------------------------------------
def my_encoder_kernel(
    # inputs
    d_feat_ref, p_idx_ref,
    ecfp_w_ref, ecfp_b_ref,
    char_emb_ref, conv1_w_ref, conv1_b_ref, conv2_w_ref, conv2_b_ref,
    pproj_w_ref, pproj_b_ref,
    adj_dd_ref, adj_pp_ref, adj_dp_ref, adj_pd_ref,
    dd_w_ref, dd_b_ref, pp_w_ref, pp_b_ref,
    dp_ws_ref, dp_bs_ref, dp_wt_ref, dp_bt_ref,
    # outputs
    d_out_ref, p_out_ref, d_att_ref, p_att_ref,
    *, network_order, cycle, kernel_size,
):
    def mm(a, b):
        # bf16 MXU inputs, f32 accumulation (review item: double MXU throughput
        # on v6e/v7x, accuracy preserved by f32 accumulate).
        return jnp.dot(a.astype(jnp.bfloat16), b.astype(jnp.bfloat16),
                       preferred_element_type=jnp.float32)

    # ---------------- drug attribute encoder: relu(x @ W + b) ----------------
    d_att = jnp.maximum(mm(d_feat_ref[...], ecfp_w_ref[...]) + ecfp_b_ref[...],
                        0.0)

    # ---------------- protein attribute encoder (fully VMEM-resident) --------
    idx = p_idx_ref[...]                                   # (Np, L) int32
    n_prot, seq_len = idx.shape
    uniqchar = char_emb_ref.shape[0]
    char_emb = char_emb_ref[...]                           # (U, C0)
    # hoisted iota for one-hot construction (not rebuilt per position)
    iota_u = jax.lax.broadcasted_iota(jnp.int32, (n_prot, uniqchar), 1)

    # per-position character embedding via one-hot matmul (no gather)
    emb = []
    for l in range(seq_len):                               # static, small
        onehot = jnp.where(idx[:, l:l + 1] == iota_u, 1.0, 0.0)   # (Np, U)
        emb.append(mm(onehot, char_emb))                          # (Np, C0)

    k = kernel_size

    # conv1 ('valid', stride 1) as im2col matmul per output position
    w1, b1 = conv1_w_ref[...], conv1_b_ref[...]            # (K*C0, C1), (1, C1)
    lout1 = seq_len - k + 1
    h1 = []
    for l in range(lout1):
        col = jnp.concatenate(emb[l:l + k], axis=1)        # (Np, K*C0)
        h1.append(jnp.maximum(mm(col, w1) + b1, 0.0))      # (Np, C1)

    # conv2
    w2, b2 = conv2_w_ref[...], conv2_b_ref[...]            # (K*C1, C2), (1, C2)
    lout2 = lout1 - k + 1
    h2 = []
    for l in range(lout2):
        col = jnp.concatenate(h1[l:l + k], axis=1)         # (Np, K*C1)
        h2.append(jnp.maximum(mm(col, w2) + b2, 0.0))      # (Np, C2)

    # global max pool over sequence positions (pure VPU elementwise max tree)
    pooled = h2[0]
    for l in range(1, lout2):
        pooled = jnp.maximum(pooled, h2[l])                # (Np, C2)

    p_att = jnp.maximum(mm(pooled, pproj_w_ref[...]) + pproj_b_ref[...], 0.0)

    # ---------------- graph encoders: features stay in VMEM all cycles -------
    adj_dd = adj_dd_ref[...]
    adj_pp = adj_pp_ref[...]
    adj_dp = adj_dp_ref[...]
    adj_pd = adj_pd_ref[...]
    dd_w, dd_b = dd_w_ref[...], dd_b_ref[...]
    pp_w, pp_b = pp_w_ref[...], pp_b_ref[...]
    dp_ws, dp_bs = dp_ws_ref[...], dp_bs_ref[...]
    dp_wt, dp_bt = dp_wt_ref[...], dp_bt_ref[...]

    d, p = d_att, p_att
    for _ in range(cycle):                                 # static unroll
        for network in network_order:                      # static unroll
            if network == "dd":        # drug_drug MonoEncoder (un-weighted)
                d = jnp.maximum(mm(mm(adj_dd, d), dd_w) + dd_b, 0.0)
            elif network == "pp":      # protein_protein MonoEncoder (weighted)
                p = jnp.maximum(mm(mm(adj_pp, p), pp_w) + pp_b, 0.0)
            elif network == "dp":      # drug_protein BipartiteEncoder
                d_new = jnp.maximum(mm(mm(adj_dp, p), dp_ws) + dp_bs, 0.0)
                p_new = jnp.maximum(mm(mm(adj_pd, d), dp_wt) + dp_bt, 0.0)
                d, p = d_new, p_new

    d_out_ref[...] = d
    p_out_ref[...] = p
    d_att_ref[...] = d_att
    p_att_ref[...] = p_att


# ----------------------------------------------------------------------------
# Wrapper: one pallas_call for the whole forward (no grid, whole-array blocks)
# ----------------------------------------------------------------------------
def my_encoder_forward(feat, params, graphs, network_order, cycle):
    n_drug = feat["d_feat"].shape[0]
    n_prot = feat["p_feat"].shape[0]
    emb_dim = params["ecfp_w"].shape[1]

    k, c0, c1 = params["conv1_w"].shape
    _, c1b, c2 = params["conv2_w"].shape
    conv1_w_flat = params["conv1_w"].reshape(k * c0, c1)      # im2col layout
    conv2_w_flat = params["conv2_w"].reshape(k * c1b, c2)

    kernel = functools.partial(
        my_encoder_kernel,
        network_order=tuple(network_order),
        cycle=int(cycle),
        kernel_size=int(k),
    )

    out_shape = (
        jax.ShapeDtypeStruct((n_drug, emb_dim), jnp.float32),   # d_feat
        jax.ShapeDtypeStruct((n_prot, emb_dim), jnp.float32),   # p_feat
        jax.ShapeDtypeStruct((n_drug, emb_dim), jnp.float32),   # d_feat_att
        jax.ShapeDtypeStruct((n_prot, emb_dim), jnp.float32),   # p_feat_att
    )

    d_out, p_out, d_att, p_att = pl.pallas_call(
        kernel,
        out_shape=out_shape,
        compiler_params=pltpu.CompilerParams(vmem_limit_bytes=32 * 1024 * 1024),
    )(
        feat["d_feat"], feat["p_feat"],
        params["ecfp_w"], params["ecfp_b"],
        params["char_emb"], conv1_w_flat, params["conv1_b"],
        conv2_w_flat, params["conv2_b"],
        params["pproj_w"], params["pproj_b"],
        graphs["adj_dd"], graphs["adj_pp"], graphs["adj_dp"], graphs["adj_pd"],
        params["dd_w"], params["dd_b"], params["pp_w"], params["pp_b"],
        params["dp_ws"], params["dp_bs"], params["dp_wt"], params["dp_bt"],
    )

    return {"d_feat": d_out, "p_feat": p_out,
            "d_feat_att": d_att, "p_feat_att": p_att}


# ----------------------------------------------------------------------------
# Graph glue (densify + normalize; done once, outside the kernel)
# ----------------------------------------------------------------------------
def build_adj(edge_index, n_src, n_tar, weights=None, self_loops=False):
    src, tar = edge_index[0], edge_index[1]
    w = weights if weights is not None else jnp.ones(src.shape[0], jnp.float32)
    adj = jnp.zeros((n_src, n_tar), jnp.float32).at[src, tar].add(w)
    if self_loops and n_src == n_tar:
        adj = adj + jnp.eye(n_src, dtype=jnp.float32)
    return adj


def row_normalize(adj):
    deg = jnp.sum(adj, axis=1, keepdims=True)
    return adj / jnp.maximum(deg, 1e-6)


# ----------------------------------------------------------------------------
# Main
# ----------------------------------------------------------------------------
if __name__ == "__main__":
    # small, deterministic configuration
    n_drug, n_protein = 8, 8
    ecfp_dim = 64
    uniqchar, mxlen = 25, 16
    emb_dim = 32
    channel0, channel1, channel2 = 8, 8, 8     # char-emb dim, conv channels
    kernel_size = 3                            # stride = 1
    cycle = 2
    network_order = ["dd", "pp", "dp"]

    key = jax.random.PRNGKey(0)
    ks = jax.random.split(key, 24)

    # inputs
    d_feat = jax.random.bernoulli(ks[0], 0.15, (n_drug, ecfp_dim)).astype(jnp.float32)
    p_feat = jax.random.randint(ks[1], (n_protein, mxlen), 0, uniqchar)

    def w(kk, shape, s=0.1):
        return jax.random.normal(kk, shape, jnp.float32) * s

    params = {
        "ecfp_w":  w(ks[2], (ecfp_dim, emb_dim)),
        "ecfp_b":  jnp.zeros((1, emb_dim), jnp.float32),
        "char_emb": w(ks[3], (uniqchar, channel0)),
        "conv1_w": w(ks[4], (kernel_size, channel0, channel1)),
        "conv1_b": jnp.zeros((1, channel1), jnp.float32),
        "conv2_w": w(ks[5], (kernel_size, channel1, channel2)),
        "conv2_b": jnp.zeros((1, channel2), jnp.float32),
        "pproj_w": w(ks[6], (channel2, emb_dim)),
        "pproj_b": jnp.zeros((1, emb_dim), jnp.float32),
        "dd_w":    w(ks[7], (emb_dim, emb_dim)),
        "dd_b":    jnp.zeros((1, emb_dim), jnp.float32),
        "pp_w":    w(ks[8], (emb_dim, emb_dim)),
        "pp_b":    jnp.zeros((1, emb_dim), jnp.float32),
        "dp_ws":   w(ks[9], (emb_dim, emb_dim)),
        "dp_bs":   jnp.zeros((1, emb_dim), jnp.float32),
        "dp_wt":   w(ks[10], (emb_dim, emb_dim)),
        "dp_bt":   jnp.zeros((1, emb_dim), jnp.float32),
    }

    # graphs (edge_index / edge_weight -> dense, row-normalized by receiver degree)
    e_dd, e_pp, e_dp = 20, 20, 24
    dd_ei = jax.random.randint(ks[11], (2, e_dd), 0, n_drug)
    pp_ei = jax.random.randint(ks[12], (2, e_pp), 0, n_protein)
    pp_ew = jax.random.uniform(ks[13], (e_pp,), jnp.float32, 0.1, 1.0)
    dp_ei = jnp.stack([jax.random.randint(ks[14], (e_dp,), 0, n_drug),
                       jax.random.randint(ks[15], (e_dp,), 0, n_protein)])

    adj_dp_raw = build_adj(dp_ei, n_drug, n_protein)
    graphs = {
        "adj_dd": row_normalize(build_adj(dd_ei, n_drug, n_drug, self_loops=True)),
        "adj_pp": row_normalize(build_adj(pp_ei, n_protein, n_protein, pp_ew,
                                          self_loops=True)),
        # each message-passing direction normalized by the receiving node's degree
        "adj_dp": row_normalize(adj_dp_raw),        # drug <- protein
        "adj_pd": row_normalize(adj_dp_raw.T),      # protein <- drug
    }

    feat = {"d_feat": d_feat, "p_feat": p_feat}
    out = my_encoder_forward(feat, params, graphs, network_order, cycle)
    out = jax.block_until_ready(out)

    assert out["d_feat"].shape == (n_drug, emb_dim)
    assert out["p_feat"].shape == (n_protein, emb_dim)
    assert out["d_feat_att"].shape == (n_drug, emb_dim)
    assert out["p_feat_att"].shape == (n_protein, emb_dim)
    assert all(bool(jnp.all(jnp.isfinite(v))) for v in out.values())
    print("KERNEL_OK")
</pallas_src>

<mosaic_0001>
module attributes {stable_mosaic.version = 11 : i64} {
  func.func @my_encoder_kernel(%arg0: memref<8x64xf32, #tpu.memory_space<vmem>>, %arg1: memref<8x16xi32, #tpu.memory_space<vmem>>, %arg2: memref<64x32xf32, #tpu.memory_space<vmem>>, %arg3: memref<1x32xf32, #tpu.memory_space<vmem>>, %arg4: memref<25x8xf32, #tpu.memory_space<vmem>>, %arg5: memref<24x8xf32, #tpu.memory_space<vmem>>, %arg6: memref<1x8xf32, #tpu.memory_space<vmem>>, %arg7: memref<24x8xf32, #tpu.memory_space<vmem>>, %arg8: memref<1x8xf32, #tpu.memory_space<vmem>>, %arg9: memref<8x32xf32, #tpu.memory_space<vmem>>, %arg10: memref<1x32xf32, #tpu.memory_space<vmem>>, %arg11: memref<8x8xf32, #tpu.memory_space<vmem>>, %arg12: memref<8x8xf32, #tpu.memory_space<vmem>>, %arg13: memref<8x8xf32, #tpu.memory_space<vmem>>, %arg14: memref<8x8xf32, #tpu.memory_space<vmem>>, %arg15: memref<32x32xf32, #tpu.memory_space<vmem>>, %arg16: memref<1x32xf32, #tpu.memory_space<vmem>>, %arg17: memref<32x32xf32, #tpu.memory_space<vmem>>, %arg18: memref<1x32xf32, #tpu.memory_space<vmem>>, %arg19: memref<32x32xf32, #tpu.memory_space<vmem>>, %arg20: memref<1x32xf32, #tpu.memory_space<vmem>>, %arg21: memref<32x32xf32, #tpu.memory_space<vmem>>, %arg22: memref<1x32xf32, #tpu.memory_space<vmem>>, %arg23: memref<8x32xf32, #tpu.memory_space<vmem>>, %arg24: memref<8x32xf32, #tpu.memory_space<vmem>>, %arg25: memref<8x32xf32, #tpu.memory_space<vmem>>, %arg26: memref<8x32xf32, #tpu.memory_space<vmem>>) attributes {dimension_semantics = [], scalar_prefetch = 0 : i64, scratch_operands = 0 : i64, tpu.core_type = #tpu.core_type<tc>} {
    %c0 = arith.constant 0 : index
    %c0_0 = arith.constant 0 : index
    %0 = vector.load %arg0[%c0, %c0_0] : memref<8x64xf32, #tpu.memory_space<vmem>>, vector<8x64xf32>
    %c0_1 = arith.constant 0 : index
    %c0_2 = arith.constant 0 : index
    %1 = vector.load %arg2[%c0_1, %c0_2] : memref<64x32xf32, #tpu.memory_space<vmem>>, vector<64x32xf32>
    %2 = arith.truncf %0 : vector<8x64xf32> to vector<8x64xbf16>
    %3 = arith.truncf %1 : vector<64x32xf32> to vector<64x32xbf16>
    %cst = arith.constant dense<0.000000e+00> : vector<8x32xf32>
    %4 = tpu.matmul %2, %3, %cst {dimension_numbers = #tpu.dot_dimension_numbers<[1], [0], [0], [1], [0, 0, 1, 1], [], []>} : vector<8x64xbf16>, vector<64x32xbf16>, vector<8x32xf32> -> vector<8x32xf32>
    %c0_3 = arith.constant 0 : index
    %c0_4 = arith.constant 0 : index
    %5 = vector.load %arg3[%c0_3, %c0_4] : memref<1x32xf32, #tpu.memory_space<vmem>>, vector<1x32xf32>
    %6 = vector.broadcast %5 : vector<1x32xf32> to vector<8x32xf32>
    %7 = arith.addf %4, %6 : vector<8x32xf32>
    %cst_5 = arith.constant 0.000000e+00 : f32
    %8 = vector.broadcast %cst_5 : f32 to vector<8x32xf32>
    %9 = arith.maximumf %7, %8 : vector<8x32xf32>
    %c0_6 = arith.constant 0 : index
    %c0_7 = arith.constant 0 : index
    %10 = vector.load %arg1[%c0_6, %c0_7] : memref<8x16xi32, #tpu.memory_space<vmem>>, vector<8x16xi32>
    %c0_8 = arith.constant 0 : index
    %c0_9 = arith.constant 0 : index
    %11 = vector.load %arg4[%c0_8, %c0_9] : memref<25x8xf32, #tpu.memory_space<vmem>>, vector<25x8xf32>
    %12 = tpu.iota {dimensions = array<i32: 1>} : vector<8x25xi32>
    %13 = vector.extract_strided_slice %10 {offsets = [0, 0], sizes = [8, 1], strides = [1, 1]} : vector<8x16xi32> to vector<8x1xi32>
    %14 = vector.broadcast %13 : vector<8x1xi32> to vector<8x25xi32>
    %15 = arith.cmpi eq, %14, %12 : vector<8x25xi32>
    %cst_10 = arith.constant 1.000000e+00 : f32
    %cst_11 = arith.constant 0.000000e+00 : f32
    %16 = vector.broadcast %cst_10 : f32 to vector<8x25xf32>
    %17 = vector.broadcast %cst_11 : f32 to vector<8x25xf32>
    %18 = arith.select %15, %16, %17 : vector<8x25xi1>, vector<8x25xf32>
    %19 = arith.truncf %18 : vector<8x25xf32> to vector<8x25xbf16>
    %20 = arith.truncf %11 : vector<25x8xf32> to vector<25x8xbf16>
    %cst_12 = arith.constant dense<0.000000e+00> : vector<8x8xf32>
    %21 = tpu.matmul %19, %20, %cst_12 {dimension_numbers = #tpu.dot_dimension_numbers<[1], [0], [0], [1], [0, 0, 1, 1], [], []>} : vector<8x25xbf16>, vector<25x8xbf16>, vector<8x8xf32> -> vector<8x8xf32>
    %22 = vector.extract_strided_slice %10 {offsets = [0, 1], sizes = [8, 1], strides = [1, 1]} : vector<8x16xi32> to vector<8x1xi32>
    %23 = vector.broadcast %22 : vector<8x1xi32> to vector<8x25xi32>
    %24 = arith.cmpi eq, %23, %12 : vector<8x25xi32>
    %cst_13 = arith.constant 1.000000e+00 : f32
    %cst_14 = arith.constant 0.000000e+00 : f32
    %25 = vector.broadcast %cst_13 : f32 to vector<8x25xf32>
    %26 = vector.broadcast %cst_14 : f32 to vector<8x25xf32>
    %27 = arith.select %24, %25, %26 : vector<8x25xi1>, vector<8x25xf32>
    %28 = arith.truncf %27 : vector<8x25xf32> to vector<8x25xbf16>
    %29 = arith.truncf %11 : vector<25x8xf32> to vector<25x8xbf16>
    %cst_15 = arith.constant dense<0.000000e+00> : vector<8x8xf32>
    %30 = tpu.matmul %28, %29, %cst_15 {dimension_numbers = #tpu.dot_dimension_numbers<[1], [0], [0], [1], [0, 0, 1, 1], [], []>} : vector<8x25xbf16>, vector<25x8xbf16>, vector<8x8xf32> -> vector<8x8xf32>
    %31 = vector.extract_strided_slice %10 {offsets = [0, 2], sizes = [8, 1], strides = [1, 1]} : vector<8x16xi32> to vector<8x1xi32>
    %32 = vector.broadcast %31 : vector<8x1xi32> to vector<8x25xi32>
    %33 = arith.cmpi eq, %32, %12 : vector<8x25xi32>
    %cst_16 = arith.constant 1.000000e+00 : f32
    %cst_17 = arith.constant 0.000000e+00 : f32
    %34 = vector.broadcast %cst_16 : f32 to vector<8x25xf32>
    %35 = vector.broadcast %cst_17 : f32 to vector<8x25xf32>
    %36 = arith.select %33, %34, %35 : vector<8x25xi1>, vector<8x25xf32>
    %37 = arith.truncf %36 : vector<8x25xf32> to vector<8x25xbf16>
    %38 = arith.truncf %11 : vector<25x8xf32> to vector<25x8xbf16>
    %cst_18 = arith.constant dense<0.000000e+00> : vector<8x8xf32>
    %39 = tpu.matmul %37, %38, %cst_18 {dimension_numbers = #tpu.dot_dimension_numbers<[1], [0], [0], [1], [0, 0, 1, 1], [], []>} : vector<8x25xbf16>, vector<25x8xbf16>, vector<8x8xf32> -> vector<8x8xf32>
    %40 = vector.extract_strided_slice %10 {offsets = [0, 3], sizes = [8, 1], strides = [1, 1]} : vector<8x16xi32> to vector<8x1xi32>
    %41 = vector.broadcast %40 : vector<8x1xi32> to vector<8x25xi32>
    %42 = arith.cmpi eq, %41, %12 : vector<8x25xi32>
    %cst_19 = arith.constant 1.000000e+00 : f32
    %cst_20 = arith.constant 0.000000e+00 : f32
    %43 = vector.broadcast %cst_19 : f32 to vector<8x25xf32>
    %44 = vector.broadcast %cst_20 : f32 to vector<8x25xf32>
    %45 = arith.select %42, %43, %44 : vector<8x25xi1>, vector<8x25xf32>
    %46 = arith.truncf %45 : vector<8x25xf32> to vector<8x25xbf16>
    %47 = arith.truncf %11 : vector<25x8xf32> to vector<25x8xbf16>
    %cst_21 = arith.constant dense<0.000000e+00> : vector<8x8xf32>
    %48 = tpu.matmul %46, %47, %cst_21 {dimension_numbers = #tpu.dot_dimension_numbers<[1], [0], [0], [1], [0, 0, 1, 1], [], []>} : vector<8x25xbf16>, vector<25x8xbf16>, vector<8x8xf32> -> vector<8x8xf32>
    %49 = vector.extract_strided_slice %10 {offsets = [0, 4], sizes = [8, 1], strides = [1, 1]} : vector<8x16xi32> to vector<8x1xi32>
    %50 = vector.broadcast %49 : vector<8x1xi32> to vector<8x25xi32>
    %51 = arith.cmpi eq, %50, %12 : vector<8x25xi32>
    %cst_22 = arith.constant 1.000000e+00 : f32
    %cst_23 = arith.constant 0.000000e+00 : f32
    %52 = vector.broadcast %cst_22 : f32 to vector<8x25xf32>
    %53 = vector.broadcast %cst_23 : f32 to vector<8x25xf32>
    %54 = arith.select %51, %52, %53 : vector<8x25xi1>, vector<8x25xf32>
    %55 = arith.truncf %54 : vector<8x25xf32> to vector<8x25xbf16>
    %56 = arith.truncf %11 : vector<25x8xf32> to vector<25x8xbf16>
    %cst_24 = arith.constant dense<0.000000e+00> : vector<8x8xf32>
    %57 = tpu.matmul %55, %56, %cst_24 {dimension_numbers = #tpu.dot_dimension_numbers<[1], [0], [0], [1], [0, 0, 1, 1], [], []>} : vector<8x25xbf16>, vector<25x8xbf16>, vector<8x8xf32> -> vector<8x8xf32>
    %58 = vector.extract_strided_slice %10 {offsets = [0, 5], sizes = [8, 1], strides = [1, 1]} : vector<8x16xi32> to vector<8x1xi32>
    %59 = vector.broadcast %58 : vector<8x1xi32> to vector<8x25xi32>
    %60 = arith.cmpi eq, %59, %12 : vector<8x25xi32>
    %cst_25 = arith.constant 1.000000e+00 : f32
    %cst_26 = arith.constant 0.000000e+00 : f32
    %61 = vector.broadcast %cst_25 : f32 to vector<8x25xf32>
    %62 = vector.broadcast %cst_26 : f32 to vector<8x25xf32>
    %63 = arith.select %60, %61, %62 : vector<8x25xi1>, vector<8x25xf32>
    %64 = arith.truncf %63 : vector<8x25xf32> to vector<8x25xbf16>
    %65 = arith.truncf %11 : vector<25x8xf32> to vector<25x8xbf16>
    %cst_27 = arith.constant dense<0.000000e+00> : vector<8x8xf32>
    %66 = tpu.matmul %64, %65, %cst_27 {dimension_numbers = #tpu.dot_dimension_numbers<[1], [0], [0], [1], [0, 0, 1, 1], [], []>} : vector<8x25xbf16>, vector<25x8xbf16>, vector<8x8xf32> -> vector<8x8xf32>
    %67 = vector.extract_strided_slice %10 {offsets = [0, 6], sizes = [8, 1], strides = [1, 1]} : vector<8x16xi32> to vector<8x1xi32>
    %68 = vector.broadcast %67 : vector<8x1xi32> to vector<8x25xi32>
    %69 = arith.cmpi eq, %68, %12 : vector<8x25xi32>
    %cst_28 = arith.constant 1.000000e+00 : f32
    %cst_29 = arith.constant 0.000000e+00 : f32
    %70 = vector.broadcast %cst_28 : f32 to vector<8x25xf32>
    %71 = vector.broadcast %cst_29 : f32 to vector<8x25xf32>
    %72 = arith.select %69, %70, %71 : vector<8x25xi1>, vector<8x25xf32>
    %73 = arith.truncf %72 : vector<8x25xf32> to vector<8x25xbf16>
    %74 = arith.truncf %11 : vector<25x8xf32> to vector<25x8xbf16>
    %cst_30 = arith.constant dense<0.000000e+00> : vector<8x8xf32>
    %75 = tpu.matmul %73, %74, %cst_30 {dimension_numbers = #tpu.dot_dimension_numbers<[1], [0], [0], [1], [0, 0, 1, 1], [], []>} : vector<8x25xbf16>, vector<25x8xbf16>, vector<8x8xf32> -> vector<8x8xf32>
    %76 = vector.extract_strided_slice %10 {offsets = [0, 7], sizes = [8, 1], strides = [1, 1]} : vector<8x16xi32> to vector<8x1xi32>
    %77 = vector.broadcast %76 : vector<8x1xi32> to vector<8x25xi32>
    %78 = arith.cmpi eq, %77, %12 : vector<8x25xi32>
    %cst_31 = arith.constant 1.000000e+00 : f32
    %cst_32 = arith.constant 0.000000e+00 : f32
    %79 = vector.broadcast %cst_31 : f32 to vector<8x25xf32>
    %80 = vector.broadcast %cst_32 : f32 to vector<8x25xf32>
    %81 = arith.select %78, %79, %80 : vector<8x25xi1>, vector<8x25xf32>
    %82 = arith.truncf %81 : vector<8x25xf32> to vector<8x25xbf16>
    %83 = arith.truncf %11 : vector<25x8xf32> to vector<25x8xbf16>
    %cst_33 = arith.constant dense<0.000000e+00> : vector<8x8xf32>
    %84 = tpu.matmul %82, %83, %cst_33 {dimension_numbers = #tpu.dot_dimension_numbers<[1], [0], [0], [1], [0, 0, 1, 1], [], []>} : vector<8x25xbf16>, vector<25x8xbf16>, vector<8x8xf32> -> vector<8x8xf32>
    %85 = vector.extract_strided_slice %10 {offsets = [0, 8], sizes = [8, 1], strides = [1, 1]} : vector<8x16xi32> to vector<8x1xi32>
    %86 = vector.broadcast %85 : vector<8x1xi32> to vector<8x25xi32>
    %87 = arith.cmpi eq, %86, %12 : vector<8x25xi32>
    %cst_34 = arith.constant 1.000000e+00 : f32
    %cst_35 = arith.constant 0.000000e+00 : f32
    %88 = vector.broadcast %cst_34 : f32 to vector<8x25xf32>
    %89 = vector.broadcast %cst_35 : f32 to vector<8x25xf32>
    %90 = arith.select %87, %88, %89 : vector<8x25xi1>, vector<8x25xf32>
    %91 = arith.truncf %90 : vector<8x25xf32> to vector<8x25xbf16>
    %92 = arith.truncf %11 : vector<25x8xf32> to vector<25x8xbf16>
    %cst_36 = arith.constant dense<0.000000e+00> : vector<8x8xf32>
    %93 = tpu.matmul %91, %92, %cst_36 {dimension_numbers = #tpu.dot_dimension_numbers<[1], [0], [0], [1], [0, 0, 1, 1], [], []>} : vector<8x25xbf16>, vector<25x8xbf16>, vector<8x8xf32> -> vector<8x8xf32>
    %94 = vector.extract_strided_slice %10 {offsets = [0, 9], sizes = [8, 1], strides = [1, 1]} : vector<8x16xi32> to vector<8x1xi32>
    %95 = vector.broadcast %94 : vector<8x1xi32> to vector<8x25xi32>
    %96 = arith.cmpi eq, %95, %12 : vector<8x25xi32>
    %cst_37 = arith.constant 1.000000e+00 : f32
    %cst_38 = arith.constant 0.000000e+00 : f32
    %97 = vector.broadcast %cst_37 : f32 to vector<8x25xf32>
    %98 = vector.broadcast %cst_38 : f32 to vector<8x25xf32>
    %99 = arith.select %96, %97, %98 : vector<8x25xi1>, vector<8x25xf32>
    %100 = arith.truncf %99 : vector<8x25xf32> to vector<8x25xbf16>
    %101 = arith.truncf %11 : vector<25x8xf32> to vector<25x8xbf16>
    %cst_39 = arith.constant dense<0.000000e+00> : vector<8x8xf32>
    %102 = tpu.matmul %100, %101, %cst_39 {dimension_numbers = #tpu.dot_dimension_numbers<[1], [0], [0], [1], [0, 0, 1, 1], [], []>} : vector<8x25xbf16>, vector<25x8xbf16>, vector<8x8xf32> -> vector<8x8xf32>
    %103 = vector.extract_strided_slice %10 {offsets = [0, 10], sizes = [8, 1], strides = [1, 1]} : vector<8x16xi32> to vector<8x1xi32>
    %104 = vector.broadcast %103 : vector<8x1xi32> to vector<8x25xi32>
    %105 = arith.cmpi eq, %104, %12 : vector<8x25xi32>
    %cst_40 = arith.constant 1.000000e+00 : f32
    %cst_41 = arith.constant 0.000000e+00 : f32
    %106 = vector.broadcast %cst_40 : f32 to vector<8x25xf32>
    %107 = vector.broadcast %cst_41 : f32 to vector<8x25xf32>
    %108 = arith.select %105, %106, %107 : vector<8x25xi1>, vector<8x25xf32>
    %109 = arith.truncf %108 : vector<8x25xf32> to vector<8x25xbf16>
    %110 = arith.truncf %11 : vector<25x8xf32> to vector<25x8xbf16>
    %cst_42 = arith.constant dense<0.000000e+00> : vector<8x8xf32>
    %111 = tpu.matmul %109, %110, %cst_42 {dimension_numbers = #tpu.dot_dimension_numbers<[1], [0], [0], [1], [0, 0, 1, 1], [], []>} : vector<8x25xbf16>, vector<25x8xbf16>, vector<8x8xf32> -> vector<8x8xf32>
    %112 = vector.extract_strided_slice %10 {offsets = [0, 11], sizes = [8, 1], strides = [1, 1]} : vector<8x16xi32> to vector<8x1xi32>
    %113 = vector.broadcast %112 : vector<8x1xi32> to vector<8x25xi32>
    %114 = arith.cmpi eq, %113, %12 : vector<8x25xi32>
    %cst_43 = arith.constant 1.000000e+00 : f32
    %cst_44 = arith.constant 0.000000e+00 : f32
    %115 = vector.broadcast %cst_43 : f32 to vector<8x25xf32>
    %116 = vector.broadcast %cst_44 : f32 to vector<8x25xf32>
    %117 = arith.select %114, %115, %116 : vector<8x25xi1>, vector<8x25xf32>
    %118 = arith.truncf %117 : vector<8x25xf32> to vector<8x25xbf16>
    %119 = arith.truncf %11 : vector<25x8xf32> to vector<25x8xbf16>
    %cst_45 = arith.constant dense<0.000000e+00> : vector<8x8xf32>
    %120 = tpu.matmul %118, %119, %cst_45 {dimension_numbers = #tpu.dot_dimension_numbers<[1], [0], [0], [1], [0, 0, 1, 1], [], []>} : vector<8x25xbf16>, vector<25x8xbf16>, vector<8x8xf32> -> vector<8x8xf32>
    %121 = vector.extract_strided_slice %10 {offsets = [0, 12], sizes = [8, 1], strides = [1, 1]} : vector<8x16xi32> to vector<8x1xi32>
    %122 = vector.broadcast %121 : vector<8x1xi32> to vector<8x25xi32>
    %123 = arith.cmpi eq, %122, %12 : vector<8x25xi32>
    %cst_46 = arith.constant 1.000000e+00 : f32
    %cst_47 = arith.constant 0.000000e+00 : f32
    %124 = vector.broadcast %cst_46 : f32 to vector<8x25xf32>
    %125 = vector.broadcast %cst_47 : f32 to vector<8x25xf32>
    %126 = arith.select %123, %124, %125 : vector<8x25xi1>, vector<8x25xf32>
    %127 = arith.truncf %126 : vector<8x25xf32> to vector<8x25xbf16>
    %128 = arith.truncf %11 : vector<25x8xf32> to vector<25x8xbf16>
    %cst_48 = arith.constant dense<0.000000e+00> : vector<8x8xf32>
    %129 = tpu.matmul %127, %128, %cst_48 {dimension_numbers = #tpu.dot_dimension_numbers<[1], [0], [0], [1], [0, 0, 1, 1], [], []>} : vector<8x25xbf16>, vector<25x8xbf16>, vector<8x8xf32> -> vector<8x8xf32>
    %130 = vector.extract_strided_slice %10 {offsets = [0, 13], sizes = [8, 1], strides = [1, 1]} : vector<8x16xi32> to vector<8x1xi32>
    %131 = vector.broadcast %130 : vector<8x1xi32> to vector<8x25xi32>
    %132 = arith.cmpi eq, %131, %12 : vector<8x25xi32>
    %cst_49 = arith.constant 1.000000e+00 : f32
    %cst_50 = arith.constant 0.000000e+00 : f32
    %133 = vector.broadcast %cst_49 : f32 to vector<8x25xf32>
    %134 = vector.broadcast %cst_50 : f32 to vector<8x25xf32>
    %135 = arith.select %132, %133, %134 : vector<8x25xi1>, vector<8x25xf32>
    %136 = arith.truncf %135 : vector<8x25xf32> to vector<8x25xbf16>
    %137 = arith.truncf %11 : vector<25x8xf32> to vector<25x8xbf16>
    %cst_51 = arith.constant dense<0.000000e+00> : vector<8x8xf32>
    %138 = tpu.matmul %136, %137, %cst_51 {dimension_numbers = #tpu.dot_dimension_numbers<[1], [0], [0], [1], [0, 0, 1, 1], [], []>} : vector<8x25xbf16>, vector<25x8xbf16>, vector<8x8xf32> -> vector<8x8xf32>
    %139 = vector.extract_strided_slice %10 {offsets = [0, 14], sizes = [8, 1], strides = [1, 1]} : vector<8x16xi32> to vector<8x1xi32>
    %140 = vector.broadcast %139 : vector<8x1xi32> to vector<8x25xi32>
    %141 = arith.cmpi eq, %140, %12 : vector<8x25xi32>
    %cst_52 = arith.constant 1.000000e+00 : f32
    %cst_53 = arith.constant 0.000000e+00 : f32
    %142 = vector.broadcast %cst_52 : f32 to vector<8x25xf32>
    %143 = vector.broadcast %cst_53 : f32 to vector<8x25xf32>
    %144 = arith.select %141, %142, %143 : vector<8x25xi1>, vector<8x25xf32>
    %145 = arith.truncf %144 : vector<8x25xf32> to vector<8x25xbf16>
    %146 = arith.truncf %11 : vector<25x8xf32> to vector<25x8xbf16>
    %cst_54 = arith.constant dense<0.000000e+00> : vector<8x8xf32>
    %147 = tpu.matmul %145, %146, %cst_54 {dimension_numbers = #tpu.dot_dimension_numbers<[1], [0], [0], [1], [0, 0, 1, 1], [], []>} : vector<8x25xbf16>, vector<25x8xbf16>, vector<8x8xf32> -> vector<8x8xf32>
    %148 = vector.extract_strided_slice %10 {offsets = [0, 15], sizes = [8, 1], strides = [1, 1]} : vector<8x16xi32> to vector<8x1xi32>
    %149 = vector.broadcast %148 : vector<8x1xi32> to vector<8x25xi32>
    %150 = arith.cmpi eq, %149, %12 : vector<8x25xi32>
    %cst_55 = arith.constant 1.000000e+00 : f32
    %cst_56 = arith.constant 0.000000e+00 : f32
    %151 = vector.broadcast %cst_55 : f32 to vector<8x25xf32>
    %152 = vector.broadcast %cst_56 : f32 to vector<8x25xf32>
    %153 = arith.select %150, %151, %152 : vector<8x25xi1>, vector<8x25xf32>
    %154 = arith.truncf %153 : vector<8x25xf32> to vector<8x25xbf16>
    %155 = arith.truncf %11 : vector<25x8xf32> to vector<25x8xbf16>
    %cst_57 = arith.constant dense<0.000000e+00> : vector<8x8xf32>
    %156 = tpu.matmul %154, %155, %cst_57 {dimension_numbers = #tpu.dot_dimension_numbers<[1], [0], [0], [1], [0, 0, 1, 1], [], []>} : vector<8x25xbf16>, vector<25x8xbf16>, vector<8x8xf32> -> vector<8x8xf32>
    %c0_58 = arith.constant 0 : index
    %c0_59 = arith.constant 0 : index
    %157 = vector.load %arg5[%c0_58, %c0_59] : memref<24x8xf32, #tpu.memory_space<vmem>>, vector<24x8xf32>
    %c0_60 = arith.constant 0 : index
    %c0_61 = arith.constant 0 : index
    %158 = vector.load %arg6[%c0_60, %c0_61] : memref<1x8xf32, #tpu.memory_space<vmem>>, vector<1x8xf32>
    %159 = tpu.concatenate %21, %30, %39 in 1 : vector<8x8xf32>, vector<8x8xf32>, vector<8x8xf32> -> vector<8x24xf32>
    %160 = arith.truncf %159 : vector<8x24xf32> to vector<8x24xbf16>
    %161 = arith.truncf %157 : vector<24x8xf32> to vector<24x8xbf16>
    %cst_62 = arith.constant dense<0.000000e+00> : vector<8x8xf32>
    %162 = tpu.matmul %160, %161, %cst_62 {dimension_numbers = #tpu.dot_dimension_numbers<[1], [0], [0], [1], [0, 0, 1, 1], [], []>} : vector<8x24xbf16>, vector<24x8xbf16>, vector<8x8xf32> -> vector<8x8xf32>
    %163 = vector.broadcast %158 : vector<1x8xf32> to vector<8x8xf32>
    %164 = arith.addf %162, %163 : vector<8x8xf32>
    %cst_63 = arith.constant 0.000000e+00 : f32
    %165 = vector.broadcast %cst_63 : f32 to vector<8x8xf32>
    %166 = arith.maximumf %164, %165 : vector<8x8xf32>
    %167 = tpu.concatenate %30, %39, %48 in 1 : vector<8x8xf32>, vector<8x8xf32>, vector<8x8xf32> -> vector<8x24xf32>
    %168 = arith.truncf %167 : vector<8x24xf32> to vector<8x24xbf16>
    %169 = arith.truncf %157 : vector<24x8xf32> to vector<24x8xbf16>
    %cst_64 = arith.constant dense<0.000000e+00> : vector<8x8xf32>
    %170 = tpu.matmul %168, %169, %cst_64 {dimension_numbers = #tpu.dot_dimension_numbers<[1], [0], [0], [1], [0, 0, 1, 1], [], []>} : vector<8x24xbf16>, vector<24x8xbf16>, vector<8x8xf32> -> vector<8x8xf32>
    %171 = vector.broadcast %158 : vector<1x8xf32> to vector<8x8xf32>
    %172 = arith.addf %170, %171 : vector<8x8xf32>
    %cst_65 = arith.constant 0.000000e+00 : f32
    %173 = vector.broadcast %cst_65 : f32 to vector<8x8xf32>
    %174 = arith.maximumf %172, %173 : vector<8x8xf32>
    %175 = tpu.concatenate %39, %48, %57 in 1 : vector<8x8xf32>, vector<8x8xf32>, vector<8x8xf32> -> vector<8x24xf32>
    %176 = arith.truncf %175 : vector<8x24xf32> to vector<8x24xbf16>
    %177 = arith.truncf %157 : vector<24x8xf32> to vector<24x8xbf16>
    %cst_66 = arith.constant dense<0.000000e+00> : vector<8x8xf32>
    %178 = tpu.matmul %176, %177, %cst_66 {dimension_numbers = #tpu.dot_dimension_numbers<[1], [0], [0], [1], [0, 0, 1, 1], [], []>} : vector<8x24xbf16>, vector<24x8xbf16>, vector<8x8xf32> -> vector<8x8xf32>
    %179 = vector.broadcast %158 : vector<1x8xf32> to vector<8x8xf32>
    %180 = arith.addf %178, %179 : vector<8x8xf32>
    %cst_67 = arith.constant 0.000000e+00 : f32
    %181 = vector.broadcast %cst_67 : f32 to vector<8x8xf32>
    %182 = arith.maximumf %180, %181 : vector<8x8xf32>
    %183 = tpu.concatenate %48, %57, %66 in 1 : vector<8x8xf32>, vector<8x8xf32>, vector<8x8xf32> -> vector<8x24xf32>
    %184 = arith.truncf %183 : vector<8x24xf32> to vector<8x24xbf16>
    %185 = arith.truncf %157 : vector<24x8xf32> to vector<24x8xbf16>
    %cst_68 = arith.constant dense<0.000000e+00> : vector<8x8xf32>
    %186 = tpu.matmul %184, %185, %cst_68 {dimension_numbers = #tpu.dot_dimension_numbers<[1], [0], [0], [1], [0, 0, 1, 1], [], []>} : vector<8x24xbf16>, vector<24x8xbf16>, vector<8x8xf32> -> vector<8x8xf32>
    %187 = vector.broadcast %158 : vector<1x8xf32> to vector<8x8xf32>
    %188 = arith.addf %186, %187 : vector<8x8xf32>
    %cst_69 = arith.constant 0.000000e+00 : f32
    %189 = vector.broadcast %cst_69 : f32 to vector<8x8xf32>
    %190 = arith.maximumf %188, %189 : vector<8x8xf32>
    %191 = tpu.concatenate %57, %66, %75 in 1 : vector<8x8xf32>, vector<8x8xf32>, vector<8x8xf32> -> vector<8x24xf32>
    %192 = arith.truncf %191 : vector<8x24xf32> to vector<8x24xbf16>
    %193 = arith.truncf %157 : vector<24x8xf32> to vector<24x8xbf16>
    %cst_70 = arith.constant dense<0.000000e+00> : vector<8x8xf32>
    %194 = tpu.matmul %192, %193, %cst_70 {dimension_numbers = #tpu.dot_dimension_numbers<[1], [0], [0], [1], [0, 0, 1, 1], [], []>} : vector<8x24xbf16>, vector<24x8xbf16>, vector<8x8xf32> -> vector<8x8xf32>
    %195 = vector.broadcast %158 : vector<1x8xf32> to vector<8x8xf32>
    %196 = arith.addf %194, %195 : vector<8x8xf32>
    %cst_71 = arith.constant 0.000000e+00 : f32
    %197 = vector.broadcast %cst_71 : f32 to vector<8x8xf32>
    %198 = arith.maximumf %196, %197 : vector<8x8xf32>
    %199 = tpu.concatenate %66, %75, %84 in 1 : vector<8x8xf32>, vector<8x8xf32>, vector<8x8xf32> -> vector<8x24xf32>
    %200 = arith.truncf %199 : vector<8x24xf32> to vector<8x24xbf16>
    %201 = arith.truncf %157 : vector<24x8xf32> to vector<24x8xbf16>
    %cst_72 = arith.constant dense<0.000000e+00> : vector<8x8xf32>
    %202 = tpu.matmul %200, %201, %cst_72 {dimension_numbers = #tpu.dot_dimension_numbers<[1], [0], [0], [1], [0, 0, 1, 1], [], []>} : vector<8x24xbf16>, vector<24x8xbf16>, vector<8x8xf32> -> vector<8x8xf32>
    %203 = vector.broadcast %158 : vector<1x8xf32> to vector<8x8xf32>
    %204 = arith.addf %202, %203 : vector<8x8xf32>
    %cst_73 = arith.constant 0.000000e+00 : f32
    %205 = vector.broadcast %cst_73 : f32 to vector<8x8xf32>
    %206 = arith.maximumf %204, %205 : vector<8x8xf32>
    %207 = tpu.concatenate %75, %84, %93 in 1 : vector<8x8xf32>, vector<8x8xf32>, vector<8x8xf32> -> vector<8x24xf32>
    %208 = arith.truncf %207 : vector<8x24xf32> to vector<8x24xbf16>
    %209 = arith.truncf %157 : vector<24x8xf32> to vector<24x8xbf16>
    %cst_74 = arith.constant dense<0.000000e+00> : vector<8x8xf32>
    %210 = tpu.matmul %208, %209, %cst_74 {dimension_numbers = #tpu.dot_dimension_numbers<[1], [0], [0], [1], [0, 0, 1, 1], [], []>} : vector<8x24xbf16>, vector<24x8xbf16>, vector<8x8xf32> -> vector<8x8xf32>
    %211 = vector.broadcast %158 : vector<1x8xf32> to vector<8x8xf32>
    %212 = arith.addf %210, %211 : vector<8x8xf32>
    %cst_75 = arith.constant 0.000000e+00 : f32
    %213 = vector.broadcast %cst_75 : f32 to vector<8x8xf32>
    %214 = arith.maximumf %212, %213 : vector<8x8xf32>
    %215 = tpu.concatenate %84, %93, %102 in 1 : vector<8x8xf32>, vector<8x8xf32>, vector<8x8xf32> -> vector<8x24xf32>
    %216 = arith.truncf %215 : vector<8x24xf32> to vector<8x24xbf16>
    %217 = arith.truncf %157 : vector<24x8xf32> to vector<24x8xbf16>
    %cst_76 = arith.constant dense<0.000000e+00> : vector<8x8xf32>
    %218 = tpu.matmul %216, %217, %cst_76 {dimension_numbers = #tpu.dot_dimension_numbers<[1], [0], [0], [1], [0, 0, 1, 1], [], []>} : vector<8x24xbf16>, vector<24x8xbf16>, vector<8x8xf32> -> vector<8x8xf32>
    %219 = vector.broadcast %158 : vector<1x8xf32> to vector<8x8xf32>
    %220 = arith.addf %218, %219 : vector<8x8xf32>
    %cst_77 = arith.constant 0.000000e+00 : f32
    %221 = vector.broadcast %cst_77 : f32 to vector<8x8xf32>
    %222 = arith.maximumf %220, %221 : vector<8x8xf32>
    %223 = tpu.concatenate %93, %102, %111 in 1 : vector<8x8xf32>, vector<8x8xf32>, vector<8x8xf32> -> vector<8x24xf32>
    %224 = arith.truncf %223 : vector<8x24xf32> to vector<8x24xbf16>
    %225 = arith.truncf %157 : vector<24x8xf32> to vector<24x8xbf16>
    %cst_78 = arith.constant dense<0.000000e+00> : vector<8x8xf32>
    %226 = tpu.matmul %224, %225, %cst_78 {dimension_numbers = #tpu.dot_dimension_numbers<[1], [0], [0], [1], [0, 0, 1, 1], [], []>} : vector<8x24xbf16>, vector<24x8xbf16>, vector<8x8xf32> -> vector<8x8xf32>
    %227 = vector.broadcast %158 : vector<1x8xf32> to vector<8x8xf32>
    %228 = arith.addf %226, %227 : vector<8x8xf32>
    %cst_79 = arith.constant 0.000000e+00 : f32
    %229 = vector.broadcast %cst_79 : f32 to vector<8x8xf32>
    %230 = arith.maximumf %228, %229 : vector<8x8xf32>
    %231 = tpu.concatenate %102, %111, %120 in 1 : vector<8x8xf32>, vector<8x8xf32>, vector<8x8xf32> -> vector<8x24xf32>
    %232 = arith.truncf %231 : vector<8x24xf32> to vector<8x24xbf16>
    %233 = arith.truncf %157 : vector<24x8xf32> to vector<24x8xbf16>
    %cst_80 = arith.constant dense<0.000000e+00> : vector<8x8xf32>
    %234 = tpu.matmul %232, %233, %cst_80 {dimension_numbers = #tpu.dot_dimension_numbers<[1], [0], [0], [1], [0, 0, 1, 1], [], []>} : vector<8x24xbf16>, vector<24x8xbf16>, vector<8x8xf32> -> vector<8x8xf32>
    %235 = vector.broadcast %158 : vector<1x8xf32> to vector<8x8xf32>
    %236 = arith.addf %234, %235 : vector<8x8xf32>
    %cst_81 = arith.constant 0.000000e+00 : f32
    %237 = vector.broadcast %cst_81 : f32 to vector<8x8xf32>
    %238 = arith.maximumf %236, %237 : vector<8x8xf32>
    %239 = tpu.concatenate %111, %120, %129 in 1 : vector<8x8xf32>, vector<8x8xf32>, vector<8x8xf32> -> vector<8x24xf32>
    %240 = arith.truncf %239 : vector<8x24xf32> to vector<8x24xbf16>
    %241 = arith.truncf %157 : vector<24x8xf32> to vector<24x8xbf16>
    %cst_82 = arith.constant dense<0.000000e+00> : vector<8x8xf32>
    %242 = tpu.matmul %240, %241, %cst_82 {dimension_numbers = #tpu.dot_dimension_numbers<[1], [0], [0], [1], [0, 0, 1, 1], [], []>} : vector<8x24xbf16>, vector<24x8xbf16>, vector<8x8xf32> -> vector<8x8xf32>
    %243 = vector.broadcast %158 : vector<1x8xf32> to vector<8x8xf32>
    %244 = arith.addf %242, %243 : vector<8x8xf32>
    %cst_83 = arith.constant 0.000000e+00 : f32
    %245 = vector.broadcast %cst_83 : f32 to vector<8x8xf32>
    %246 = arith.maximumf %244, %245 : vector<8x8xf32>
    %247 = tpu.concatenate %120, %129, %138 in 1 : vector<8x8xf32>, vector<8x8xf32>, vector<8x8xf32> -> vector<8x24xf32>
    %248 = arith.truncf %247 : vector<8x24xf32> to vector<8x24xbf16>
    %249 = arith.truncf %157 : vector<24x8xf32> to vector<24x8xbf16>
    %cst_84 = arith.constant dense<0.000000e+00> : vector<8x8xf32>
    %250 = tpu.matmul %248, %249, %cst_84 {dimension_numbers = #tpu.dot_dimension_numbers<[1], [0], [0], [1], [0, 0, 1, 1], [], []>} : vector<8x24xbf16>, vector<24x8xbf16>, vector<8x8xf32> -> vector<8x8xf32>
    %251 = vector.broadcast %158 : vector<1x8xf32> to vector<8x8xf32>
    %252 = arith.addf %250, %251 : vector<8x8xf32>
    %cst_85 = arith.constant 0.000000e+00 : f32
    %253 = vector.broadcast %cst_85 : f32 to vector<8x8xf32>
    %254 = arith.maximumf %252, %253 : vector<8x8xf32>
    %255 = tpu.concatenate %129, %138, %147 in 1 : vector<8x8xf32>, vector<8x8xf32>, vector<8x8xf32> -> vector<8x24xf32>
    %256 = arith.truncf %255 : vector<8x24xf32> to vector<8x24xbf16>
    %257 = arith.truncf %157 : vector<24x8xf32> to vector<24x8xbf16>
    %cst_86 = arith.constant dense<0.000000e+00> : vector<8x8xf32>
    %258 = tpu.matmul %256, %257, %cst_86 {dimension_numbers = #tpu.dot_dimension_numbers<[1], [0], [0], [1], [0, 0, 1, 1], [], []>} : vector<8x24xbf16>, vector<24x8xbf16>, vector<8x8xf32> -> vector<8x8xf32>
    %259 = vector.broadcast %158 : vector<1x8xf32> to vector<8x8xf32>
    %260 = arith.addf %258, %259 : vector<8x8xf32>
    %cst_87 = arith.constant 0.000000e+00 : f32
    %261 = vector.broadcast %cst_87 : f32 to vector<8x8xf32>
    %262 = arith.maximumf %260, %261 : vector<8x8xf32>
    %263 = tpu.concatenate %138, %147, %156 in 1 : vector<8x8xf32>, vector<8x8xf32>, vector<8x8xf32> -> vector<8x24xf32>
    %264 = arith.truncf %263 : vector<8x24xf32> to vector<8x24xbf16>
    %265 = arith.truncf %157 : vector<24x8xf32> to vector<24x8xbf16>
    %cst_88 = arith.constant dense<0.000000e+00> : vector<8x8xf32>
    %266 = tpu.matmul %264, %265, %cst_88 {dimension_numbers = #tpu.dot_dimension_numbers<[1], [0], [0], [1], [0, 0, 1, 1], [], []>} : vector<8x24xbf16>, vector<24x8xbf16>, vector<8x8xf32> -> vector<8x8xf32>
    %267 = vector.broadcast %158 : vector<1x8xf32> to vector<8x8xf32>
    %268 = arith.addf %266, %267 : vector<8x8xf32>
    %cst_89 = arith.constant 0.000000e+00 : f32
    %269 = vector.broadcast %cst_89 : f32 to vector<8x8xf32>
    %270 = arith.maximumf %268, %269 : vector<8x8xf32>
    %c0_90 = arith.constant 0 : index
    %c0_91 = arith.constant 0 : index
    %271 = vector.load %arg7[%c0_90, %c0_91] : memref<24x8xf32, #tpu.memory_space<vmem>>, vector<24x8xf32>
    %c0_92 = arith.constant 0 : index
    %c0_93 = arith.constant 0 : index
    %272 = vector.load %arg8[%c0_92, %c0_93] : memref<1x8xf32, #tpu.memory_space<vmem>>, vector<1x8xf32>
    %273 = tpu.concatenate %166, %174, %182 in 1 : vector<8x8xf32>, vector<8x8xf32>, vector<8x8xf32> -> vector<8x24xf32>
    %274 = arith.truncf %273 : vector<8x24xf32> to vector<8x24xbf16>
    %275 = arith.truncf %271 : vector<24x8xf32> to vector<24x8xbf16>
    %cst_94 = arith.constant dense<0.000000e+00> : vector<8x8xf32>
    %276 = tpu.matmul %274, %275, %cst_94 {dimension_numbers = #tpu.dot_dimension_numbers<[1], [0], [0], [1], [0, 0, 1, 1], [], []>} : vector<8x24xbf16>, vector<24x8xbf16>, vector<8x8xf32> -> vector<8x8xf32>
    %277 = vector.broadcast %272 : vector<1x8xf32> to vector<8x8xf32>
    %278 = arith.addf %276, %277 : vector<8x8xf32>
    %cst_95 = arith.constant 0.000000e+00 : f32
    %279 = vector.broadcast %cst_95 : f32 to vector<8x8xf32>
    %280 = arith.maximumf %278, %279 : vector<8x8xf32>
    %281 = tpu.concatenate %174, %182, %190 in 1 : vector<8x8xf32>, vector<8x8xf32>, vector<8x8xf32> -> vector<8x24xf32>
    %282 = arith.truncf %281 : vector<8x24xf32> to vector<8x24xbf16>
    %283 = arith.truncf %271 : vector<24x8xf32> to vector<24x8xbf16>
    %cst_96 = arith.constant dense<0.000000e+00> : vector<8x8xf32>
    %284 = tpu.matmul %282, %283, %cst_96 {dimension_numbers = #tpu.dot_dimension_numbers<[1], [0], [0], [1], [0, 0, 1, 1], [], []>} : vector<8x24xbf16>, vector<24x8xbf16>, vector<8x8xf32> -> vector<8x8xf32>
    %285 = vector.broadcast %272 : vector<1x8xf32> to vector<8x8xf32>
    %286 = arith.addf %284, %285 : vector<8x8xf32>
    %cst_97 = arith.constant 0.000000e+00 : f32
    %287 = vector.broadcast %cst_97 : f32 to vector<8x8xf32>
    %288 = arith.maximumf %286, %287 : vector<8x8xf32>
    %289 = tpu.concatenate %182, %190, %198 in 1 : vector<8x8xf32>, vector<8x8xf32>, vector<8x8xf32> -> vector<8x24xf32>
    %290 = arith.truncf %289 : vector<8x24xf32> to vector<8x24xbf16>
    %291 = arith.truncf %271 : vector<24x8xf32> to vector<24x8xbf16>
    %cst_98 = arith.constant dense<0.000000e+00> : vector<8x8xf32>
    %292 = tpu.matmul %290, %291, %cst_98 {dimension_numbers = #tpu.dot_dimension_numbers<[1], [0], [0], [1], [0, 0, 1, 1], [], []>} : vector<8x24xbf16>, vector<24x8xbf16>, vector<8x8xf32> -> vector<8x8xf32>
    %293 = vector.broadcast %272 : vector<1x8xf32> to vector<8x8xf32>
    %294 = arith.addf %292, %293 : vector<8x8xf32>
    %cst_99 = arith.constant 0.000000e+00 : f32
    %295 = vector.broadcast %cst_99 : f32 to vector<8x8xf32>
    %296 = arith.maximumf %294, %295 : vector<8x8xf32>
    %297 = tpu.concatenate %190, %198, %206 in 1 : vector<8x8xf32>, vector<8x8xf32>, vector<8x8xf32> -> vector<8x24xf32>
    %298 = arith.truncf %297 : vector<8x24xf32> to vector<8x24xbf16>
    %299 = arith.truncf %271 : vector<24x8xf32> to vector<24x8xbf16>
    %cst_100 = arith.constant dense<0.000000e+00> : vector<8x8xf32>
    %300 = tpu.matmul %298, %299, %cst_100 {dimension_numbers = #tpu.dot_dimension_numbers<[1], [0], [0], [1], [0, 0, 1, 1], [], []>} : vector<8x24xbf16>, vector<24x8xbf16>, vector<8x8xf32> -> vector<8x8xf32>
    %301 = vector.broadcast %272 : vector<1x8xf32> to vector<8x8xf32>
    %302 = arith.addf %300, %301 : vector<8x8xf32>
    %cst_101 = arith.constant 0.000000e+00 : f32
    %303 = vector.broadcast %cst_101 : f32 to vector<8x8xf32>
    %304 = arith.maximumf %302, %303 : vector<8x8xf32>
    %305 = tpu.concatenate %198, %206, %214 in 1 : vector<8x8xf32>, vector<8x8xf32>, vector<8x8xf32> -> vector<8x24xf32>
    %306 = arith.truncf %305 : vector<8x24xf32> to vector<8x24xbf16>
    %307 = arith.truncf %271 : vector<24x8xf32> to vector<24x8xbf16>
    %cst_102 = arith.constant dense<0.000000e+00> : vector<8x8xf32>
    %308 = tpu.matmul %306, %307, %cst_102 {dimension_numbers = #tpu.dot_dimension_numbers<[1], [0], [0], [1], [0, 0, 1, 1], [], []>} : vector<8x24xbf16>, vector<24x8xbf16>, vector<8x8xf32> -> vector<8x8xf32>
    %309 = vector.broadcast %272 : vector<1x8xf32> to vector<8x8xf32>
    %310 = arith.addf %308, %309 : vector<8x8xf32>
    %cst_103 = arith.constant 0.000000e+00 : f32
    %311 = vector.broadcast %cst_103 : f32 to vector<8x8xf32>
    %312 = arith.maximumf %310, %311 : vector<8x8xf32>
    %313 = tpu.concatenate %206, %214, %222 in 1 : vector<8x8xf32>, vector<8x8xf32>, vector<8x8xf32> -> vector<8x24xf32>
    %314 = arith.truncf %313 : vector<8x24xf32> to vector<8x24xbf16>
    %315 = arith.truncf %271 : vector<24x8xf32> to vector<24x8xbf16>
    %cst_104 = arith.constant dense<0.000000e+00> : vector<8x8xf32>
    %316 = tpu.matmul %314, %315, %cst_104 {dimension_numbers = #tpu.dot_dimension_numbers<[1], [0], [0], [1], [0, 0, 1, 1], [], []>} : vector<8x24xbf16>, vector<24x8xbf16>, vector<8x8xf32> -> vector<8x8xf32>
    %317 = vector.broadcast %272 : vector<1x8xf32> to vector<8x8xf32>
    %318 = arith.addf %316, %317 : vector<8x8xf32>
    %cst_105 = arith.constant 0.000000e+00 : f32
    %319 = vector.broadcast %cst_105 : f32 to vector<8x8xf32>
    %320 = arith.maximumf %318, %319 : vector<8x8xf32>
    %321 = tpu.concatenate %214, %222, %230 in 1 : vector<8x8xf32>, vector<8x8xf32>, vector<8x8xf32> -> vector<8x24xf32>
    %322 = arith.truncf %321 : vector<8x24xf32> to vector<8x24xbf16>
    %323 = arith.truncf %271 : vector<24x8xf32> to vector<24x8xbf16>
    %cst_106 = arith.constant dense<0.000000e+00> : vector<8x8xf32>
    %324 = tpu.matmul %322, %323, %cst_106 {dimension_numbers = #tpu.dot_dimension_numbers<[1], [0], [0], [1], [0, 0, 1, 1], [], []>} : vector<8x24xbf16>, vector<24x8xbf16>, vector<8x8xf32> -> vector<8x8xf32>
    %325 = vector.broadcast %272 : vector<1x8xf32> to vector<8x8xf32>
    %326 = arith.addf %324, %325 : vector<8x8xf32>
    %cst_107 = arith.constant 0.000000e+00 : f32
    %327 = vector.broadcast %cst_107 : f32 to vector<8x8xf32>
    %328 = arith.maximumf %326, %327 : vector<8x8xf32>
    %329 = tpu.concatenate %222, %230, %238 in 1 : vector<8x8xf32>, vector<8x8xf32>, vector<8x8xf32> -> vector<8x24xf32>
    %330 = arith.truncf %329 : vector<8x24xf32> to vector<8x24xbf16>
    %331 = arith.truncf %271 : vector<24x8xf32> to vector<24x8xbf16>
    %cst_108 = arith.constant dense<0.000000e+00> : vector<8x8xf32>
    %332 = tpu.matmul %330, %331, %cst_108 {dimension_numbers = #tpu.dot_dimension_numbers<[1], [0], [0], [1], [0, 0, 1, 1], [], []>} : vector<8x24xbf16>, vector<24x8xbf16>, vector<8x8xf32> -> vector<8x8xf32>
    %333 = vector.broadcast %272 : vector<1x8xf32> to vector<8x8xf32>
    %334 = arith.addf %332, %333 : vector<8x8xf32>
    %cst_109 = arith.constant 0.000000e+00 : f32
    %335 = vector.broadcast %cst_109 : f32 to vector<8x8xf32>
    %336 = arith.maximumf %334, %335 : vector<8x8xf32>
    %337 = tpu.concatenate %230, %238, %246 in 1 : vector<8x8xf32>, vector<8x8xf32>, vector<8x8xf32> -> vector<8x24xf32>
    %338 = arith.truncf %337 : vector<8x24xf32> to vector<8x24xbf16>
    %339 = arith.truncf %271 : vector<24x8xf32> to vector<24x8xbf16>
    %cst_110 = arith.constant dense<0.000000e+00> : vector<8x8xf32>
    %340 = tpu.matmul %338, %339, %cst_110 {dimension_numbers = #tpu.dot_dimension_numbers<[1], [0], [0], [1], [0, 0, 1, 1], [], []>} : vector<8x24xbf16>, vector<24x8xbf16>, vector<8x8xf32> -> vector<8x8xf32>
    %341 = vector.broadcast %272 : vector<1x8xf32> to vector<8x8xf32>
    %342 = arith.addf %340, %341 : vector<8x8xf32>
    %cst_111 = arith.constant 0.000000e+00 : f32
    %343 = vector.broadcast %cst_111 : f32 to vector<8x8xf32>
    %344 = arith.maximumf %342, %343 : vector<8x8xf32>
    %345 = tpu.concatenate %238, %246, %254 in 1 : vector<8x8xf32>, vector<8x8xf32>, vector<8x8xf32> -> vector<8x24xf32>
    %346 = arith.truncf %345 : vector<8x24xf32> to vector<8x24xbf16>
    %347 = arith.truncf %271 : vector<24x8xf32> to vector<24x8xbf16>
    %cst_112 = arith.constant dense<0.000000e+00> : vector<8x8xf32>
    %348 = tpu.matmul %346, %347, %cst_112 {dimension_numbers = #tpu.dot_dimension_numbers<[1], [0], [0], [1], [0, 0, 1, 1], [], []>} : vector<8x24xbf16>, vector<24x8xbf16>, vector<8x8xf32> -> vector<8x8xf32>
    %349 = vector.broadcast %272 : vector<1x8xf32> to vector<8x8xf32>
    %350 = arith.addf %348, %349 : vector<8x8xf32>
    %cst_113 = arith.constant 0.000000e+00 : f32
    %351 = vector.broadcast %cst_113 : f32 to vector<8x8xf32>
    %352 = arith.maximumf %350, %351 : vector<8x8xf32>
    %353 = tpu.concatenate %246, %254, %262 in 1 : vector<8x8xf32>, vector<8x8xf32>, vector<8x8xf32> -> vector<8x24xf32>
    %354 = arith.truncf %353 : vector<8x24xf32> to vector<8x24xbf16>
    %355 = arith.truncf %271 : vector<24x8xf32> to vector<24x8xbf16>
    %cst_114 = arith.constant dense<0.000000e+00> : vector<8x8xf32>
    %356 = tpu.matmul %354, %355, %cst_114 {dimension_numbers = #tpu.dot_dimension_numbers<[1], [0], [0], [1], [0, 0, 1, 1], [], []>} : vector<8x24xbf16>, vector<24x8xbf16>, vector<8x8xf32> -> vector<8x8xf32>
    %357 = vector.broadcast %272 : vector<1x8xf32> to vector<8x8xf32>
    %358 = arith.addf %356, %357 : vector<8x8xf32>
    %cst_115 = arith.constant 0.000000e+00 : f32
    %359 = vector.broadcast %cst_115 : f32 to vector<8x8xf32>
    %360 = arith.maximumf %358, %359 : vector<8x8xf32>
    %361 = tpu.concatenate %254, %262, %270 in 1 : vector<8x8xf32>, vector<8x8xf32>, vector<8x8xf32> -> vector<8x24xf32>
    %362 = arith.truncf %361 : vector<8x24xf32> to vector<8x24xbf16>
    %363 = arith.truncf %271 : vector<24x8xf32> to vector<24x8xbf16>
    %cst_116 = arith.constant dense<0.000000e+00> : vector<8x8xf32>
    %364 = tpu.matmul %362, %363, %cst_116 {dimension_numbers = #tpu.dot_dimension_numbers<[1], [0], [0], [1], [0, 0, 1, 1], [], []>} : vector<8x24xbf16>, vector<24x8xbf16>, vector<8x8xf32> -> vector<8x8xf32>
    %365 = vector.broadcast %272 : vector<1x8xf32> to vector<8x8xf32>
    %366 = arith.addf %364, %365 : vector<8x8xf32>
    %cst_117 = arith.constant 0.000000e+00 : f32
    %367 = vector.broadcast %cst_117 : f32 to vector<8x8xf32>
    %368 = arith.maximumf %366, %367 : vector<8x8xf32>
    %369 = arith.maximumf %280, %288 : vector<8x8xf32>
    %370 = arith.maximumf %369, %296 : vector<8x8xf32>
    %371 = arith.maximumf %370, %304 : vector<8x8xf32>
    %372 = arith.maximumf %371, %312 : vector<8x8xf32>
    %373 = arith.maximumf %372, %320 : vector<8x8xf32>
    %374 = arith.maximumf %373, %328 : vector<8x8xf32>
    %375 = arith.maximumf %374, %336 : vector<8x8xf32>
    %376 = arith.maximumf %375, %344 : vector<8x8xf32>
    %377 = arith.maximumf %376, %352 : vector<8x8xf32>
    %378 = arith.maximumf %377, %360 : vector<8x8xf32>
    %379 = arith.maximumf %378, %368 : vector<8x8xf32>
    %c0_118 = arith.constant 0 : index
    %c0_119 = arith.constant 0 : index
    %380 = vector.load %arg9[%c0_118, %c0_119] : memref<8x32xf32, #tpu.memory_space<vmem>>, vector<8x32xf32>
    %381 = arith.truncf %379 : vector<8x8xf32> to vector<8x8xbf16>
    %382 = arith.truncf %380 : vector<8x32xf32> to vector<8x32xbf16>
    %cst_120 = arith.constant dense<0.000000e+00> : vector<8x32xf32>
    %383 = tpu.matmul %381, %382, %cst_120 {dimension_numbers = #tpu.dot_dimension_numbers<[1], [0], [0], [1], [0, 0, 1, 1], [], []>} : vector<8x8xbf16>, vector<8x32xbf16>, vector<8x32xf32> -> vector<8x32xf32>
    %c0_121 = arith.constant 0 : index
    %c0_122 = arith.constant 0 : index
    %384 = vector.load %arg10[%c0_121, %c0_122] : memref<1x32xf32, #tpu.memory_space<vmem>>, vector<1x32xf32>
    %385 = vector.broadcast %384 : vector<1x32xf32> to vector<8x32xf32>
    %386 = arith.addf %383, %385 : vector<8x32xf32>
    %cst_123 = arith.constant 0.000000e+00 : f32
    %387 = vector.broadcast %cst_123 : f32 to vector<8x32xf32>
    %388 = arith.maximumf %386, %387 : vector<8x32xf32>
    %c0_124 = arith.constant 0 : index
    %c0_125 = arith.constant 0 : index
    %389 = vector.load %arg11[%c0_124, %c0_125] : memref<8x8xf32, #tpu.memory_space<vmem>>, vector<8x8xf32>
    %c0_126 = arith.constant 0 : index
    %c0_127 = arith.constant 0 : index
    %390 = vector.load %arg12[%c0_126, %c0_127] : memref<8x8xf32, #tpu.memory_space<vmem>>, vector<8x8xf32>
    %c0_128 = arith.constant 0 : index
    %c0_129 = arith.constant 0 : index
    %391 = vector.load %arg13[%c0_128, %c0_129] : memref<8x8xf32, #tpu.memory_space<vmem>>, vector<8x8xf32>
    %c0_130 = arith.constant 0 : index
    %c0_131 = arith.constant 0 : index
    %392 = vector.load %arg14[%c0_130, %c0_131] : memref<8x8xf32, #tpu.memory_space<vmem>>, vector<8x8xf32>
    %c0_132 = arith.constant 0 : index
    %c0_133 = arith.constant 0 : index
    %393 = vector.load %arg15[%c0_132, %c0_133] : memref<32x32xf32, #tpu.memory_space<vmem>>, vector<32x32xf32>
    %c0_134 = arith.constant 0 : index
    %c0_135 = arith.constant 0 : index
    %394 = vector.load %arg16[%c0_134, %c0_135] : memref<1x32xf32, #tpu.memory_space<vmem>>, vector<1x32xf32>
    %c0_136 = arith.constant 0 : index
    %c0_137 = arith.constant 0 : index
    %395 = vector.load %arg17[%c0_136, %c0_137] : memref<32x32xf32, #tpu.memory_space<vmem>>, vector<32x32xf32>
    %c0_138 = arith.constant 0 : index
    %c0_139 = arith.constant 0 : index
    %396 = vector.load %arg18[%c0_138, %c0_139] : memref<1x32xf32, #tpu.memory_space<vmem>>, vector<1x32xf32>
    %c0_140 = arith.constant 0 : index
    %c0_141 = arith.constant 0 : index
    %397 = vector.load %arg19[%c0_140, %c0_141] : memref<32x32xf32, #tpu.memory_space<vmem>>, vector<32x32xf32>
    %c0_142 = arith.constant 0 : index
    %c0_143 = arith.constant 0 : index
    %398 = vector.load %arg20[%c0_142, %c0_143] : memref<1x32xf32, #tpu.memory_space<vmem>>, vector<1x32xf32>
    %c0_144 = arith.constant 0 : index
    %c0_145 = arith.constant 0 : index
    %399 = vector.load %arg21[%c0_144, %c0_145] : memref<32x32xf32, #tpu.memory_space<vmem>>, vector<32x32xf32>
    %c0_146 = arith.constant 0 : index
    %c0_147 = arith.constant 0 : index
    %400 = vector.load %arg22[%c0_146, %c0_147] : memref<1x32xf32, #tpu.memory_space<vmem>>, vector<1x32xf32>
    %401 = arith.truncf %389 : vector<8x8xf32> to vector<8x8xbf16>
    %402 = arith.truncf %9 : vector<8x32xf32> to vector<8x32xbf16>
    %cst_148 = arith.constant dense<0.000000e+00> : vector<8x32xf32>
    %403 = tpu.matmul %401, %402, %cst_148 {dimension_numbers = #tpu.dot_dimension_numbers<[1], [0], [0], [1], [0, 0, 1, 1], [], []>} : vector<8x8xbf16>, vector<8x32xbf16>, vector<8x32xf32> -> vector<8x32xf32>
    %404 = arith.truncf %403 : vector<8x32xf32> to vector<8x32xbf16>
    %405 = arith.truncf %393 : vector<32x32xf32> to vector<32x32xbf16>
    %cst_149 = arith.constant dense<0.000000e+00> : vector<8x32xf32>
    %406 = tpu.matmul %404, %405, %cst_149 {dimension_numbers = #tpu.dot_dimension_numbers<[1], [0], [0], [1], [0, 0, 1, 1], [], []>} : vector<8x32xbf16>, vector<32x32xbf16>, vector<8x32xf32> -> vector<8x32xf32>
    %407 = vector.broadcast %394 : vector<1x32xf32> to vector<8x32xf32>
    %408 = arith.addf %406, %407 : vector<8x32xf32>
    %cst_150 = arith.constant 0.000000e+00 : f32
    %409 = vector.broadcast %cst_150 : f32 to vector<8x32xf32>
    %410 = arith.maximumf %408, %409 : vector<8x32xf32>
    %411 = arith.truncf %390 : vector<8x8xf32> to vector<8x8xbf16>
    %412 = arith.truncf %388 : vector<8x32xf32> to vector<8x32xbf16>
    %cst_151 = arith.constant dense<0.000000e+00> : vector<8x32xf32>
    %413 = tpu.matmul %411, %412, %cst_151 {dimension_numbers = #tpu.dot_dimension_numbers<[1], [0], [0], [1], [0, 0, 1, 1], [], []>} : vector<8x8xbf16>, vector<8x32xbf16>, vector<8x32xf32> -> vector<8x32xf32>
    %414 = arith.truncf %413 : vector<8x32xf32> to vector<8x32xbf16>
    %415 = arith.truncf %395 : vector<32x32xf32> to vector<32x32xbf16>
    %cst_152 = arith.constant dense<0.000000e+00> : vector<8x32xf32>
    %416 = tpu.matmul %414, %415, %cst_152 {dimension_numbers = #tpu.dot_dimension_numbers<[1], [0], [0], [1], [0, 0, 1, 1], [], []>} : vector<8x32xbf16>, vector<32x32xbf16>, vector<8x32xf32> -> vector<8x32xf32>
    %417 = vector.broadcast %396 : vector<1x32xf32> to vector<8x32xf32>
    %418 = arith.addf %416, %417 : vector<8x32xf32>
    %cst_153 = arith.constant 0.000000e+00 : f32
    %419 = vector.broadcast %cst_153 : f32 to vector<8x32xf32>
    %420 = arith.maximumf %418, %419 : vector<8x32xf32>
    %421 = arith.truncf %391 : vector<8x8xf32> to vector<8x8xbf16>
    %422 = arith.truncf %420 : vector<8x32xf32> to vector<8x32xbf16>
    %cst_154 = arith.constant dense<0.000000e+00> : vector<8x32xf32>
    %423 = tpu.matmul %421, %422, %cst_154 {dimension_numbers = #tpu.dot_dimension_numbers<[1], [0], [0], [1], [0, 0, 1, 1], [], []>} : vector<8x8xbf16>, vector<8x32xbf16>, vector<8x32xf32> -> vector<8x32xf32>
    %424 = arith.truncf %423 : vector<8x32xf32> to vector<8x32xbf16>
    %425 = arith.truncf %397 : vector<32x32xf32> to vector<32x32xbf16>
    %cst_155 = arith.constant dense<0.000000e+00> : vector<8x32xf32>
    %426 = tpu.matmul %424, %425, %cst_155 {dimension_numbers = #tpu.dot_dimension_numbers<[1], [0], [0], [1], [0, 0, 1, 1], [], []>} : vector<8x32xbf16>, vector<32x32xbf16>, vector<8x32xf32> -> vector<8x32xf32>
    %427 = vector.broadcast %398 : vector<1x32xf32> to vector<8x32xf32>
    %428 = arith.addf %426, %427 : vector<8x32xf32>
    %cst_156 = arith.constant 0.000000e+00 : f32
    %429 = vector.broadcast %cst_156 : f32 to vector<8x32xf32>
    %430 = arith.maximumf %428, %429 : vector<8x32xf32>
    %431 = arith.truncf %392 : vector<8x8xf32> to vector<8x8xbf16>
    %432 = arith.truncf %410 : vector<8x32xf32> to vector<8x32xbf16>
    %cst_157 = arith.constant dense<0.000000e+00> : vector<8x32xf32>
    %433 = tpu.matmul %431, %432, %cst_157 {dimension_numbers = #tpu.dot_dimension_numbers<[1], [0], [0], [1], [0, 0, 1, 1], [], []>} : vector<8x8xbf16>, vector<8x32xbf16>, vector<8x32xf32> -> vector<8x32xf32>
    %434 = arith.truncf %433 : vector<8x32xf32> to vector<8x32xbf16>
    %435 = arith.truncf %399 : vector<32x32xf32> to vector<32x32xbf16>
    %cst_158 = arith.constant dense<0.000000e+00> : vector<8x32xf32>
    %436 = tpu.matmul %434, %435, %cst_158 {dimension_numbers = #tpu.dot_dimension_numbers<[1], [0], [0], [1], [0, 0, 1, 1], [], []>} : vector<8x32xbf16>, vector<32x32xbf16>, vector<8x32xf32> -> vector<8x32xf32>
    %437 = vector.broadcast %400 : vector<1x32xf32> to vector<8x32xf32>
    %438 = arith.addf %436, %437 : vector<8x32xf32>
    %cst_159 = arith.constant 0.000000e+00 : f32
    %439 = vector.broadcast %cst_159 : f32 to vector<8x32xf32>
    %440 = arith.maximumf %438, %439 : vector<8x32xf32>
    %441 = arith.truncf %389 : vector<8x8xf32> to vector<8x8xbf16>
    %442 = arith.truncf %430 : vector<8x32xf32> to vector<8x32xbf16>
    %cst_160 = arith.constant dense<0.000000e+00> : vector<8x32xf32>
    %443 = tpu.matmul %441, %442, %cst_160 {dimension_numbers = #tpu.dot_dimension_numbers<[1], [0], [0], [1], [0, 0, 1, 1], [], []>} : vector<8x8xbf16>, vector<8x32xbf16>, vector<8x32xf32> -> vector<8x32xf32>
    %444 = arith.truncf %443 : vector<8x32xf32> to vector<8x32xbf16>
    %445 = arith.truncf %393 : vector<32x32xf32> to vector<32x32xbf16>
    %cst_161 = arith.constant dense<0.000000e+00> : vector<8x32xf32>
    %446 = tpu.matmul %444, %445, %cst_161 {dimension_numbers = #tpu.dot_dimension_numbers<[1], [0], [0], [1], [0, 0, 1, 1], [], []>} : vector<8x32xbf16>, vector<32x32xbf16>, vector<8x32xf32> -> vector<8x32xf32>
    %447 = vector.broadcast %394 : vector<1x32xf32> to vector<8x32xf32>
    %448 = arith.addf %446, %447 : vector<8x32xf32>
    %cst_162 = arith.constant 0.000000e+00 : f32
    %449 = vector.broadcast %cst_162 : f32 to vector<8x32xf32>
    %450 = arith.maximumf %448, %449 : vector<8x32xf32>
    %451 = arith.truncf %390 : vector<8x8xf32> to vector<8x8xbf16>
    %452 = arith.truncf %440 : vector<8x32xf32> to vector<8x32xbf16>
    %cst_163 = arith.constant dense<0.000000e+00> : vector<8x32xf32>
    %453 = tpu.matmul %451, %452, %cst_163 {dimension_numbers = #tpu.dot_dimension_numbers<[1], [0], [0], [1], [0, 0, 1, 1], [], []>} : vector<8x8xbf16>, vector<8x32xbf16>, vector<8x32xf32> -> vector<8x32xf32>
    %454 = arith.truncf %453 : vector<8x32xf32> to vector<8x32xbf16>
    %455 = arith.truncf %395 : vector<32x32xf32> to vector<32x32xbf16>
    %cst_164 = arith.constant dense<0.000000e+00> : vector<8x32xf32>
    %456 = tpu.matmul %454, %455, %cst_164 {dimension_numbers = #tpu.dot_dimension_numbers<[1], [0], [0], [1], [0, 0, 1, 1], [], []>} : vector<8x32xbf16>, vector<32x32xbf16>, vector<8x32xf32> -> vector<8x32xf32>
    %457 = vector.broadcast %396 : vector<1x32xf32> to vector<8x32xf32>
    %458 = arith.addf %456, %457 : vector<8x32xf32>
    %cst_165 = arith.constant 0.000000e+00 : f32
    %459 = vector.broadcast %cst_165 : f32 to vector<8x32xf32>
    %460 = arith.maximumf %458, %459 : vector<8x32xf32>
    %461 = arith.truncf %391 : vector<8x8xf32> to vector<8x8xbf16>
    %462 = arith.truncf %460 : vector<8x32xf32> to vector<8x32xbf16>
    %cst_166 = arith.constant dense<0.000000e+00> : vector<8x32xf32>
    %463 = tpu.matmul %461, %462, %cst_166 {dimension_numbers = #tpu.dot_dimension_numbers<[1], [0], [0], [1], [0, 0, 1, 1], [], []>} : vector<8x8xbf16>, vector<8x32xbf16>, vector<8x32xf32> -> vector<8x32xf32>
    %464 = arith.truncf %463 : vector<8x32xf32> to vector<8x32xbf16>
    %465 = arith.truncf %397 : vector<32x32xf32> to vector<32x32xbf16>
    %cst_167 = arith.constant dense<0.000000e+00> : vector<8x32xf32>
    %466 = tpu.matmul %464, %465, %cst_167 {dimension_numbers = #tpu.dot_dimension_numbers<[1], [0], [0], [1], [0, 0, 1, 1], [], []>} : vector<8x32xbf16>, vector<32x32xbf16>, vector<8x32xf32> -> vector<8x32xf32>
    %467 = vector.broadcast %398 : vector<1x32xf32> to vector<8x32xf32>
    %468 = arith.addf %466, %467 : vector<8x32xf32>
    %cst_168 = arith.constant 0.000000e+00 : f32
    %469 = vector.broadcast %cst_168 : f32 to vector<8x32xf32>
    %470 = arith.maximumf %468, %469 : vector<8x32xf32>
    %471 = arith.truncf %392 : vector<8x8xf32> to vector<8x8xbf16>
    %472 = arith.truncf %450 : vector<8x32xf32> to vector<8x32xbf16>
    %cst_169 = arith.constant dense<0.000000e+00> : vector<8x32xf32>
    %473 = tpu.matmul %471, %472, %cst_169 {dimension_numbers = #tpu.dot_dimension_numbers<[1], [0], [0], [1], [0, 0, 1, 1], [], []>} : vector<8x8xbf16>, vector<8x32xbf16>, vector<8x32xf32> -> vector<8x32xf32>
    %474 = arith.truncf %473 : vector<8x32xf32> to vector<8x32xbf16>
    %475 = arith.truncf %399 : vector<32x32xf32> to vector<32x32xbf16>
    %cst_170 = arith.constant dense<0.000000e+00> : vector<8x32xf32>
    %476 = tpu.matmul %474, %475, %cst_170 {dimension_numbers = #tpu.dot_dimension_numbers<[1], [0], [0], [1], [0, 0, 1, 1], [], []>} : vector<8x32xbf16>, vector<32x32xbf16>, vector<8x32xf32> -> vector<8x32xf32>
    %477 = vector.broadcast %400 : vector<1x32xf32> to vector<8x32xf32>
    %478 = arith.addf %476, %477 : vector<8x32xf32>
    %cst_171 = arith.constant 0.000000e+00 : f32
    %479 = vector.broadcast %cst_171 : f32 to vector<8x32xf32>
    %480 = arith.maximumf %478, %479 : vector<8x32xf32>
    %c0_172 = arith.constant 0 : index
    %c0_173 = arith.constant 0 : index
    %481 = vector.load %arg23[%c0_172, %c0_173] : memref<8x32xf32, #tpu.memory_space<vmem>>, vector<8x32xf32>
    tpu.vector_store %arg23[%c0_172, %c0_173], %470 {strides = array<i32>} : memref<8x32xf32, #tpu.memory_space<vmem>>, vector<8x32xf32>,
    %c0_174 = arith.constant 0 : index
    %c0_175 = arith.constant 0 : index
    %482 = vector.load %arg24[%c0_174, %c0_175] : memref<8x32xf32, #tpu.memory_space<vmem>>, vector<8x32xf32>
    tpu.vector_store %arg24[%c0_174, %c0_175], %480 {strides = array<i32>} : memref<8x32xf32, #tpu.memory_space<vmem>>, vector<8x32xf32>,
    %c0_176 = arith.constant 0 : index
    %c0_177 = arith.constant 0 : index
    %483 = vector.load %arg25[%c0_176, %c0_177] : memref<8x32xf32, #tpu.memory_space<vmem>>, vector<8x32xf32>
    tpu.vector_store %arg25[%c0_176, %c0_177], %9 {strides = array<i32>} : memref<8x32xf32, #tpu.memory_space<vmem>>, vector<8x32xf32>,
    %c0_178 = arith.constant 0 : index
    %c0_179 = arith.constant 0 : index
    %484 = vector.load %arg26[%c0_178, %c0_179] : memref<8x32xf32, #tpu.memory_space<vmem>>, vector<8x32xf32>
    tpu.vector_store %arg26[%c0_178, %c0_179], %388 {strides = array<i32>} : memref<8x32xf32, #tpu.memory_space<vmem>>, vector<8x32xf32>,
    return
  }
}

</mosaic_0001>

<bundles_post_ra>
// kernel: tpu_custom_call.1
= control target key start
LH: loop header
LB: loop body
LE: loop exit
PB: predicated region body
PF: predicated region fallthrough
CT: control target
= control target key end

     0   :  { %s5336_s0 = inlined_call_operand.vmem [shape: f32[8,64], index: 0, kind: input, shape index: {}]   ;;  %s5337_s1 = inlined_call_operand.vmem [shape: s32[8,16], index: 1, kind: input, shape index: {}]   ;;  %s5338_s2 = inlined_call_operand.vmem [shape: f32[64,32], index: 2, kind: input, shape index: {}]   ;;  %s5339_s3 = inlined_call_operand.vmem [shape: f32[1,32], index: 3, kind: input, shape index: {}]   ;;  %s5340_s4 = inlined_call_operand.vmem [shape: f32[25,8], index: 4, kind: input, shape index: {}]   ;;  %s5341_s5 = inlined_call_operand.vmem [shape: f32[24,8], index: 5, kind: input, shape index: {}]   ;;  %s5342_s6 = inlined_call_operand.vmem [shape: f32[1,8], index: 6, kind: input, shape index: {}]   ;;  %s5343_s7 = inlined_call_operand.vmem [shape: f32[24,8], index: 7, kind: input, shape index: {}]   ;;  %s5344_s8 = inlined_call_operand.vmem [shape: f32[1,8], index: 8, kind: input, shape index: {}]   ;;  %s5345_s9 = inlined_call_operand.vmem [shape: f32[8,32], index: 9, kind: input, shape index: {}]   ;;  %s5346_s10 = inlined_call_operand.vmem [shape: f32[1,32], index: 10, kind: input, shape index: {}]   ;;  %s5347_s11 = inlined_call_operand.vmem [shape: f32[8,8], index: 11, kind: input, shape index: {}]   ;;  %s5348_s12 = inlined_call_operand.vmem [shape: f32[8,8], index: 12, kind: input, shape index: {}]   ;;  %s5349_s13 = inlined_call_operand.vmem [shape: f32[8,8], index: 13, kind: input, shape index: {}]   ;;  %s5350_s14 = inlined_call_operand.vmem [shape: f32[8,8], index: 14, kind: input, shape index: {}]   ;;  %s5351_s15 = inlined_call_operand.vmem [shape: f32[32,32], index: 15, kind: input, shape index: {}]   ;;  %s5352_s16 = inlined_call_operand.vmem [shape: f32[1,32], index: 16, kind: input, shape index: {}]   ;;  %s5353_s17 = inlined_call_operand.vmem [shape: f32[32,32], index: 17, kind: input, shape index: {}]   ;;  %s5354_s18 = inlined_call_operand.vmem [shape: f32[1,32], index: 18, kind: input, shape index: {}]   ;;  %s5355_s19 = inlined_call_operand.vmem [shape: f32[32,32], index: 19, kind: input, shape index: {}]   ;;  %s5356_s20 = inlined_call_operand.vmem [shape: f32[1,32], index: 20, kind: input, shape index: {}]   ;;  %s5357_s21 = inlined_call_operand.vmem [shape: f32[32,32], index: 21, kind: input, shape index: {}]   ;;  %s5358_s22 = inlined_call_operand.vmem [shape: f32[1,32], index: 22, kind: input, shape index: {}]   ;;  %s5359_s23 = inlined_call_operand.hbm [shape: f32[8,32], index: 23, kind: output, shape index: {0}]   ;;  %s5360_s24 = inlined_call_operand.hbm [shape: f32[8,32], index: 24, kind: output, shape index: {1}]   ;;  %s5361_s25 = inlined_call_operand.hbm [shape: f32[8,32], index: 25, kind: output, shape index: {2}]   ;;  %s5362_s26 = inlined_call_operand.hbm [shape: f32[8,32], index: 26, kind: output, shape index: {3}]  }
   0x1   :  { %5367 = sst [smem:[#allocation12_spill]] %s5336_s0 }
   0x2   :  { %5368 = sst [smem:[#allocation13_spill]] %s5337_s1 }
   0x3   :  { %5369 = sst [smem:[#allocation14_spill]] %s5338_s2 }
   0x4   :  { %5370 = sst [smem:[#allocation15_spill]] %s5339_s3 }
   0x5   :  { %5371 = sst [smem:[#allocation16_spill]] %s5340_s4 }
   0x6   :  { %5372 = sst [smem:[#allocation17_spill]] %s5341_s5 }
   0x7   :  { %5373 = sst [smem:[#allocation18_spill]] %s5342_s6 }
   0x8   :  { %5374 = sst [smem:[#allocation19_spill]] %s5343_s7 }
   0x9   :  { %5375 = sst [smem:[#allocation20_spill]] %s5344_s8 }
   0xa   :  { %5376 = sst [smem:[#allocation21_spill]] %s5345_s9 }
   0xb   :  { %5377 = sst [smem:[#allocation22_spill]] %s5346_s10 }
   0xc   :  { %32 = vsyncpa [#allocation3], 0 }
   0xd   :  { %33 = vsyncpa [#allocation5], 0  ;;  %s5378_s7 = sld [smem:[#allocation13_spill]]  ;;  %v4208_v1 = vmov 0   ;;  %v4209_v2 = vmov 2   ;;  %s5379_s4 = sld [smem:[#allocation14_spill]] }
   0xe   :  { %4032 = vset.pattern.permute.xlu0 %v4208_v1  ;;  %4034 = vset.pattern.permute.xlu1 %v4209_v2  ;;  %s5380_s2 = sld [smem:[#allocation16_spill]]  ;;  %v4210_v8 = vmov 0.0   ;;  %v4211_v12 = vmov 3   ;;  %v4212_v13 = vmov 1   ;;  %vm167_vm0 = vcmask 1043456  }
   0xf   :  { %3541 = vmatprep.subr.bf16.mxu0 %v4210_v8  ;;  %3553 = vmatprep.subr.bf16.mxu1 %v4210_v8 }
  0x13   :  { %v4371_v0 = vld [vmem:[%s5378_s7] sm:$0xff]  ;;  %v84_v4 = vld [vmem:[%s5379_s4 + $0x8] sm:$0xff]  ;;  %v85_v14 = vld [vmem:[%s5379_s4 + $0x10] sm:$0xff] }
  0x14   :  { %v83_v3 = vld [vmem:[%s5379_s4] sm:$0xff]  ;;  %156 = vperm.xlu0 %4032, %v4371_v0   ;;  %264 = vperm.xlu1 %4034, %v4371_v0   ;;  %v150_v7 = vld [vmem:[%s5380_s2 + $0x8] sm:$0xff]  ;;  %v151_v10 = vld [vmem:[%s5380_s2 + $0x10] sm:$0xff] }
  0x15   :  { %v92_v5 = vpack.c.bf16 %v84_v4, %v83_v3  ;;  %v149_v6 = vld [vmem:[%s5380_s2] sm:$0xff]  ;;  %v152_v11 = vld [vmem:[%s5380_s2 + $0x18] sm:$0x1] }
  0x16   :  { %v4389_v9 = vpack.c.bf16 %v150_v7, %v149_v6  ;;  %v86_v15 = vld [vmem:[%s5379_s4 + $0x18] sm:$0xff]  ;;  %v162_v16 = vpack.c.bf16 %v152_v11, %v151_v10 }
  0x18   :  { %4035 = vset.pattern.permute.xlu1 %v4211_v12  ;;  %4033 = vset.pattern.permute.xlu0 %v4212_v13 }
  0x19   :  { %34 = vsyncpa [#allocation8], 0  ;;  %313 = vperm.xlu1 %4035, %v4371_v0   ;;  %215 = vperm.xlu0 %4033, %v4371_v0   ;;  %vm168_vm1 = vcmask 1044480   ;;  %v4213_v17 = vmov 65535   ;;  %v93_v19 = vpack.c.bf16 %v86_v15, %v85_v14  ;;  %vm4214_vm2 = vmmov 0   ;;  %v87_v24 = vld [vmem:[%s5379_s4 + $0x20] sm:$0xff] }
  0x1a   :  { %3542 = vmatpush3.bf16.msra.mxu0 %v92_v5  ;;  %3554 = vmatpush3.bf16.msra.mxu1 %v4389_v9  ;;  %v169_v18 = vsel %vm167_vm0, 4294967295, %v4213_v17  ;;  %v4215_v22 = vmov 4   ;;  %v4216_v23 = vmov 5   ;;  %v88_v25 = vld [vmem:[%s5379_s4 + $0x28] sm:$0xff]  ;;  %v4217_v27 = vmov 6   ;;  %v89_v29 = vld [vmem:[%s5379_s4 + $0x30] sm:$0xff] }
  0x1b   :  { %3543 = vmatprep.subr.bf16.mxu0 %v4210_v8  ;;  %3549 = vmatprep.mubr.msk.bf16.mxu0 %vm4214_vm2, %v4210_v8  ;;  %v170_v20 = vsel %vm168_vm1, %v169_v18, 0  ;;  %v94_v26 = vpack.c.bf16 %v88_v25, %v87_v24  ;;  %v4218_v28 = vmov 8   ;;  %v90_v30 = vld [vmem:[%s5379_s4 + $0x38] sm:$0xff]  ;;  %v4219_v32 = vmov 7   ;;  %s5381_s7 = sld [smem:[#allocation12_spill]]  ;;  %s5382_s8 = sld [smem:[#allocation15_spill]] }
  0x1c   :  { %3555 = vmatprep.subr.bf16.mxu1 %v4210_v8  ;;  %v4411_v21 = vand.u32 %v170_v20, %v162_v16  ;;  %3557 = vmatprep.mubr.msk.bf16.mxu1 %vm4214_vm2, %v4210_v8  ;;  %v95_v31 = vpack.c.bf16 %v90_v30, %v89_v29  ;;  %v4220_v33 = vmov 11   ;;  %vm103_vm3 = vcmask 523264   ;;  %s5383_s9 = sld [smem:[#allocation17_spill]]  ;;  %s4227_s6 = smov 16  }
  0x1d   :  { %4036 = vset.pattern.permute.xlu1 %v4215_v22  ;;  %4037 = vset.pattern.permute.xlu0 %v4216_v23  ;;  %v4221_v36 = vmov 9   ;;  %v4222_v37 = vmov 14   ;;  %v4223_v38 = vmov 10   ;;  %v4224_v39 = vmov 15   ;;  %s4228_s1 = smov 8   ;;  %s5386_s10 = sld [smem:[#allocation21_spill]] }
  0x1e   :  { %362 = vperm.xlu1 %4036, %v4371_v0   ;;  %411 = vperm.xlu0 %4037, %v4371_v0   ;;  %v4225_v40 = vmov 12   ;;  %v4226_v41 = vmov 13   ;;  %v153_v42 = vlaneseq  ;;  %vm163_vm6 = vcmask 203776   ;;  %s5387_s27 = sld [smem:[#allocation20_spill]] }
  0x1f   :  { %3544 = vmatpush3.bf16.msra.mxu0 %v93_v19  ;;  %3556 = vmatpush3.bf16.msra.mxu1 %v4411_v21 }
  0x20   :  { %3545 = vmatprep.subr.bf16.mxu0 %v4210_v8  ;;  %3561 = vmatprep.subr.bf16.mxu1 %v4210_v8  ;;  %v4453_v43 = vand.u32 127, %v153_v42 }
  0x21   :  { %v82_v34 = vld [vmem:[%s5381_s7] sm:$0xff]  ;;  %s5384_s7 = sld [smem:[#allocation18_spill]] }
  0x22   :  { %4038 = vset.pattern.permute.xlu1 %v4217_v27  ;;  %4040 = vset.pattern.permute.xlu0 %v4218_v28  ;;  %v91_v35 = vpack.c.bf16 %v82_v34, %v82_v34 }
  0x23   :  { %460 = vperm.xlu1 %4038, %v4371_v0   ;;  %558 = vperm.xlu0 %4040, %v4371_v0  }
  0x24   :  { %3546 = vmatpush3.bf16.msra.mxu0 %v94_v26 }
  0x25   :  { %3547 = vmatprep.subr.bf16.mxu0 %v4210_v8 }
  0x27   :  { %4039 = vset.pattern.permute.xlu1 %v4219_v32  ;;  %4043 = vset.pattern.permute.xlu0 %v4220_v33 }
  0x28   :  { %509 = vperm.xlu1 %4039, %v4371_v0   ;;  %705 = vperm.xlu0 %4043, %v4371_v0  }
  0x29   :  { %3548 = vmatpush3.bf16.msra.mxu0 %v95_v31 }
  0x2a   :  { %3569 = vmatprep.subr.bf16.mxu0 %v4210_v8 }
  0x2c   :  { %4041 = vset.pattern.permute.xlu1 %v4221_v36  ;;  %4046 = vset.pattern.permute.xlu0 %v4222_v37  ;;  %v950_v37 = vld [vmem:[%s5383_s9 + $0x8] sm:$0xff] }
  0x2d   :  { %607 = vperm.xlu1 %4041, %v4371_v0   ;;  %852 = vperm.xlu0 %4046, %v4371_v0  }
  0x2e   :  { %3550 = vmatmul.mubr.msk.bf16.vlgmr.msra.gmra.mrb[0].mxu0 %vm103_vm3, %v91_v35 }
  0x2f   :  { %3570 = vmatpush3.bf16.msra.mxu0 %v4389_v9  ;;  %3573 = vmatprep.mubr.msk.bf16.mxu0 %vm4214_vm2, %v4210_v8 }
  0x30   :  { %3571 = vmatprep.subr.bf16.mxu0 %v4210_v8 }
  0x31   :  { %4042 = vset.pattern.permute.xlu1 %v4223_v38  ;;  %4113 = vset.pattern.permute.xlu0 %v4224_v39 }
  0x32   :  { %656 = vperm.xlu1 %4042, %v4371_v0  }
  0x33   :  { %3572 = vmatpush3.bf16.msra.mxu0 %v4411_v21 }
  0x34   :  { %3585 = vmatprep.subr.bf16.mxu0 %v4210_v8 }
  0x36   :  { %4044 = vset.pattern.permute.xlu1 %v4225_v40 }
  0x37   :  { %754 = vperm.xlu1 %4044, %v4371_v0  }
  0x3b   :  { %4045 = vset.pattern.permute.xlu1 %v4226_v41 }
  0x3c   :  { %803 = vperm.xlu1 %4045, %v4371_v0  }
  0x40   :  { %4047 = vset.pattern.permute.xlu1 %v4224_v39  ;;  %v951_v39 = vld [vmem:[%s5383_s9 + $0x10] sm:$0xff] }
  0x41   :  { %901 = vperm.xlu1 %4047, %v4371_v0   ;;  %v967_v40 = vpack.c.bf16 %v951_v39, %v951_v39 }
  0x93   :  { %v157_v44 = vpop.permute.xlu0 %156  ;;  %v265_v45 = vpop.permute.xlu1 %264 }
  0x94   :  { %vm158_vm4 = vcmp.eq.s32.totalorder %v157_v44, %v4453_v43  ;;  %vm266_vm5 = vcmp.eq.s32.totalorder %v265_v45, %v4453_v43 }
  0x95   :  { %v159_v46 = vsel %vm158_vm4, 1.0, %v4210_v8  ;;  %v267_v47 = vsel %vm266_vm5, 1.0, %v4210_v8 }
  0x96   :  { %v160_v48 = vpack.c.bf16 %v159_v46, %v159_v46  ;;  %v268_v49 = vpack.c.bf16 %v267_v47, %v267_v47 }
  0x98   :  { %3558 = vmatmul.mubr.msk.bf16.vlgmr.msra.gmra.mrb[0].mxu1 %vm163_vm6, %v160_v48  ;;  %v216_v50 = vpop.permute.xlu0 %215  ;;  %3574 = vmatmul.mubr.msk.bf16.vlgmr.msra.gmra.mrb[4].mxu0 %vm163_vm6, %v268_v49  ;;  %v314_v51 = vpop.permute.xlu1 %313 }
  0x99   :  { %3562 = vmatpush3.bf16.msra.mxu1 %v4389_v9  ;;  %vm217_vm7 = vcmp.eq.s32.totalorder %v216_v50, %v4453_v43  ;;  %3586 = vmatpush3.bf16.msra.mxu0 %v4389_v9  ;;  %vm315_vm9 = vcmp.eq.s32.totalorder %v314_v51, %v4453_v43 }
  0x9a   :  { %v218_v52 = vsel %vm217_vm7, 1.0, %v4210_v8  ;;  %3563 = vmatprep.subr.bf16.mxu1 %v4210_v8  ;;  %3565 = vmatprep.mubr.msk.bf16.mxu1 %vm4214_vm2, %v4210_v8  ;;  %v316_v59 = vsel %vm315_vm9, 1.0, %v4210_v8  ;;  %vm963_vm9 = vcmask 130048  }
  0x9b   :  { %3587 = vmatprep.subr.bf16.mxu0 %v4210_v8  ;;  %3589 = vmatprep.mubr.msk.bf16.mxu0 %vm4214_vm2, %v4210_v8  ;;  %v219_v53 = vpack.c.bf16 %v218_v52, %v218_v52  ;;  %v317_v62 = vpack.c.bf16 %v316_v59, %v316_v59 }
  0x9d   :  { %3564 = vmatpush3.bf16.msra.mxu1 %v4411_v21  ;;  %v363_v54 = vpop.permute.xlu1 %362  ;;  %3588 = vmatpush3.bf16.msra.mxu0 %v4411_v21  ;;  %v412_v56 = vpop.permute.xlu0 %411 }
  0x9e   :  { %vm364_vm8 = vcmp.eq.s32.totalorder %v363_v54, %v4453_v43  ;;  %3577 = vmatprep.subr.bf16.mxu1 %v4210_v8  ;;  %3601 = vmatprep.subr.bf16.mxu0 %v4210_v8  ;;  %vm413_vm11 = vcmp.eq.s32.totalorder %v412_v56, %v4453_v43 }
  0x9f   :  { %v365_v55 = vsel %vm364_vm8, 1.0, %v4210_v8  ;;  %v414_v1 = vsel %vm413_vm11, 1.0, %v4210_v8  ;;  %vm2537_vm8 = vcmask 261120  }
  0xa0   :  { %v366_v57 = vpack.c.bf16 %v365_v55, %v365_v55  ;;  %3566 = vmatmul.mubr.msk.bf16.vlgmr.msra.gmra.mrb[4].mxu1 %vm163_vm6, %v219_v53  ;;  %v415_v3 = vpack.c.bf16 %v414_v1, %v414_v1 }
  0xa1   :  { %3578 = vmatpush3.bf16.msra.mxu1 %v4389_v9  ;;  %3581 = vmatprep.mubr.msk.bf16.mxu1 %vm4214_vm2, %v4210_v8 }
  0xa2   :  { %3579 = vmatprep.subr.bf16.mxu1 %v4210_v8  ;;  %3590 = vmatmul.mubr.msk.bf16.vlgmr.msra.gmra.mrb[8].mxu0 %vm163_vm6, %v366_v57  ;;  %v461_v58 = vpop.permute.xlu1 %460  ;;  %v559_v61 = vpop.permute.xlu0 %558 }
  0xa3   :  { %3602 = vmatpush3.bf16.msra.mxu0 %v4389_v9  ;;  %vm462_vm10 = vcmp.eq.s32.totalorder %v461_v58, %v4453_v43  ;;  %3605 = vmatprep.mubr.msk.bf16.mxu0 %vm4214_vm2, %v4210_v8  ;;  %vm560_vm12 = vcmp.eq.s32.totalorder %v559_v61, %v4453_v43 }
  0xa4   :  { %v463_v60 = vsel %vm462_vm10, 1.0, %v4210_v8  ;;  %3603 = vmatprep.subr.bf16.mxu0 %v4210_v8  ;;  %v561_v2 = vsel %vm560_vm12, 1.0, %v4210_v8  ;;  %vm974_vm10 = vcmask 195584  }
  0xa5   :  { %3580 = vmatpush3.bf16.msra.mxu1 %v4411_v21  ;;  %v464_v63 = vpack.c.bf16 %v463_v60, %v463_v60  ;;  %v562_v5 = vpack.c.bf16 %v561_v2, %v561_v2 }
  0xa6   :  { %3593 = vmatprep.subr.bf16.mxu1 %v4210_v8 }
  0xa7   :  { %3604 = vmatpush3.bf16.msra.mxu0 %v4411_v21  ;;  %v510_v0 = vpop.permute.xlu1 %509  ;;  %v706_v14 = vpop.permute.xlu0 %705 }
  0xa8   :  { %3582 = vmatmul.mubr.msk.bf16.vlgmr.msra.gmra.mrb[8].mxu1 %vm163_vm6, %v317_v62  ;;  %3617 = vmatprep.subr.bf16.mxu0 %v4210_v8  ;;  %vm511_vm13 = vcmp.eq.s32.totalorder %v510_v0, %v4453_v43  ;;  %vm707_vm3 = vcmp.eq.s32.totalorder %v706_v14, %v4453_v43 }
  0xa9   :  { %3594 = vmatpush3.bf16.msra.mxu1 %v4389_v9  ;;  %3597 = vmatprep.mubr.msk.bf16.mxu1 %vm4214_vm2, %v4210_v8  ;;  %v512_v7 = vsel %vm511_vm13, 1.0, %v4210_v8  ;;  %v708_v20 = vsel %vm707_vm3, 1.0, %v4210_v8 }
  0xaa   :  { %3595 = vmatprep.subr.bf16.mxu1 %v4210_v8  ;;  %3606 = vmatmul.mubr.msk.bf16.vlgmr.msra.gmra.mrb[12].mxu0 %vm163_vm6, %v464_v63  ;;  %v513_v11 = vpack.c.bf16 %v512_v7, %v512_v7  ;;  %v709_v24 = vpack.c.bf16 %v708_v20, %v708_v20 }
  0xab   :  { %3618 = vmatpush3.bf16.msra.mxu0 %v4389_v9  ;;  %3621 = vmatprep.mubr.msk.bf16.mxu0 %vm4214_vm2, %v4210_v8 }
  0xac   :  { %3619 = vmatprep.subr.bf16.mxu0 %v4210_v8  ;;  %v608_v4 = vpop.permute.xlu1 %607  ;;  %v853_v17 = vpop.permute.xlu0 %852 }
  0xad   :  { %3596 = vmatpush3.bf16.msra.mxu1 %v4411_v21  ;;  %vm609_vm15 = vcmp.eq.s32.totalorder %v608_v4, %v4453_v43  ;;  %vm854_vm4 = vcmp.eq.s32.totalorder %v853_v17, %v4453_v43 }
  0xae   :  { %3609 = vmatprep.subr.bf16.mxu1 %v4210_v8  ;;  %v610_v15 = vsel %vm609_vm15, 1.0, %v4210_v8  ;;  %v855_v22 = vsel %vm854_vm4, 1.0, %v4210_v8 }
  0xaf   :  { %3620 = vmatpush3.bf16.msra.mxu0 %v4411_v21  ;;  %v611_v18 = vpack.c.bf16 %v610_v15, %v610_v15  ;;  %v856_v25 = vpack.c.bf16 %v855_v22, %v855_v22 }
  0xb0   :  { %3598 = vmatmul.mubr.msk.bf16.vlgmr.msra.gmra.mrb[12].mxu1 %vm163_vm6, %v415_v3  ;;  %3633 = vmatprep.subr.bf16.mxu0 %v4210_v8 }
  0xb1   :  { %3610 = vmatpush3.bf16.msra.mxu1 %v4389_v9  ;;  %3613 = vmatprep.mubr.msk.bf16.mxu1 %vm4214_vm2, %v4210_v8  ;;  %v657_v6 = vpop.permute.xlu1 %656 }
  0xb2   :  { %3611 = vmatprep.subr.bf16.mxu1 %v4210_v8  ;;  %3622 = vmatmul.mubr.msk.bf16.vlgmr.msra.gmra.mrb[16].mxu0 %vm163_vm6, %v562_v5  ;;  %vm658_vm14 = vcmp.eq.s32.totalorder %v657_v6, %v4453_v43 }
  0xb3   :  { %3634 = vmatpush3.bf16.msra.mxu0 %v4389_v9  ;;  %v659_v10 = vsel %vm658_vm14, 1.0, %v4210_v8  ;;  %3637 = vmatprep.mubr.msk.bf16.mxu0 %vm4214_vm2, %v4210_v8 }
  0xb4   :  { %3635 = vmatprep.subr.bf16.mxu0 %v4210_v8  ;;  %v660_v12 = vpack.c.bf16 %v659_v10, %v659_v10 }
  0xb5   :  { %3612 = vmatpush3.bf16.msra.mxu1 %v4411_v21 }
  0xb6   :  { %3625 = vmatprep.subr.bf16.mxu1 %v4210_v8  ;;  %v755_v13 = vpop.permute.xlu1 %754 }
  0xb7   :  { %3636 = vmatpush3.bf16.msra.mxu0 %v4411_v21  ;;  %vm756_vm1 = vcmp.eq.s32.totalorder %v755_v13, %v4453_v43 }
  0xb8   :  { %3614 = vmatmul.mubr.msk.bf16.vlgmr.msra.gmra.mrb[16].mxu1 %vm163_vm6, %v513_v11  ;;  %3649 = vmatprep.subr.bf16.mxu0 %v4210_v8  ;;  %v757_v16 = vsel %vm756_vm1, 1.0, %v4210_v8 }
  0xb9   :  { %3626 = vmatpush3.bf16.msra.mxu1 %v4389_v9  ;;  %3629 = vmatprep.mubr.msk.bf16.mxu1 %vm4214_vm2, %v4210_v8  ;;  %v758_v19 = vpack.c.bf16 %v757_v16, %v757_v16 }
  0xba   :  { %3627 = vmatprep.subr.bf16.mxu1 %v4210_v8  ;;  %3638 = vmatmul.mubr.msk.bf16.vlgmr.msra.gmra.mrb[20].mxu0 %vm163_vm6, %v660_v12 }
  0xbb   :  { %3650 = vmatpush3.bf16.msra.mxu0 %v4389_v9  ;;  %3653 = vmatprep.mubr.msk.bf16.mxu0 %vm4214_vm2, %v4210_v8  ;;  %v804_v23 = vpop.permute.xlu1 %803 }
  0xbc   :  { %3651 = vmatprep.subr.bf16.mxu0 %v4210_v8  ;;  %vm805_vm5 = vcmp.eq.s32.totalorder %v804_v23, %v4453_v43 }
  0xbd   :  { %3628 = vmatpush3.bf16.msra.mxu1 %v4411_v21  ;;  %v806_v26 = vsel %vm805_vm5, 1.0, %v4210_v8 }
  0xbe   :  { %3641 = vmatprep.subr.bf16.mxu1 %v4210_v8  ;;  %v807_v28 = vpack.c.bf16 %v806_v26, %v806_v26 }
  0xbf   :  { %3652 = vmatpush3.bf16.msra.mxu0 %v4411_v21 }
  0xc0   :  { %3630 = vmatmul.mubr.msk.bf16.vlgmr.msra.gmra.mrb[20].mxu1 %vm163_vm6, %v611_v18  ;;  %3665 = vmatprep.subr.bf16.mxu0 %v4210_v8  ;;  %v902_v27 = vpop.permute.xlu1 %901 }
  0xc1   :  { %3642 = vmatpush3.bf16.msra.mxu1 %v4389_v9  ;;  %3645 = vmatprep.mubr.msk.bf16.mxu1 %vm4214_vm2, %v4210_v8  ;;  %vm903_vm7 = vcmp.eq.s32.totalorder %v902_v27, %v4453_v43  ;;  %v4618_v43 = vsel %vm167_vm0, %v967_v40, 0 }
  0xc2   :  { %3643 = vmatprep.subr.bf16.mxu1 %v4210_v8  ;;  %3654 = vmatmul.mubr.msk.bf16.vlgmr.msra.gmra.mrb[24].mxu0 %vm163_vm6, %v758_v19  ;;  %v904_v29 = vsel %vm903_vm7, 1.0, %v4210_v8 }
  0xc3   :  { %3666 = vmatpush3.bf16.msra.mxu0 %v4389_v9  ;;  %3669 = vmatprep.mubr.msk.bf16.mxu0 %vm4214_vm2, %v4210_v8  ;;  %v905_v30 = vpack.c.bf16 %v904_v29, %v904_v29 }
  0xc4   :  { %3667 = vmatprep.subr.bf16.mxu0 %v4210_v8 }
  0xc5   :  { %3644 = vmatpush3.bf16.msra.mxu1 %v4411_v21 }
  0xc6   :  { %3657 = vmatprep.subr.bf16.mxu1 %v4210_v8 }
  0xc7   :  { %3668 = vmatpush3.bf16.msra.mxu0 %v4411_v21 }
  0xc8   :  { %3646 = vmatmul.mubr.msk.bf16.vlgmr.msra.gmra.mrb[24].mxu1 %vm163_vm6, %v709_v24  ;;  %3681 = vmatprep.subr.bf16.mxu0 %v4210_v8 }
  0xc9   :  { %3658 = vmatpush3.bf16.msra.mxu1 %v4389_v9  ;;  %3661 = vmatprep.mubr.msk.bf16.mxu1 %vm4214_vm2, %v4210_v8 }
  0xca   :  { %3659 = vmatprep.subr.bf16.mxu1 %v4210_v8  ;;  %3670 = vmatmul.mubr.msk.bf16.vlgmr.msra.gmra.mrb[28].mxu0 %vm163_vm6, %v856_v25 }
  0xcb   :  { %3685 = vmatprep.mubr.msk.bf16.mxu0 %vm4214_vm2, %v4210_v8 }
  0xcd   :  { %3660 = vmatpush3.bf16.msra.mxu1 %v4411_v21 }
  0xce   :  { %3673 = vmatprep.subr.bf16.mxu1 %v4210_v8 }
  0xd0   :  { %3662 = vmatmul.mubr.msk.bf16.vlgmr.msra.gmra.mrb[28].mxu1 %vm163_vm6, %v807_v28 }
  0xd1   :  { %3674 = vmatpush3.bf16.msra.mxu1 %v4389_v9  ;;  %3677 = vmatprep.mubr.msk.bf16.mxu1 %vm4214_vm2, %v4210_v8  ;;  %v3300_v9 = vld [vmem:[%s5382_s8] ss:$0 sm:$0xff]  ;;  %s5385_s8 = sld [smem:[#allocation19_spill]] }
  0xd2   :  { %3675 = vmatprep.subr.bf16.mxu1 %v4210_v8 }
  0xd5   :  { %3676 = vmatpush3.bf16.msra.mxu1 %v4411_v21  ;;  %v949_v21 = vld [vmem:[%s5383_s9] sm:$0xff] }
  0xd6   :  { %3689 = vmatprep.subr.bf16.mxu1 %v4210_v8  ;;  %v4604_v38 = vpack.c.bf16 %v950_v37, %v949_v21 }
  0xd8   :  { %3678 = vmatmul.mubr.msk.bf16.vlgmr.msra.gmra.mrb[32].mxu1 %vm163_vm6, %v905_v30  ;;  %3682 = vmatpush3.bf16.msra.mxu0 %v4604_v38  ;;  %vm961_vm6 = vcmask 64512  }
  0xd9   :  { %3693 = vmatprep.mubr.msk.bf16.mxu1 %vm4214_vm2, %v4210_v8  ;;  %3690 = vmatpush3.bf16.msra.mxu1 %v4604_v38 }
  0xda   :  { %3683 = vmatprep.subr.bf16.mxu0 %v4210_v8  ;;  %3691 = vmatprep.subr.bf16.mxu1 %v4210_v8 }
  0xdc   :  { %3684 = vmatpush3.bf16.msra.mxu0 %v4618_v43 }
  0xdd   :  { %3692 = vmatpush3.bf16.msra.mxu1 %v4618_v43  ;;  %3697 = vmatprep.subr.bf16.mxu0 %v4210_v8 }
  0xde   :  { %3705 = vmatprep.subr.bf16.mxu1 %v4210_v8 }
 0x101   :  { %v141_v31 = vpop.f32.mrb[0].mxu0 }
 0x102   :  { %v142_v32 = vadd.f32 %v3300_v9, %v141_v31  ;;  %v3551_v33 = vpop.f32.mrb[1].mxu0 }
 0x103   :  { %v144_v34 = vpop.f32.mrb[2].mxu0 }
 0x104   :  { %v4594_v35 = vmax.f32 %v142_v32, 0.0  ;;  %v3552_v36 = vpop.f32.mrb[3].mxu0 }
 0x106   :  { %3243 = vst.msk [vmem:[#allocation6] sm:$0xff] %vm2537_vm8, %v4594_v35 }
 0x16b   :  { %v4613_v41 = vpop.f32.mrb[0].mxu1  ;;  %v4615_v42 = vpop.f32.mrb[4].mxu0 }
 0x16c   :  { %v3559_v44 = vpop.f32.mrb[1].mxu1  ;;  %v3575_v45 = vpop.f32.mrb[5].mxu0  ;;  %958 = vrot.lane.b32.xlu0 %v4615_v42, %s4227_s6 }
 0x16d   :  { %v211_v46 = vpop.f32.mrb[2].mxu1  ;;  %v309_v47 = vpop.f32.mrb[6].mxu0 }
 0x16e   :  { %v3560_v48 = vpop.f32.mrb[3].mxu1  ;;  %v3576_v49 = vpop.f32.mrb[7].mxu0 }
 0x173   :  { %v4626_v50 = vpop.f32.mrb[4].mxu1 }
 0x174   :  { %v4048_v51 = vpack.i.bf16 %v4615_v42, %v4626_v50  ;;  %v3567_v52 = vpop.f32.mrb[5].mxu1 }
 0x175   :  { %v260_v53 = vpop.f32.mrb[6].mxu1  ;;  %v4630_v54 = vpop.f32.mrb[8].mxu0 }
 0x176   :  { %v3568_v55 = vpop.f32.mrb[7].mxu1  ;;  %4049 = vrot.lane.b32.xlu1 %v4048_v51, %s4228_s1  ;;  %v3591_v56 = vpop.f32.mrb[9].mxu0 }
 0x177   :  { %v407_v57 = vpop.f32.mrb[10].mxu0 }
 0x178   :  { %v3592_v58 = vpop.f32.mrb[11].mxu0 }
 0x17b   :  { %v4633_v59 = vpop.f32.mrb[8].mxu1 }
 0x17c   :  { %v4053_v60 = vpack.i.bf16 %v4630_v54, %v4633_v59  ;;  %v3583_v61 = vpop.f32.mrb[9].mxu1  ;;  %1026 = vrot.lane.b32.xlu1 %v4633_v59, %s4227_s6 }
 0x17d   :  { %v358_v62 = vpop.f32.mrb[10].mxu1  ;;  %v4639_v63 = vpop.f32.mrb[12].mxu0 }
 0x17e   :  { %v3584_v0 = vpop.f32.mrb[11].mxu1  ;;  %4054 = vrot.lane.b32.xlu0 %v4053_v60, %s4228_s1  ;;  %v3607_v1 = vpop.f32.mrb[13].mxu0 }
 0x17f   :  { %v505_v2 = vpop.f32.mrb[14].mxu0 }
 0x180   :  { %1080 = vrot.lane.b32.xlu1 %v4630_v54, %s4227_s6  ;;  %v3608_v3 = vpop.f32.mrb[15].mxu0 }
 0x183   :  { %v4644_v4 = vpop.f32.mrb[12].mxu1 }
 0x184   :  { %v4058_v5 = vpack.i.bf16 %v4639_v63, %v4644_v4  ;;  %v3599_v6 = vpop.f32.mrb[13].mxu1  ;;  %1134 = vrot.lane.b32.xlu0 %v4644_v4, %s4227_s6 }
 0x185   :  { %v456_v7 = vpop.f32.mrb[14].mxu1  ;;  %v4650_v10 = vpop.f32.mrb[16].mxu0 }
 0x186   :  { %v3600_v11 = vpop.f32.mrb[15].mxu1  ;;  %4059 = vrot.lane.b32.xlu1 %v4058_v5, %s4228_s1  ;;  %v3623_v12 = vpop.f32.mrb[17].mxu0 }
 0x187   :  { %v603_v13 = vpop.f32.mrb[18].mxu0 }
 0x188   :  { %1188 = vrot.lane.b32.xlu0 %v4639_v63, %s4227_s6  ;;  %v3624_v14 = vpop.f32.mrb[19].mxu0 }
 0x18b   :  { %v4655_v15 = vpop.f32.mrb[16].mxu1 }
 0x18c   :  { %v4063_v16 = vpack.i.bf16 %v4650_v10, %v4655_v15  ;;  %v3615_v17 = vpop.f32.mrb[17].mxu1  ;;  %1242 = vrot.lane.b32.xlu1 %v4655_v15, %s4227_s6 }
 0x18d   :  { %v554_v18 = vpop.f32.mrb[18].mxu1  ;;  %v4661_v19 = vpop.f32.mrb[20].mxu0 }
 0x18e   :  { %v3616_v20 = vpop.f32.mrb[19].mxu1  ;;  %4064 = vrot.lane.b32.xlu0 %v4063_v16, %s4228_s1  ;;  %v3639_v22 = vpop.f32.mrb[21].mxu0 }
 0x18f   :  { %v701_v23 = vpop.f32.mrb[22].mxu0 }
 0x190   :  { %1296 = vrot.lane.b32.xlu1 %v4650_v10, %s4227_s6  ;;  %v3640_v24 = vpop.f32.mrb[23].mxu0 }
 0x193   :  { %v4666_v25 = vpop.f32.mrb[20].mxu1 }
 0x194   :  { %v4068_v26 = vpack.i.bf16 %v4661_v19, %v4666_v25  ;;  %v3631_v27 = vpop.f32.mrb[21].mxu1  ;;  %1350 = vrot.lane.b32.xlu0 %v4666_v25, %s4227_s6 }
 0x195   :  { %v652_v28 = vpop.f32.mrb[22].mxu1  ;;  %v4672_v29 = vpop.f32.mrb[24].mxu0 }
 0x196   :  { %v3632_v30 = vpop.f32.mrb[23].mxu1  ;;  %4069 = vrot.lane.b32.xlu1 %v4068_v26, %s4228_s1  ;;  %v3655_v9 = vpop.f32.mrb[25].mxu0 }
 0x197   :  { %v799_v31 = vpop.f32.mrb[26].mxu0 }
 0x198   :  { %1404 = vrot.lane.b32.xlu0 %v4661_v19, %s4227_s6  ;;  %v3656_v32 = vpop.f32.mrb[27].mxu0 }
 0x19b   :  { %v4677_v33 = vpop.f32.mrb[24].mxu1 }
 0x19c   :  { %v4073_v34 = vpack.i.bf16 %v4672_v29, %v4677_v33  ;;  %v3647_v36 = vpop.f32.mrb[25].mxu1  ;;  %1458 = vrot.lane.b32.xlu1 %v4677_v33, %s4227_s6 }
 0x19d   :  { %v750_v21 = vpop.f32.mrb[26].mxu1  ;;  %v894_v37 = vpop.f32.mrb[28].mxu0 }
 0x19e   :  { %v3648_v39 = vpop.f32.mrb[27].mxu1  ;;  %4074 = vrot.lane.b32.xlu0 %v4073_v34, %s4228_s1  ;;  %v3671_v40 = vpop.f32.mrb[29].mxu0 }
 0x19f   :  { %v897_v44 = vpop.f32.mrb[30].mxu0 }
 0x1a0   :  { %1512 = vrot.lane.b32.xlu1 %v4672_v29, %s4227_s6  ;;  %v3672_v45 = vpop.f32.mrb[31].mxu0 }
 0x1a3   :  { %v4686_v46 = vpop.f32.mrb[28].mxu1 }
 0x1a4   :  { %v4078_v47 = vpack.i.bf16 %v894_v37, %v4686_v46  ;;  %v3663_v48 = vpop.f32.mrb[29].mxu1  ;;  %1566 = vrot.lane.b32.xlu0 %v4686_v46, %s4227_s6 }
 0x1a5   :  { %v848_v49 = vpop.f32.mrb[30].mxu1 }
 0x1a6   :  { %v3664_v51 = vpop.f32.mrb[31].mxu1  ;;  %4079 = vrot.lane.b32.xlu1 %v4078_v47, %s4228_s1 }
 0x1a8   :  { %1620 = vrot.lane.b32.xlu0 %v894_v37, %s4227_s6 }
 0x1ab   :  { %v943_v52 = vpop.f32.mrb[32].mxu1 }
 0x1ac   :  { %1674 = vrot.lane.b32.xlu1 %v943_v52, %s4227_s6  ;;  %v3679_v53 = vpop.f32.mrb[33].mxu1 }
 0x1ad   :  { %v946_v55 = vpop.f32.mrb[34].mxu1 }
 0x1ae   :  { %v3680_v56 = vpop.f32.mrb[35].mxu1 }
 0x1de   :  { %v959_v61 = vpop.permute.xlu0 %958 }
 0x1e8   :  { %v4050_v57 = vpop.permute.xlu1 %4049 }
 0x1e9   :  { %v4051_v58 = vunpack.i.l.bf16 %v4050_v57  ;;  %v4052_v60 = vunpack.i.h.bf16 %v4050_v57 }
 0x1eb   :  { %v962_v62 = vsel %vm961_vm6, %v4613_v41, %v4051_v58  ;;  %v1029_v3 = vsel %vm961_vm6, %v4626_v50, %v4052_v60 }
 0x1ec   :  { %v964_v0 = vsel %vm963_vm9, %v962_v62, %v959_v61 }
 0x1ed   :  { %v965_v1 = vpack.c.bf16 %v964_v0, %v964_v0 }
 0x1ee   :  { %v1027_v2 = vpop.permute.xlu1 %1026 }
 0x1ef   :  { %v1030_v5 = vsel %vm963_vm9, %v1029_v3, %v1027_v2  ;;  %3686 = vmatmul.mubr.msk.bf16.vlgmr.msra.gmra.mrb[32].mxu0 %vm974_vm10, %v965_v1 }
 0x1f0   :  { %v1031_v6 = vpack.c.bf16 %v1030_v5, %v1030_v5  ;;  %3698 = vmatpush3.bf16.msra.mxu0 %v4604_v38  ;;  %v4055_v7 = vpop.permute.xlu0 %4054  ;;  %3701 = vmatprep.mubr.msk.bf16.mxu0 %vm4214_vm2, %v4210_v8 }
 0x1f1   :  { %v4056_v41 = vunpack.i.l.bf16 %v4055_v7  ;;  %3699 = vmatprep.subr.bf16.mxu0 %v4210_v8  ;;  %v4057_v11 = vunpack.i.h.bf16 %v4055_v7 }
 0x1f2   :  { %3694 = vmatmul.mubr.msk.bf16.vlgmr.msra.gmra.mrb[36].mxu1 %vm974_vm10, %v1031_v6  ;;  %v1081_v12 = vpop.permute.xlu1 %1080 }
 0x1f3   :  { %v1083_v50 = vsel %vm961_vm6, %v4615_v42, %v4056_v41  ;;  %3706 = vmatpush3.bf16.msra.mxu1 %v4604_v38  ;;  %3709 = vmatprep.mubr.msk.bf16.mxu1 %vm4214_vm2, %v4210_v8  ;;  %v1137_v17 = vsel %vm961_vm6, %v4633_v59, %v4057_v11 }
 0x1f4   :  { %v1084_v13 = vsel %vm963_vm9, %v1083_v50, %v1081_v12  ;;  %3700 = vmatpush3.bf16.msra.mxu0 %v4618_v43  ;;  %3707 = vmatprep.subr.bf16.mxu1 %v4210_v8 }
 0x1f5   :  { %v1085_v14 = vpack.c.bf16 %v1084_v13, %v1084_v13  ;;  %3713 = vmatprep.subr.bf16.mxu0 %v4210_v8 }
 0x1f6   :  { %v1135_v16 = vpop.permute.xlu0 %1134 }
 0x1f7   :  { %v1138_v42 = vsel %vm963_vm9, %v1137_v17, %v1135_v16  ;;  %3702 = vmatmul.mubr.msk.bf16.vlgmr.msra.gmra.mrb[36].mxu0 %vm974_vm10, %v1085_v14  ;;  %3708 = vmatpush3.bf16.msra.mxu1 %v4618_v43  ;;  %v1725_v14 = vld [vmem:[%s5385_s8 + $0x8] sm:$0xff] }
 0x1f8   :  { %v1139_v18 = vpack.c.bf16 %v1138_v42, %v1138_v42  ;;  %3714 = vmatpush3.bf16.msra.mxu0 %v4604_v38  ;;  %v4060_v20 = vpop.permute.xlu1 %4059  ;;  %3721 = vmatprep.subr.bf16.mxu1 %v4210_v8 }
 0x1f9   :  { %v4061_v22 = vunpack.i.l.bf16 %v4060_v20  ;;  %3715 = vmatprep.subr.bf16.mxu0 %v4210_v8  ;;  %3717 = vmatprep.mubr.msk.bf16.mxu0 %vm4214_vm2, %v4210_v8  ;;  %v4062_v23 = vunpack.i.h.bf16 %v4060_v20  ;;  %v1726_v20 = vld [vmem:[%s5385_s8 + $0x10] sm:$0xff] }
 0x1fa   :  { %3710 = vmatmul.mubr.msk.bf16.vlgmr.msra.gmra.mrb[40].mxu1 %vm974_vm10, %v1139_v18  ;;  %v1189_v59 = vpop.permute.xlu0 %1188 }
 0x1fb   :  { %v1191_v24 = vsel %vm961_vm6, %v4630_v54, %v4061_v22  ;;  %3722 = vmatpush3.bf16.msra.mxu1 %v4604_v38  ;;  %3725 = vmatprep.mubr.msk.bf16.mxu1 %vm4214_vm2, %v4210_v8  ;;  %v1245_v30 = vsel %vm961_vm6, %v4644_v4, %v4062_v23  ;;  %v1740_v23 = vpack.c.bf16 %v1726_v20, %v1726_v20 }
 0x1fc   :  { %v1192_v26 = vsel %vm963_vm9, %v1191_v24, %v1189_v59  ;;  %3716 = vmatpush3.bf16.msra.mxu0 %v4618_v43  ;;  %3723 = vmatprep.subr.bf16.mxu1 %v4210_v8 }
 0x1fd   :  { %v1193_v27 = vpack.c.bf16 %v1192_v26, %v1192_v26  ;;  %3729 = vmatprep.subr.bf16.mxu0 %v4210_v8 }
 0x1fe   :  { %v1243_v28 = vpop.permute.xlu1 %1242 }
 0x1ff   :  { %v1246_v54 = vsel %vm963_vm9, %v1245_v30, %v1243_v28  ;;  %3718 = vmatmul.mubr.msk.bf16.vlgmr.msra.gmra.mrb[40].mxu0 %vm974_vm10, %v1193_v27  ;;  %3724 = vmatpush3.bf16.msra.mxu1 %v4618_v43  ;;  %v4850_v27 = vsel %vm167_vm0, %v1740_v23, 0 }
 0x200   :  { %v1247_v9 = vpack.c.bf16 %v1246_v54, %v1246_v54  ;;  %3730 = vmatpush3.bf16.msra.mxu0 %v4604_v38  ;;  %v4065_v31 = vpop.permute.xlu0 %4064  ;;  %3737 = vmatprep.subr.bf16.mxu1 %v4210_v8 }
 0x201   :  { %v4066_v32 = vunpack.i.l.bf16 %v4065_v31  ;;  %3731 = vmatprep.subr.bf16.mxu0 %v4210_v8  ;;  %3733 = vmatprep.mubr.msk.bf16.mxu0 %vm4214_vm2, %v4210_v8  ;;  %v4067_v34 = vunpack.i.h.bf16 %v4065_v31 }
 0x202   :  { %3726 = vmatmul.mubr.msk.bf16.vlgmr.msra.gmra.mrb[44].mxu1 %vm974_vm10, %v1247_v9  ;;  %v1297_v4 = vpop.permute.xlu1 %1296 }
 0x203   :  { %v1299_v36 = vsel %vm961_vm6, %v4639_v63, %v4066_v32  ;;  %3738 = vmatpush3.bf16.msra.mxu1 %v4604_v38  ;;  %3741 = vmatprep.mubr.msk.bf16.mxu1 %vm4214_vm2, %v4210_v8  ;;  %v1353_v40 = vsel %vm961_vm6, %v4655_v15, %v4067_v34 }
 0x204   :  { %v1300_v21 = vsel %vm963_vm9, %v1299_v36, %v1297_v4  ;;  %3732 = vmatpush3.bf16.msra.mxu0 %v4618_v43  ;;  %3739 = vmatprep.subr.bf16.mxu1 %v4210_v8 }
 0x205   :  { %v1301_v37 = vpack.c.bf16 %v1300_v21, %v1300_v21  ;;  %3745 = vmatprep.subr.bf16.mxu0 %v4210_v8 }
 0x206   :  { %v1351_v39 = vpop.permute.xlu0 %1350 }
 0x207   :  { %v1354_v63 = vsel %vm963_vm9, %v1353_v40, %v1351_v39  ;;  %3734 = vmatmul.mubr.msk.bf16.vlgmr.msra.gmra.mrb[44].mxu0 %vm974_vm10, %v1301_v37  ;;  %3740 = vmatpush3.bf16.msra.mxu1 %v4618_v43 }
 0x208   :  { %v1355_v44 = vpack.c.bf16 %v1354_v63, %v1354_v63  ;;  %3746 = vmatpush3.bf16.msra.mxu0 %v4604_v38  ;;  %v4070_v45 = vpop.permute.xlu1 %4069  ;;  %3753 = vmatprep.subr.bf16.mxu1 %v4210_v8 }
 0x209   :  { %v4071_v47 = vunpack.i.l.bf16 %v4070_v45  ;;  %3747 = vmatprep.subr.bf16.mxu0 %v4210_v8  ;;  %3749 = vmatprep.mubr.msk.bf16.mxu0 %vm4214_vm2, %v4210_v8  ;;  %v4072_v48 = vunpack.i.h.bf16 %v4070_v45 }
 0x20a   :  { %3742 = vmatmul.mubr.msk.bf16.vlgmr.msra.gmra.mrb[48].mxu1 %vm974_vm10, %v1355_v44  ;;  %v1405_v15 = vpop.permute.xlu0 %1404 }
 0x20b   :  { %v1407_v49 = vsel %vm961_vm6, %v4650_v10, %v4071_v47  ;;  %3754 = vmatpush3.bf16.msra.mxu1 %v4604_v38  ;;  %3757 = vmatprep.mubr.msk.bf16.mxu1 %vm4214_vm2, %v4210_v8  ;;  %v1461_v55 = vsel %vm961_vm6, %v4666_v25, %v4072_v48 }
 0x20c   :  { %v1408_v51 = vsel %vm963_vm9, %v1407_v49, %v1405_v15  ;;  %3748 = vmatpush3.bf16.msra.mxu0 %v4618_v43  ;;  %3755 = vmatprep.subr.bf16.mxu1 %v4210_v8 }
 0x20d   :  { %v1409_v52 = vpack.c.bf16 %v1408_v51, %v1408_v51  ;;  %3761 = vmatprep.subr.bf16.mxu0 %v4210_v8 }
 0x20e   :  { %v1459_v53 = vpop.permute.xlu1 %1458 }
 0x20f   :  { %v1462_v10 = vsel %vm963_vm9, %v1461_v55, %v1459_v53  ;;  %3750 = vmatmul.mubr.msk.bf16.vlgmr.msra.gmra.mrb[48].mxu0 %vm974_vm10, %v1409_v52  ;;  %3756 = vmatpush3.bf16.msra.mxu1 %v4618_v43 }
 0x210   :  { %v1463_v56 = vpack.c.bf16 %v1462_v10, %v1462_v10  ;;  %3762 = vmatpush3.bf16.msra.mxu0 %v4604_v38  ;;  %v4075_v57 = vpop.permute.xlu0 %4074  ;;  %3769 = vmatprep.subr.bf16.mxu1 %v4210_v8 }
 0x211   :  { %v4076_v58 = vunpack.i.l.bf16 %v4075_v57  ;;  %3763 = vmatprep.subr.bf16.mxu0 %v4210_v8  ;;  %3765 = vmatprep.mubr.msk.bf16.mxu0 %vm4214_vm2, %v4210_v8  ;;  %v4077_v60 = vunpack.i.h.bf16 %v4075_v57 }
 0x212   :  { %3758 = vmatmul.mubr.msk.bf16.vlgmr.msra.gmra.mrb[52].mxu1 %vm974_vm10, %v1463_v56  ;;  %v1513_v25 = vpop.permute.xlu1 %1512 }
 0x213   :  { %v1515_v61 = vsel %vm961_vm6, %v4661_v19, %v4076_v58  ;;  %3770 = vmatpush3.bf16.msra.mxu1 %v4604_v38  ;;  %3773 = vmatprep.mubr.msk.bf16.mxu1 %vm4214_vm2, %v4210_v8  ;;  %v1569_v2 = vsel %vm961_vm6, %v4677_v33, %v4077_v60 }
 0x214   :  { %v1516_v62 = vsel %vm963_vm9, %v1515_v61, %v1513_v25  ;;  %3764 = vmatpush3.bf16.msra.mxu0 %v4618_v43  ;;  %3771 = vmatprep.subr.bf16.mxu1 %v4210_v8 }
 0x215   :  { %v1517_v0 = vpack.c.bf16 %v1516_v62, %v1516_v62  ;;  %3777 = vmatprep.subr.bf16.mxu0 %v4210_v8 }
 0x216   :  { %v1567_v1 = vpop.permute.xlu0 %1566 }
 0x217   :  { %v1570_v19 = vsel %vm963_vm9, %v1569_v2, %v1567_v1  ;;  %3766 = vmatmul.mubr.msk.bf16.vlgmr.msra.gmra.mrb[52].mxu0 %vm974_vm10, %v1517_v0  ;;  %3772 = vmatpush3.bf16.msra.mxu1 %v4618_v43 }
 0x218   :  { %v1571_v3 = vpack.c.bf16 %v1570_v19, %v1570_v19  ;;  %3778 = vmatpush3.bf16.msra.mxu0 %v4604_v38  ;;  %v4080_v5 = vpop.permute.xlu1 %4079  ;;  %3785 = vmatprep.subr.bf16.mxu1 %v4210_v8 }
 0x219   :  { %v4081_v6 = vunpack.i.l.bf16 %v4080_v5  ;;  %3779 = vmatprep.subr.bf16.mxu0 %v4210_v8  ;;  %3781 = vmatprep.mubr.msk.bf16.mxu0 %vm4214_vm2, %v4210_v8  ;;  %v4082_v7 = vunpack.i.h.bf16 %v4080_v5 }
 0x21a   :  { %3774 = vmatmul.mubr.msk.bf16.vlgmr.msra.gmra.mrb[56].mxu1 %vm974_vm10, %v1571_v3  ;;  %v1621_v33 = vpop.permute.xlu0 %1620 }
 0x21b   :  { %v1623_v41 = vsel %vm961_vm6, %v4672_v29, %v4081_v6  ;;  %3786 = vmatpush3.bf16.msra.mxu1 %v4604_v38  ;;  %3789 = vmatprep.mubr.msk.bf16.mxu1 %vm4214_vm2, %v4210_v8  ;;  %v1677_v13 = vsel %vm961_vm6, %v4686_v46, %v4082_v7  ;;  %v4829_v46 = vld [vmem:[%s5384_s7] ss:$0 sm:$0xff] }
 0x21c   :  { %v1624_v11 = vsel %vm963_vm9, %v1623_v41, %v1621_v33  ;;  %3780 = vmatpush3.bf16.msra.mxu0 %v4618_v43  ;;  %3787 = vmatprep.subr.bf16.mxu1 %v4210_v8 }
 0x21d   :  { %v1625_v12 = vpack.c.bf16 %v1624_v11, %v1624_v11  ;;  %3793 = vmatprep.subr.bf16.mxu0 %v4210_v8 }
 0x21e   :  { %v1675_v50 = vpop.permute.xlu1 %1674 }
 0x21f   :  { %v1678_v29 = vsel %vm963_vm9, %v1677_v13, %v1675_v50  ;;  %3782 = vmatmul.mubr.msk.bf16.vlgmr.msra.gmra.mrb[56].mxu0 %vm974_vm10, %v1625_v12  ;;  %3788 = vmatpush3.bf16.msra.mxu1 %v4618_v43  ;;  %v1724_v43 = vld [vmem:[%s5385_s8] sm:$0xff] }
 0x220   :  { %v1679_v38 = vpack.c.bf16 %v1678_v29, %v1678_v29  ;;  %3801 = vmatprep.subr.bf16.mxu1 %v4210_v8  ;;  %3797 = vmatprep.mubr.msk.bf16.mxu0 %vm4214_vm2, %v4210_v8  ;;  %v4837_v16 = vpack.c.bf16 %v1725_v14, %v1724_v43 }
 0x222   :  { %3790 = vmatmul.mubr.msk.bf16.vlgmr.msra.gmra.mrb[60].mxu1 %vm974_vm10, %v1679_v38  ;;  %3794 = vmatpush3.bf16.msra.mxu0 %v4837_v16 }
 0x223   :  { %3805 = vmatprep.mubr.msk.bf16.mxu1 %vm4214_vm2, %v4210_v8  ;;  %3802 = vmatpush3.bf16.msra.mxu1 %v4837_v16 }
 0x224   :  { %3795 = vmatprep.subr.bf16.mxu0 %v4210_v8  ;;  %3803 = vmatprep.subr.bf16.mxu1 %v4210_v8 }
 0x226   :  { %3796 = vmatpush3.bf16.msra.mxu0 %v4850_v27 }
 0x227   :  { %3804 = vmatpush3.bf16.msra.mxu1 %v4850_v27  ;;  %3809 = vmatprep.subr.bf16.mxu0 %v4210_v8 }
 0x228   :  { %3817 = vmatprep.subr.bf16.mxu1 %v4210_v8 }
 0x2c2   :  { %v1015_v17 = vpop.f32.mrb[32].mxu0 }
 0x2c3   :  { %v4840_v42 = vadd.f32 %v4829_v46, %v1015_v17  ;;  %v3687_v18 = vpop.f32.mrb[33].mxu0 }
 0x2c4   :  { %v1018_v22 = vpop.f32.mrb[34].mxu0 }
 0x2c5   :  { %v3688_v59 = vpop.f32.mrb[35].mxu0  ;;  %v1069_v24 = vpop.f32.mrb[36].mxu1 }
 0x2c6   :  { %v3695_v26 = vpop.f32.mrb[37].mxu1  ;;  %v4857_v54 = vadd.f32 %v4829_v46, %v1069_v24 }
 0x2c7   :  { %v1072_v28 = vpop.f32.mrb[38].mxu1 }
 0x2c8   :  { %v3696_v30 = vpop.f32.mrb[39].mxu1  ;;  %v1075_v4 = vmax.f32 %v4857_v54, 0.0 }
 0x2ca   :  { %v1123_v9 = vpop.f32.mrb[36].mxu0 }
 0x2cb   :  { %v1124_v31 = vadd.f32 %v4829_v46, %v1123_v9  ;;  %v3703_v32 = vpop.f32.mrb[37].mxu0 }
 0x2cc   :  { %v1126_v34 = vpop.f32.mrb[38].mxu0 }
 0x2cd   :  { %v4861_v36 = vmax.f32 %v1124_v31, 0.0  ;;  %v3704_v21 = vpop.f32.mrb[39].mxu0  ;;  %v1177_v37 = vpop.f32.mrb[40].mxu1 }
 0x2ce   :  { %v3711_v39 = vpop.f32.mrb[41].mxu1  ;;  %v1178_v40 = vadd.f32 %v4829_v46, %v1177_v37 }
 0x2cf   :  { %v1180_v63 = vpop.f32.mrb[42].mxu1  ;;  %1733 = vrot.lane.b32.xlu1 %v4861_v36, %s4227_s6  ;;  %v4083_v44 = vpack.i.bf16 %v4861_v36, %v1075_v4 }
 0x2d0   :  { %v3712_v45 = vpop.f32.mrb[43].mxu1  ;;  %v4870_v48 = vmax.f32 %v1178_v40, 0.0 }
 0x2d1   :  { %4084 = vrot.lane.b32.xlu0 %v4083_v44, %s4228_s1 }
 0x2d2   :  { %v1231_v47 = vpop.f32.mrb[40].mxu0 }
 0x2d3   :  { %v1232_v15 = vadd.f32 %v4829_v46, %v1231_v47  ;;  %v3719_v49 = vpop.f32.mrb[41].mxu0 }
 0x2d4   :  { %v1234_v51 = vpop.f32.mrb[42].mxu0 }
 0x2d5   :  { %v4873_v52 = vmax.f32 %v1232_v15, 0.0  ;;  %v1285_v53 = vpop.f32.mrb[44].mxu1  ;;  %1798 = vrot.lane.b32.xlu0 %v4870_v48, %s4227_s6  ;;  %v3720_v55 = vpop.f32.mrb[43].mxu0 }
 0x2d6   :  { %v3727_v10 = vpop.f32.mrb[45].mxu1  ;;  %v1286_v56 = vadd.f32 %v4829_v46, %v1285_v53 }
 0x2d7   :  { %v1288_v57 = vpop.f32.mrb[46].mxu1  ;;  %v4088_v58 = vpack.i.bf16 %v4873_v52, %v4870_v48 }
 0x2d8   :  { %v3728_v60 = vpop.f32.mrb[47].mxu1  ;;  %v4883_v61 = vmax.f32 %v1286_v56, 0.0 }
 0x2d9   :  { %1852 = vrot.lane.b32.xlu0 %v4873_v52, %s4227_s6  ;;  %4089 = vrot.lane.b32.xlu1 %v4088_v58, %s4228_s1 }
 0x2da   :  { %v1339_v25 = vpop.f32.mrb[44].mxu0 }
 0x2db   :  { %v1340_v62 = vadd.f32 %v4829_v46, %v1339_v25  ;;  %v3735_v0 = vpop.f32.mrb[45].mxu0 }
 0x2dc   :  { %v1342_v1 = vpop.f32.mrb[46].mxu0 }
 0x2dd   :  { %v4886_v2 = vmax.f32 %v1340_v62, 0.0  ;;  %v1393_v19 = vpop.f32.mrb[48].mxu1  ;;  %1906 = vrot.lane.b32.xlu1 %v4883_v61, %s4227_s6  ;;  %v3736_v3 = vpop.f32.mrb[47].mxu0  ;;  %v1021_v62 = vmax.f32 %v4840_v42, 0.0 }
 0x2de   :  { %v3743_v5 = vpop.f32.mrb[49].mxu1  ;;  %v1394_v6 = vadd.f32 %v4829_v46, %v1393_v19 }
 0x2df   :  { %v1396_v7 = vpop.f32.mrb[50].mxu1  ;;  %v4093_v33 = vpack.i.bf16 %v4886_v2, %v4883_v61 }
 0x2e0   :  { %v3744_v41 = vpop.f32.mrb[51].mxu1  ;;  %v4896_v12 = vmax.f32 %v1394_v6, 0.0 }
 0x2e1   :  { %1960 = vrot.lane.b32.xlu1 %v4886_v2, %s4227_s6  ;;  %4094 = vrot.lane.b32.xlu0 %v4093_v33, %s4228_s1 }
 0x2e2   :  { %v1447_v11 = vpop.f32.mrb[48].mxu0 }
 0x2e3   :  { %v1448_v50 = vadd.f32 %v4829_v46, %v1447_v11  ;;  %v3751_v13 = vpop.f32.mrb[49].mxu0 }
 0x2e4   :  { %v1450_v29 = vpop.f32.mrb[50].mxu0 }
 0x2e5   :  { %v4899_v38 = vmax.f32 %v1448_v50, 0.0  ;;  %v1501_v43 = vpop.f32.mrb[52].mxu1  ;;  %2014 = vrot.lane.b32.xlu0 %v4896_v12, %s4227_s6  ;;  %v3752_v14 = vpop.f32.mrb[51].mxu0 }
 0x2e6   :  { %v3759_v17 = vpop.f32.mrb[53].mxu1  ;;  %v1502_v18 = vadd.f32 %v4829_v46, %v1501_v43 }
 0x2e7   :  { %v1504_v20 = vpop.f32.mrb[54].mxu1  ;;  %v4098_v22 = vpack.i.bf16 %v4899_v38, %v4896_v12 }
 0x2e8   :  { %v3760_v23 = vpop.f32.mrb[55].mxu1  ;;  %v4909_v24 = vmax.f32 %v1502_v18, 0.0 }
 0x2e9   :  { %2068 = vrot.lane.b32.xlu0 %v4899_v38, %s4227_s6  ;;  %4099 = vrot.lane.b32.xlu1 %v4098_v22, %s4228_s1 }
 0x2ea   :  { %v1555_v59 = vpop.f32.mrb[52].mxu0 }
 0x2eb   :  { %v1556_v26 = vadd.f32 %v4829_v46, %v1555_v59  ;;  %v3767_v28 = vpop.f32.mrb[53].mxu0 }
 0x2ec   :  { %v1558_v30 = vpop.f32.mrb[54].mxu0 }
 0x2ed   :  { %v4912_v9 = vmax.f32 %v1556_v26, 0.0  ;;  %v1609_v31 = vpop.f32.mrb[56].mxu1  ;;  %2122 = vrot.lane.b32.xlu1 %v4909_v24, %s4227_s6  ;;  %v3768_v32 = vpop.f32.mrb[55].mxu0 }
 0x2ee   :  { %v3775_v34 = vpop.f32.mrb[57].mxu1  ;;  %v1610_v21 = vadd.f32 %v4829_v46, %v1609_v31 }
 0x2ef   :  { %v1612_v37 = vpop.f32.mrb[58].mxu1  ;;  %v4103_v39 = vpack.i.bf16 %v4912_v9, %v4909_v24 }
 0x2f0   :  { %v3776_v40 = vpop.f32.mrb[59].mxu1  ;;  %v4922_v44 = vmax.f32 %v1610_v21, 0.0 }
 0x2f1   :  { %2176 = vrot.lane.b32.xlu1 %v4912_v9, %s4227_s6  ;;  %4104 = vrot.lane.b32.xlu0 %v4103_v39, %s4228_s1 }
 0x2f2   :  { %v1663_v63 = vpop.f32.mrb[56].mxu0 }
 0x2f3   :  { %v1664_v45 = vadd.f32 %v4829_v46, %v1663_v63  ;;  %v3783_v47 = vpop.f32.mrb[57].mxu0 }
 0x2f4   :  { %v1666_v15 = vpop.f32.mrb[58].mxu0 }
 0x2f5   :  { %v1669_v49 = vmax.f32 %v1664_v45, 0.0  ;;  %v1717_v51 = vpop.f32.mrb[60].mxu1  ;;  %2230 = vrot.lane.b32.xlu0 %v4922_v44, %s4227_s6  ;;  %v3784_v53 = vpop.f32.mrb[59].mxu0 }
 0x2f6   :  { %v3791_v55 = vpop.f32.mrb[61].mxu1  ;;  %v1718_v56 = vadd.f32 %v4829_v46, %v1717_v51 }
 0x2f7   :  { %v4108_v10 = vpack.i.bf16 %v1669_v49, %v4922_v44  ;;  %v1720_v57 = vpop.f32.mrb[62].mxu1 }
 0x2f8   :  { %v3792_v58 = vpop.f32.mrb[63].mxu1  ;;  %v1723_v60 = vmax.f32 %v1718_v56, 0.0 }
 0x2f9   :  { %2284 = vrot.lane.b32.xlu0 %v1669_v49, %s4227_s6  ;;  %4109 = vrot.lane.b32.xlu1 %v4108_v10, %s4228_s1 }
 0x2fd   :  { %2338 = vrot.lane.b32.xlu1 %v1723_v60, %s4227_s6 }
 0x341   :  { %v1734_v19 = vpop.permute.xlu1 %1733 }
 0x343   :  { %v4085_v25 = vpop.permute.xlu0 %4084 }
 0x344   :  { %v4087_v0 = vunpack.i.h.bf16 %v4085_v25  ;;  %v4086_v1 = vunpack.i.l.bf16 %v4085_v25 }
 0x346   :  { %v1736_v3 = vsel %vm961_vm6, %v1021_v62, %v4086_v1  ;;  %v1801_v46 = vsel %vm961_vm6, %v1075_v4, %v4087_v0 }
 0x347   :  { %v1737_v5 = vsel %vm963_vm9, %v1736_v3, %v1734_v19  ;;  %v1799_v6 = vpop.permute.xlu0 %1798 }
 0x348   :  { %v1738_v7 = vpack.c.bf16 %v1737_v5, %v1737_v5  ;;  %v1802_v33 = vsel %vm963_vm9, %v1801_v46, %v1799_v6 }
 0x349   :  { %v1803_v41 = vpack.c.bf16 %v1802_v33, %v1802_v33 }
 0x34a   :  { %3798 = vmatmul.mubr.msk.bf16.vlgmr.msra.gmra.mrb[60].mxu0 %vm974_vm10, %v1738_v7  ;;  %v5057_v7 = vld [vmem:[%s5387_s27] ss:$0 sm:$0xff] }
 0x34b   :  { %3806 = vmatmul.mubr.msk.bf16.vlgmr.msra.gmra.mrb[64].mxu1 %vm974_vm10, %v1803_v41  ;;  %3810 = vmatpush3.bf16.msra.mxu0 %v4837_v16  ;;  %v4090_v42 = vpop.permute.xlu1 %4089  ;;  %v1853_v4 = vpop.permute.xlu0 %1852 }
 0x34c   :  { %3818 = vmatpush3.bf16.msra.mxu1 %v4837_v16  ;;  %v4092_v11 = vunpack.i.h.bf16 %v4090_v42  ;;  %v4091_v54 = vunpack.i.l.bf16 %v4090_v42  ;;  %3811 = vmatprep.subr.bf16.mxu0 %v4210_v8 }
 0x34d   :  { %3819 = vmatprep.subr.bf16.mxu1 %v4210_v8  ;;  %3813 = vmatprep.mubr.msk.bf16.mxu0 %vm4214_vm2, %v4210_v8 }
 0x34e   :  { %v1855_v50 = vsel %vm961_vm6, %v4861_v36, %v4091_v54  ;;  %v1909_v13 = vsel %vm961_vm6, %v4870_v48, %v4092_v11  ;;  %3821 = vmatprep.mubr.msk.bf16.mxu1 %vm4214_vm2, %v4210_v8 }
 0x34f   :  { %v1856_v29 = vsel %vm963_vm9, %v1855_v50, %v1853_v4  ;;  %3812 = vmatpush3.bf16.msra.mxu0 %v4850_v27  ;;  %v1907_v43 = vpop.permute.xlu1 %1906 }
 0x350   :  { %v1857_v14 = vpack.c.bf16 %v1856_v29, %v1856_v29  ;;  %3820 = vmatpush3.bf16.msra.mxu1 %v4850_v27  ;;  %v1910_v17 = vsel %vm963_vm9, %v1909_v13, %v1907_v43  ;;  %3825 = vmatprep.subr.bf16.mxu0 %v4210_v8 }
 0x351   :  { %v1911_v18 = vpack.c.bf16 %v1910_v17, %v1910_v17  ;;  %3833 = vmatprep.subr.bf16.mxu1 %v4210_v8 }
 0x352   :  { %3814 = vmatmul.mubr.msk.bf16.vlgmr.msra.gmra.mrb[64].mxu0 %vm974_vm10, %v1857_v14 }
 0x353   :  { %3822 = vmatmul.mubr.msk.bf16.vlgmr.msra.gmra.mrb[68].mxu1 %vm974_vm10, %v1911_v18  ;;  %3826 = vmatpush3.bf16.msra.mxu0 %v4837_v16  ;;  %v4095_v36 = vpop.permute.xlu0 %4094  ;;  %v1961_v22 = vpop.permute.xlu1 %1960 }
 0x354   :  { %3834 = vmatpush3.bf16.msra.mxu1 %v4837_v16  ;;  %v4097_v48 = vunpack.i.h.bf16 %v4095_v36  ;;  %v4096_v20 = vunpack.i.l.bf16 %v4095_v36  ;;  %3827 = vmatprep.subr.bf16.mxu0 %v4210_v8 }
 0x355   :  { %3835 = vmatprep.subr.bf16.mxu1 %v4210_v8  ;;  %3829 = vmatprep.mubr.msk.bf16.mxu0 %vm4214_vm2, %v4210_v8 }
 0x356   :  { %v1963_v23 = vsel %vm961_vm6, %v4873_v52, %v4096_v20  ;;  %v2017_v59 = vsel %vm961_vm6, %v4883_v61, %v4097_v48  ;;  %3837 = vmatprep.mubr.msk.bf16.mxu1 %vm4214_vm2, %v4210_v8 }
 0x357   :  { %v1964_v26 = vsel %vm963_vm9, %v1963_v23, %v1961_v22  ;;  %3828 = vmatpush3.bf16.msra.mxu0 %v4850_v27  ;;  %v2015_v28 = vpop.permute.xlu0 %2014 }
 0x358   :  { %v1965_v30 = vpack.c.bf16 %v1964_v26, %v1964_v26  ;;  %3836 = vmatpush3.bf16.msra.mxu1 %v4850_v27  ;;  %v2018_v31 = vsel %vm963_vm9, %v2017_v59, %v2015_v28  ;;  %3841 = vmatprep.subr.bf16.mxu0 %v4210_v8 }
 0x359   :  { %v2019_v32 = vpack.c.bf16 %v2018_v31, %v2018_v31  ;;  %3849 = vmatprep.subr.bf16.mxu1 %v4210_v8 }
 0x35a   :  { %3830 = vmatmul.mubr.msk.bf16.vlgmr.msra.gmra.mrb[68].mxu0 %vm974_vm10, %v1965_v30 }
 0x35b   :  { %3838 = vmatmul.mubr.msk.bf16.vlgmr.msra.gmra.mrb[72].mxu1 %vm974_vm10, %v2019_v32  ;;  %3842 = vmatpush3.bf16.msra.mxu0 %v4837_v16  ;;  %v4100_v52 = vpop.permute.xlu1 %4099  ;;  %v2069_v21 = vpop.permute.xlu0 %2068 }
 0x35c   :  { %3850 = vmatpush3.bf16.msra.mxu1 %v4837_v16  ;;  %v4102_v61 = vunpack.i.h.bf16 %v4100_v52  ;;  %v4101_v34 = vunpack.i.l.bf16 %v4100_v52  ;;  %3843 = vmatprep.subr.bf16.mxu0 %v4210_v8 }
 0x35d   :  { %3851 = vmatprep.subr.bf16.mxu1 %v4210_v8  ;;  %3845 = vmatprep.mubr.msk.bf16.mxu0 %vm4214_vm2, %v4210_v8 }
 0x35e   :  { %v2071_v37 = vsel %vm961_vm6, %v4886_v2, %v4101_v34  ;;  %v2125_v39 = vsel %vm961_vm6, %v4896_v12, %v4102_v61  ;;  %3853 = vmatprep.mubr.msk.bf16.mxu1 %vm4214_vm2, %v4210_v8 }
 0x35f   :  { %v2072_v40 = vsel %vm963_vm9, %v2071_v37, %v2069_v21  ;;  %3844 = vmatpush3.bf16.msra.mxu0 %v4850_v27  ;;  %v2123_v63 = vpop.permute.xlu1 %2122 }
 0x360   :  { %v2073_v45 = vpack.c.bf16 %v2072_v40, %v2072_v40  ;;  %3852 = vmatpush3.bf16.msra.mxu1 %v4850_v27  ;;  %v2126_v47 = vsel %vm963_vm9, %v2125_v39, %v2123_v63  ;;  %3857 = vmatprep.subr.bf16.mxu0 %v4210_v8 }
 0x361   :  { %v2127_v15 = vpack.c.bf16 %v2126_v47, %v2126_v47  ;;  %3865 = vmatprep.subr.bf16.mxu1 %v4210_v8 }
 0x362   :  { %3846 = vmatmul.mubr.msk.bf16.vlgmr.msra.gmra.mrb[72].mxu0 %vm974_vm10, %v2073_v45 }
 0x363   :  { %3854 = vmatmul.mubr.msk.bf16.vlgmr.msra.gmra.mrb[76].mxu1 %vm974_vm10, %v2127_v15  ;;  %3858 = vmatpush3.bf16.msra.mxu0 %v4837_v16  ;;  %v4105_v2 = vpop.permute.xlu0 %4104  ;;  %v2177_v51 = vpop.permute.xlu1 %2176 }
 0x364   :  { %3866 = vmatpush3.bf16.msra.mxu1 %v4837_v16  ;;  %v4107_v12 = vunpack.i.h.bf16 %v4105_v2  ;;  %v4106_v49 = vunpack.i.l.bf16 %v4105_v2  ;;  %3859 = vmatprep.subr.bf16.mxu0 %v4210_v8 }
 0x365   :  { %3867 = vmatprep.subr.bf16.mxu1 %v4210_v8  ;;  %3861 = vmatprep.mubr.msk.bf16.mxu0 %vm4214_vm2, %v4210_v8 }
 0x366   :  { %v2179_v53 = vsel %vm961_vm6, %v4899_v38, %v4106_v49  ;;  %v2233_v55 = vsel %vm961_vm6, %v4909_v24, %v4107_v12  ;;  %3869 = vmatprep.mubr.msk.bf16.mxu1 %vm4214_vm2, %v4210_v8 }
 0x367   :  { %v2180_v10 = vsel %vm963_vm9, %v2179_v53, %v2177_v51  ;;  %3860 = vmatpush3.bf16.msra.mxu0 %v4850_v27  ;;  %v2231_v56 = vpop.permute.xlu0 %2230 }
 0x368   :  { %v2181_v57 = vpack.c.bf16 %v2180_v10, %v2180_v10  ;;  %3868 = vmatpush3.bf16.msra.mxu1 %v4850_v27  ;;  %v2234_v58 = vsel %vm963_vm9, %v2233_v55, %v2231_v56  ;;  %3873 = vmatprep.subr.bf16.mxu0 %v4210_v8 }
 0x369   :  { %v2235_v60 = vpack.c.bf16 %v2234_v58, %v2234_v58  ;;  %3881 = vmatprep.subr.bf16.mxu1 %v4210_v8 }
 0x36a   :  { %3862 = vmatmul.mubr.msk.bf16.vlgmr.msra.gmra.mrb[76].mxu0 %vm974_vm10, %v2181_v57 }
 0x36b   :  { %3870 = vmatmul.mubr.msk.bf16.vlgmr.msra.gmra.mrb[80].mxu1 %vm974_vm10, %v2235_v60  ;;  %3874 = vmatpush3.bf16.msra.mxu0 %v4837_v16  ;;  %v4110_v38 = vpop.permute.xlu1 %4109  ;;  %v2285_v62 = vpop.permute.xlu0 %2284 }
 0x36c   :  { %3882 = vmatpush3.bf16.msra.mxu1 %v4837_v16  ;;  %v4112_v24 = vunpack.i.h.bf16 %v4110_v38  ;;  %v4111_v25 = vunpack.i.l.bf16 %v4110_v38  ;;  %3875 = vmatprep.subr.bf16.mxu0 %v4210_v8  ;;  %v2481_v16 = vpack.c.bf16 %v4594_v35, %v4594_v35 }
 0x36d   :  { %3883 = vmatprep.subr.bf16.mxu1 %v4210_v8  ;;  %3877 = vmatprep.mubr.msk.bf16.mxu0 %vm4214_vm2, %v4210_v8 }
 0x36e   :  { %v2287_v0 = vsel %vm961_vm6, %v4912_v9, %v4111_v25  ;;  %v2341_v1 = vsel %vm961_vm6, %v4922_v44, %v4112_v24  ;;  %3885 = vmatprep.mubr.msk.bf16.mxu1 %vm4214_vm2, %v4210_v8  ;;  %v2486_v35 = vsel %vm167_vm0, %v2481_v16, 0 }
 0x36f   :  { %v2288_v19 = vsel %vm963_vm9, %v2287_v0, %v2285_v62  ;;  %3876 = vmatpush3.bf16.msra.mxu0 %v4850_v27  ;;  %v2339_v3 = vpop.permute.xlu1 %2338 }
 0x370   :  { %v2289_v46 = vpack.c.bf16 %v2288_v19, %v2288_v19  ;;  %3884 = vmatpush3.bf16.msra.mxu1 %v4850_v27  ;;  %v2342_v5 = vsel %vm963_vm9, %v2341_v1, %v2339_v3  ;;  %3889 = vmatprep.subr.bf16.mxu0 %v4210_v8  ;;  %v2399_v27 = vld [vmem:[%s5386_s10] sm:$0xff]  ;;  %s5388_s10 = sld [smem:[#allocation22_spill]] }
 0x371   :  { %v2343_v9 = vpack.c.bf16 %v2342_v5, %v2342_v5  ;;  %3895 = vmatprep.subr.bf16.mxu1 %v4210_v8  ;;  %v2401_v44 = vpack.c.bf16 %v2399_v27, %v2399_v27 }
 0x372   :  { %3878 = vmatmul.mubr.msk.bf16.vlgmr.msra.gmra.mrb[80].mxu0 %vm974_vm10, %v2289_v46 }
 0x373   :  { %3886 = vmatmul.mubr.msk.bf16.vlgmr.msra.gmra.mrb[84].mxu1 %vm974_vm10, %v2343_v9  ;;  %3891 = vmatprep.mubr.msk.bf16.mxu0 %vm4214_vm2, %v4210_v8  ;;  %v2413_v6 = vsel %vm167_vm0, %v2401_v44, 0 }
 0x374   :  { %3896 = vmatpush3.bf16.msra.mxu1 %v2486_v35  ;;  %3897 = vmatprep.mubr.msk.bf16.mxu1 %vm4214_vm2, %v4210_v8 }
 0x375   :  { %3909 = vmatprep.subr.bf16.mxu1 %v4210_v8  ;;  %3890 = vmatpush3.bf16.msra.mxu0 %v2413_v6 }
 0x376   :  { %3901 = vmatprep.subr.bf16.mxu0 %v4210_v8 }
 0x41d   :  { %v1787_v33 = vpop.f32.mrb[60].mxu0 }
 0x41e   :  { %v1788_v41 = vadd.f32 %v5057_v7, %v1787_v33  ;;  %v3799_v42 = vpop.f32.mrb[61].mxu0  ;;  %v1841_v11 = vpop.f32.mrb[64].mxu1 }
 0x41f   :  { %v1842_v54 = vadd.f32 %v5057_v7, %v1841_v11  ;;  %v1790_v4 = vpop.f32.mrb[62].mxu0  ;;  %v3807_v50 = vpop.f32.mrb[65].mxu1 }
 0x420   :  { %v1793_v13 = vmax.f32 %v1788_v41, 0.0  ;;  %v3800_v29 = vpop.f32.mrb[63].mxu0  ;;  %v1844_v43 = vpop.f32.mrb[66].mxu1 }
 0x421   :  { %v1847_v14 = vmax.f32 %v1842_v54, 0.0  ;;  %v3808_v17 = vpop.f32.mrb[67].mxu1 }
 0x423   :  { %v2388_v18 = vmax.f32 %v1793_v13, %v1847_v14 }
 0x425   :  { %v1895_v36 = vpop.f32.mrb[64].mxu0 }
 0x426   :  { %v1896_v48 = vadd.f32 %v5057_v7, %v1895_v36  ;;  %v3815_v20 = vpop.f32.mrb[65].mxu0  ;;  %v1949_v22 = vpop.f32.mrb[68].mxu1 }
 0x427   :  { %v1950_v23 = vadd.f32 %v5057_v7, %v1949_v22  ;;  %v1898_v59 = vpop.f32.mrb[66].mxu0  ;;  %v3823_v26 = vpop.f32.mrb[69].mxu1 }
 0x428   :  { %v1901_v28 = vmax.f32 %v1896_v48, 0.0  ;;  %v3816_v30 = vpop.f32.mrb[67].mxu0  ;;  %v1952_v31 = vpop.f32.mrb[70].mxu1 }
 0x429   :  { %v1955_v32 = vmax.f32 %v1950_v23, 0.0  ;;  %v3824_v52 = vpop.f32.mrb[71].mxu1  ;;  %v2456_v31 = vld [vmem:[%s5347_s11] sm:$0xff] }
 0x42a   :  { %v2389_v61 = vmax.f32 %v2388_v18, %v1901_v28  ;;  %v2461_v52 = vld [vmem:[%s5351_s15 + $0x8] sm:$0xff] }
 0x42c   :  { %v2390_v34 = vmax.f32 %v2389_v61, %v1955_v32  ;;  %v2460_v32 = vld [vmem:[%s5351_s15] sm:$0xff] }
 0x42d   :  { %v2003_v21 = vpop.f32.mrb[68].mxu0  ;;  %v5089_v61 = vpack.c.bf16 %v2461_v52, %v2460_v32  ;;  %v2476_v32 = vld [vmem:[%s5357_s21 + $0x8] sm:$0xff] }
 0x42e   :  { %v2004_v37 = vadd.f32 %v5057_v7, %v2003_v21  ;;  %v3831_v39 = vpop.f32.mrb[69].mxu0  ;;  %v2057_v40 = vpop.f32.mrb[72].mxu1  ;;  %v2463_v21 = vld [vmem:[%s5351_s15 + $0x18] sm:$0xff] }
 0x42f   :  { %v2058_v63 = vadd.f32 %v5057_v7, %v2057_v40  ;;  %v2006_v45 = vpop.f32.mrb[70].mxu0  ;;  %v3839_v47 = vpop.f32.mrb[73].mxu1  ;;  %v3346_v39 = vld [vmem:[%s5388_s10] ss:$0 sm:$0xff] }
 0x430   :  { %v2009_v15 = vmax.f32 %v2004_v37, 0.0  ;;  %v3832_v2 = vpop.f32.mrb[71].mxu0  ;;  %v2060_v12 = vpop.f32.mrb[74].mxu1 }
 0x431   :  { %v2063_v49 = vmax.f32 %v2058_v63, 0.0  ;;  %v3840_v51 = vpop.f32.mrb[75].mxu1  ;;  %v2457_v12 = vld [vmem:[%s5348_s12] sm:$0xff] }
 0x432   :  { %v2391_v53 = vmax.f32 %v2390_v34, %v2009_v15  ;;  %v2462_v34 = vld [vmem:[%s5351_s15 + $0x10] sm:$0xff] }
 0x433   :  { %v5099_v37 = vpack.c.bf16 %v2463_v21, %v2462_v34 }
 0x434   :  { %v2392_v55 = vmax.f32 %v2391_v53, %v2063_v49  ;;  %v5111_v53 = vpack.c.bf16 %v2457_v12, %v2457_v12 }
 0x435   :  { %v2111_v10 = vpop.f32.mrb[72].mxu0 }
 0x436   :  { %v2112_v56 = vadd.f32 %v5057_v7, %v2111_v10  ;;  %v3847_v57 = vpop.f32.mrb[73].mxu0  ;;  %v2165_v58 = vpop.f32.mrb[76].mxu1  ;;  %v2466_v10 = vld [vmem:[%s5353_s17 + $0x8] sm:$0xff] }
 0x437   :  { %v2166_v60 = vadd.f32 %v5057_v7, %v2165_v58  ;;  %v2114_v38 = vpop.f32.mrb[74].mxu0  ;;  %v3855_v24 = vpop.f32.mrb[77].mxu1 }
 0x438   :  { %v2117_v25 = vmax.f32 %v2112_v56, 0.0  ;;  %v3848_v62 = vpop.f32.mrb[75].mxu0  ;;  %v2168_v0 = vpop.f32.mrb[78].mxu1 }
 0x439   :  { %v2171_v1 = vmax.f32 %v2166_v60, 0.0  ;;  %v3856_v16 = vpop.f32.mrb[79].mxu1  ;;  %v2468_v62 = vld [vmem:[%s5353_s17 + $0x18] sm:$0xff] }
 0x43a   :  { %v2393_v19 = vmax.f32 %v2392_v55, %v2117_v25  ;;  %v2465_v55 = vld [vmem:[%s5353_s17] sm:$0xff]  ;;  %v2467_v25 = vld [vmem:[%s5353_s17 + $0x10] sm:$0xff] }
 0x43b   :  { %v5124_v57 = vpack.c.bf16 %v2466_v10, %v2465_v55  ;;  %v5137_v0 = vpack.c.bf16 %v2468_v62, %v2467_v25  ;;  %v5231_v10 = vld [vmem:[%s5356_s20] ss:$0 sm:$0xff]  ;;  %s4229_s20 = smov [#allocation7]  }
 0x43c   :  { %v2394_v3 = vmax.f32 %v2393_v19, %v2171_v1  ;;  %v5237_v62 = vld [vmem:[%s5358_s22] ss:$0 sm:$0xff]  ;;  %s3281_s22 = sshll.u32 %s4229_s20, 4  ;;  %s3282_s22 = int_to_ptr.vmem [resolvable:$true] %s3281_s22 }
 0x43d   :  { %v2219_v46 = vpop.f32.mrb[76].mxu0  ;;  %s4114_s0 = scalar_lea.vmem %s3282_s22, 128  ;;  %p4119_p1 = scmp.lt.s32.totalorder %s3282_s22, %s3282_s22 }
 0x43e   :  { %v2220_v5 = vadd.f32 %v5057_v7, %v2219_v46  ;;  %v3863_v9 = vpop.f32.mrb[77].mxu0  ;;  %v2273_v35 = vpop.f32.mrb[80].mxu1  ;;  %p4115_p0 = scmp.ne.s32.totalorder %s3282_s22, %s4114_s0  ;;  %p4120_p2 = scmp.lt.s32.totalorder %s4114_s0, %s4114_s0 }
 0x43f   :  { %v2274_v27 = vadd.f32 %v5057_v7, %v2273_v35  ;;  %v2222_v44 = vpop.f32.mrb[78].mxu0  ;;  %v3871_v6 = vpop.f32.mrb[81].mxu1 }
 0x440   :  { %v2225_v33 = vmax.f32 %v2220_v5, 0.0  ;;  %v3864_v41 = vpop.f32.mrb[79].mxu0  ;;  %v2276_v42 = vpop.f32.mrb[82].mxu1  ;;  %v2470_v44 = vld [vmem:[%s5355_s19] sm:$0xff]  ;;  %v2471_v6 = vld [vmem:[%s5355_s19 + $0x8] sm:$0xff]  ;;  %p4121_p3 = por %p4120_p2, %p4119_p1 }
 0x441   :  { %v2279_v11 = vmax.f32 %v2274_v27, 0.0  ;;  %v3872_v54 = vpop.f32.mrb[83].mxu1  ;;  %v5157_v41 = vld [vmem:[%s5352_s16] ss:$0 sm:$0xff] }
 0x442   :  { %v2395_v4 = vmax.f32 %v2394_v3, %v2225_v33  ;;  %v5150_v33 = vpack.c.bf16 %v2471_v6, %v2470_v44  ;;  %v5162_v42 = vld [vmem:[%s5354_s18] ss:$0 sm:$0xff]  ;;  %p4122_p4 = pnand %p4121_p3, %p4115_p0 }
 0x444   :  { %v2396_v50 = vmax.f32 %v2395_v4, %v2279_v11 }
 0x445   :  { %v2327_v13 = vpop.f32.mrb[80].mxu0 }
 0x446   :  { %v2328_v29 = vadd.f32 %v5057_v7, %v2327_v13  ;;  %v3879_v43 = vpop.f32.mrb[81].mxu0  ;;  %v2381_v14 = vpop.f32.mrb[84].mxu1 }
 0x447   :  { %v2382_v17 = vadd.f32 %v5057_v7, %v2381_v14  ;;  %v2330_v18 = vpop.f32.mrb[82].mxu0  ;;  %v3887_v36 = vpop.f32.mrb[85].mxu1  ;;  %v5077_v7 = vpack.c.bf16 %v2456_v31, %v2456_v31  ;;  %v2475_v31 = vld [vmem:[%s5357_s21] sm:$0xff] }
 0x448   :  { %v2333_v48 = vmax.f32 %v2328_v29, 0.0  ;;  %v3880_v20 = vpop.f32.mrb[83].mxu0  ;;  %v2384_v22 = vpop.f32.mrb[86].mxu1  ;;  %v5204_v34 = vpack.c.bf16 %v2476_v32, %v2475_v31 }
 0x449   :  { %v2387_v23 = vmax.f32 %v2382_v17, 0.0  ;;  %v3888_v59 = vpop.f32.mrb[87].mxu1  ;;  %3898 = vmatmul.mubr.msk.bf16.vlgmr.msra.gmra.mrb[88].mxu1 %vm961_vm6, %v5077_v7  ;;  %v2458_v17 = vld [vmem:[%s5349_s13] sm:$0xff] }
 0x44a   :  { %v2397_v26 = vmax.f32 %v2396_v50, %v2333_v48  ;;  %3911 = vmatprep.mubr.msk.bf16.mxu1 %vm4214_vm2, %v4210_v8  ;;  %v5170_v20 = vpack.c.bf16 %v2458_v17, %v2458_v17 }
 0x44c   :  { %v2398_v28 = vmax.f32 %v2397_v26, %v2387_v23  ;;  %v2459_v23 = vld [vmem:[%s5350_s14] sm:$0xff]  ;;  %v2472_v26 = vld [vmem:[%s5355_s19 + $0x10] sm:$0xff] }
 0x44d   :  { %v5182_v59 = vpack.c.bf16 %v2459_v23, %v2459_v23 }
 0x44e   :  { %v2400_v30 = vpack.c.bf16 %v2398_v28, %v2398_v28  ;;  %v2473_v28 = vld [vmem:[%s5355_s19 + $0x18] sm:$0xff] }
 0x450   :  { %3892 = vmatmul.mubr.msk.bf16.vlgmr.msra.gmra.mrb[84].mxu0 %vm961_vm6, %v2400_v30  ;;  %v5194_v30 = vpack.c.bf16 %v2473_v28, %v2472_v26 }
 0x451   :  { %3905 = vmatprep.mubr.msk.bf16.mxu0 %vm4214_vm2, %v4210_v8  ;;  %3902 = vmatpush3.bf16.msra.mxu0 %v5089_v61 }
 0x452   :  { %3903 = vmatprep.subr.bf16.mxu0 %v4210_v8 }
 0x455   :  { %3904 = vmatpush3.bf16.msra.mxu0 %v5099_v37 }
 0x456   :  { %3915 = vmatprep.subr.bf16.mxu0 %v4210_v8 }
 0x51c   :  { %v2522_v56 = vpop.f32.mrb[88].mxu1 }
 0x51d   :  { %v2528_v58 = vpack.c.bf16 %v2522_v56, %v2522_v56  ;;  %v3899_v60 = vpop.f32.mrb[89].mxu1 }
 0x51e   :  { %v2525_v38 = vpop.f32.mrb[90].mxu1 }
 0x51f   :  { %v3900_v24 = vpop.f32.mrb[91].mxu1  ;;  %3906 = vmatmul.mubr.msk.bf16.vlgmr.msra.gmra.mrb[88].mxu0 %vm2537_vm8, %v2528_v58 }
 0x520   :  { %3916 = vmatpush3.bf16.msra.mxu0 %v5124_v57  ;;  %3919 = vmatprep.mubr.msk.bf16.mxu0 %vm4214_vm2, %v4210_v8 }
 0x521   :  { %3917 = vmatprep.subr.bf16.mxu0 %v4210_v8 }
 0x523   :  { %v2449_v40 = vpop.f32.mrb[84].mxu0 }
 0x524   :  { %v2450_v63 = vadd.f32 %v3346_v39, %v2449_v40  ;;  %v3893_v45 = vpop.f32.mrb[85].mxu0  ;;  %3918 = vmatpush3.bf16.msra.mxu0 %v5137_v0  ;;  %v2477_v40 = vld [vmem:[%s5357_s21 + $0x10] sm:$0xff] }
 0x525   :  { %v2452_v47 = vpop.f32.mrb[86].mxu0  ;;  %3929 = vmatprep.subr.bf16.mxu0 %v4210_v8 }
 0x526   :  { %v2455_v15 = vmax.f32 %v2450_v63, 0.0  ;;  %v3894_v2 = vpop.f32.mrb[87].mxu0  ;;  %v2478_v63 = vld [vmem:[%s5357_s21 + $0x18] sm:$0xff] }
 0x528   :  { %v2583_v49 = vpack.c.bf16 %v2455_v15, %v2455_v15  ;;  %3244 = vst.msk [vmem:[#allocation7] sm:$0xff] %vm2537_vm8, %v2455_v15  ;;  %v5214_v15 = vpack.c.bf16 %v2478_v63, %v2477_v40 }
 0x52a   :  { %v2588_v51 = vsel %vm167_vm0, %v2583_v49, 0 }
 0x52b   :  { %3910 = vmatpush3.bf16.msra.mxu1 %v2588_v51 }
 0x52c   :  { %3923 = vmatprep.subr.bf16.mxu1 %v4210_v8 }
 0x52e   :  { %3912 = vmatmul.mubr.msk.bf16.vlgmr.msra.gmra.mrb[92].mxu1 %vm961_vm6, %v5111_v53 }
 0x52f   :  { %3925 = vmatprep.mubr.msk.bf16.mxu1 %vm4214_vm2, %v4210_v8 }
 0x5f2   :  { %v2575_v5 = vpop.f32.mrb[88].mxu0 }
 0x5f3   :  { %v3907_v9 = vpop.f32.mrb[89].mxu0  ;;  %v2576_v11 = vadd.f32 %v5157_v41, %v2575_v5 }
 0x5f4   :  { %v2578_v35 = vpop.f32.mrb[90].mxu0 }
 0x5f5   :  { %v3908_v27 = vpop.f32.mrb[91].mxu0  ;;  %v2581_v29 = vmax.f32 %v2576_v11, 0.0 }
 0x5f7   :  { %v2785_v36 = vpack.c.bf16 %v2581_v29, %v2581_v29 }
 0x5f9   :  { %v2790_v22 = vsel %vm167_vm0, %v2785_v36, 0 }
 0x601   :  { %v2624_v1 = vpop.f32.mrb[92].mxu1 }
 0x602   :  { %v2630_v16 = vpack.c.bf16 %v2624_v1, %v2624_v1  ;;  %v3913_v19 = vpop.f32.mrb[93].mxu1 }
 0x603   :  { %v2627_v3 = vpop.f32.mrb[94].mxu1 }
 0x604   :  { %v3914_v46 = vpop.f32.mrb[95].mxu1  ;;  %3920 = vmatmul.mubr.msk.bf16.vlgmr.msra.gmra.mrb[92].mxu0 %vm2537_vm8, %v2630_v16 }
 0x605   :  { %3933 = vmatprep.mubr.msk.bf16.mxu0 %vm4214_vm2, %v4210_v8  ;;  %3930 = vmatpush3.bf16.msra.mxu0 %v5150_v33 }
 0x606   :  { %3931 = vmatprep.subr.bf16.mxu0 %v4210_v8 }
 0x609   :  { %3932 = vmatpush3.bf16.msra.mxu0 %v5194_v30 }
 0x60a   :  { %3943 = vmatprep.subr.bf16.mxu0 %v4210_v8 }
 0x6d7   :  { %v2676_v54 = vpop.f32.mrb[92].mxu0 }
 0x6d8   :  { %v2677_v4 = vadd.f32 %v5162_v42, %v2676_v54  ;;  %v3921_v50 = vpop.f32.mrb[93].mxu0 }
 0x6d9   :  { %v2679_v13 = vpop.f32.mrb[94].mxu0 }
 0x6da   :  { %v2682_v43 = vmax.f32 %v2677_v4, 0.0  ;;  %v3922_v14 = vpop.f32.mrb[95].mxu0 }
 0x6dc   :  { %v2684_v18 = vpack.c.bf16 %v2682_v43, %v2682_v43 }
 0x6de   :  { %v2689_v48 = vsel %vm167_vm0, %v2684_v18, 0 }
 0x6df   :  { %3924 = vmatpush3.bf16.msra.mxu1 %v2689_v48 }
 0x6e0   :  { %3937 = vmatprep.subr.bf16.mxu1 %v4210_v8 }
 0x6e2   :  { %3926 = vmatmul.mubr.msk.bf16.vlgmr.msra.gmra.mrb[96].mxu1 %vm961_vm6, %v5170_v20 }
 0x6e3   :  { %3938 = vmatpush3.bf16.msra.mxu1 %v2790_v22  ;;  %3939 = vmatprep.mubr.msk.bf16.mxu1 %vm4214_vm2, %v4210_v8 }
 0x6e4   :  { %3951 = vmatprep.subr.bf16.mxu1 %v4210_v8 }
 0x6ea   :  { %3940 = vmatmul.mubr.msk.bf16.vlgmr.msra.gmra.mrb[100].mxu1 %vm961_vm6, %v5182_v59 }
 0x6eb   :  { %3953 = vmatprep.mubr.msk.bf16.mxu1 %vm4214_vm2, %v4210_v8 }
 0x7b5   :  { %v2725_v52 = vpop.f32.mrb[96].mxu1 }
 0x7b6   :  { %v2731_v21 = vpack.c.bf16 %v2725_v52, %v2725_v52  ;;  %v3927_v39 = vpop.f32.mrb[97].mxu1 }
 0x7b7   :  { %v2728_v45 = vpop.f32.mrb[98].mxu1 }
 0x7b8   :  { %v3928_v47 = vpop.f32.mrb[99].mxu1  ;;  %3934 = vmatmul.mubr.msk.bf16.vlgmr.msra.gmra.mrb[96].mxu0 %vm2537_vm8, %v2731_v21 }
 0x7b9   :  { %3944 = vmatpush3.bf16.msra.mxu0 %v5204_v34  ;;  %3947 = vmatprep.mubr.msk.bf16.mxu0 %vm4214_vm2, %v4210_v8 }
 0x7ba   :  { %3945 = vmatprep.subr.bf16.mxu0 %v4210_v8 }
 0x7bd   :  { %v2826_v2 = vpop.f32.mrb[100].mxu1  ;;  %3946 = vmatpush3.bf16.msra.mxu0 %v5214_v15 }
 0x7be   :  { %v2832_v12 = vpack.c.bf16 %v2826_v2, %v2826_v2  ;;  %v3941_v49 = vpop.f32.mrb[101].mxu1  ;;  %3957 = vmatprep.subr.bf16.mxu0 %v4210_v8 }
 0x7bf   :  { %v2829_v51 = vpop.f32.mrb[102].mxu1 }
 0x7c0   :  { %v3942_v55 = vpop.f32.mrb[103].mxu1  ;;  %3948 = vmatmul.mubr.msk.bf16.vlgmr.msra.gmra.mrb[100].mxu0 %vm2537_vm8, %v2832_v12 }
 0x7c1   :  { %3958 = vmatpush3.bf16.msra.mxu0 %v5089_v61  ;;  %3961 = vmatprep.mubr.msk.bf16.mxu0 %vm4214_vm2, %v4210_v8 }
 0x7c2   :  { %3959 = vmatprep.subr.bf16.mxu0 %v4210_v8 }
 0x7c5   :  { %3960 = vmatpush3.bf16.msra.mxu0 %v5099_v37 }
 0x7c6   :  { %3971 = vmatprep.subr.bf16.mxu0 %v4210_v8 }
 0x88b   :  { %v2777_v56 = vpop.f32.mrb[96].mxu0 }
 0x88c   :  { %v2778_v58 = vadd.f32 %v5231_v10, %v2777_v56  ;;  %v3935_v60 = vpop.f32.mrb[97].mxu0 }
 0x88d   :  { %v2780_v38 = vpop.f32.mrb[98].mxu0 }
 0x88e   :  { %v2783_v61 = vmax.f32 %v2778_v58, 0.0  ;;  %v3936_v24 = vpop.f32.mrb[99].mxu0 }
 0x890   :  { %v2885_v25 = vpack.c.bf16 %v2783_v61, %v2783_v61 }
 0x892   :  { %v2887_v37 = vsel %vm167_vm0, %v2885_v25, 0 }
 0x893   :  { %v2878_v1 = vpop.f32.mrb[100].mxu0  ;;  %3952 = vmatpush3.bf16.msra.mxu1 %v2887_v37 }
 0x894   :  { %v2879_v16 = vadd.f32 %v5237_v62, %v2878_v1  ;;  %v3949_v19 = vpop.f32.mrb[101].mxu0  ;;  %3965 = vmatprep.subr.bf16.mxu1 %v4210_v8 }
 0x895   :  { %v2881_v3 = vpop.f32.mrb[102].mxu0 }
 0x896   :  { %v2884_v46 = vmax.f32 %v2879_v16, 0.0  ;;  %v3950_v5 = vpop.f32.mrb[103].mxu0  ;;  %3954 = vmatmul.mubr.msk.bf16.vlgmr.msra.gmra.mrb[104].mxu1 %vm961_vm6, %v5077_v7 }
 0x897   :  { %3967 = vmatprep.mubr.msk.bf16.mxu1 %vm4214_vm2, %v4210_v8 }
 0x898   :  { %v2974_v9 = vpack.c.bf16 %v2884_v46, %v2884_v46 }
 0x89a   :  { %v2976_v35 = vsel %vm167_vm0, %v2974_v9, 0 }
 0x89b   :  { %3966 = vmatpush3.bf16.msra.mxu1 %v2976_v35 }
 0x89c   :  { %3979 = vmatprep.subr.bf16.mxu1 %v4210_v8 }
 0x89e   :  { %3968 = vmatmul.mubr.msk.bf16.vlgmr.msra.gmra.mrb[108].mxu1 %vm961_vm6, %v5111_v53 }
 0x89f   :  { %3981 = vmatprep.mubr.msk.bf16.mxu1 %vm4214_vm2, %v4210_v8 }
 0x969   :  { %v2923_v27 = vpop.f32.mrb[104].mxu1 }
 0x96a   :  { %v2929_v44 = vpack.c.bf16 %v2923_v27, %v2923_v27  ;;  %v3955_v6 = vpop.f32.mrb[105].mxu1 }
 0x96b   :  { %v2926_v11 = vpop.f32.mrb[106].mxu1 }
 0x96c   :  { %v3956_v7 = vpop.f32.mrb[107].mxu1  ;;  %3962 = vmatmul.mubr.msk.bf16.vlgmr.msra.gmra.mrb[104].mxu0 %vm2537_vm8, %v2929_v44 }
 0x96d   :  { %3972 = vmatpush3.bf16.msra.mxu0 %v5124_v57  ;;  %3975 = vmatprep.mubr.msk.bf16.mxu0 %vm4214_vm2, %v4210_v8 }
 0x96e   :  { %3973 = vmatprep.subr.bf16.mxu0 %v4210_v8 }
 0x971   :  { %v3012_v54 = vpop.f32.mrb[108].mxu1  ;;  %3974 = vmatpush3.bf16.msra.mxu0 %v5137_v0 }
 0x972   :  { %v3018_v53 = vpack.c.bf16 %v3012_v54, %v3012_v54  ;;  %v3969_v4 = vpop.f32.mrb[109].mxu1  ;;  %3985 = vmatprep.subr.bf16.mxu0 %v4210_v8 }
 0x973   :  { %v3015_v50 = vpop.f32.mrb[110].mxu1 }
 0x974   :  { %v3970_v13 = vpop.f32.mrb[111].mxu1  ;;  %3976 = vmatmul.mubr.msk.bf16.vlgmr.msra.gmra.mrb[108].mxu0 %vm2537_vm8, %v3018_v53 }
 0x975   :  { %3986 = vmatpush3.bf16.msra.mxu0 %v5150_v33  ;;  %3989 = vmatprep.mubr.msk.bf16.mxu0 %vm4214_vm2, %v4210_v8 }
 0x976   :  { %3987 = vmatprep.subr.bf16.mxu0 %v4210_v8 }
 0x979   :  { %3988 = vmatpush3.bf16.msra.mxu0 %v5194_v30 }
 0x97a   :  { %3999 = vmatprep.subr.bf16.mxu0 %v4210_v8 }
 0xa3f   :  { %v2967_v57 = vpop.f32.mrb[104].mxu0 }
 0xa40   :  { %v3963_v0 = vpop.f32.mrb[105].mxu0  ;;  %v2968_v14 = vadd.f32 %v5157_v41, %v2967_v57 }
 0xa41   :  { %v2970_v29 = vpop.f32.mrb[106].mxu0 }
 0xa42   :  { %v3964_v43 = vpop.f32.mrb[107].mxu0  ;;  %v2973_v48 = vmax.f32 %v2968_v14, 0.0 }
 0xa44   :  { %v3152_v28 = vpack.c.bf16 %v2973_v48, %v2973_v48 }
 0xa46   :  { %v3154_v41 = vsel %vm167_vm0, %v3152_v28, 0 }
 0xa47   :  { %v3056_v17 = vpop.f32.mrb[108].mxu0 }
 0xa48   :  { %v3057_v18 = vadd.f32 %v5162_v42, %v3056_v17  ;;  %v3977_v36 = vpop.f32.mrb[109].mxu0 }
 0xa49   :  { %v3059_v33 = vpop.f32.mrb[110].mxu0 }
 0xa4a   :  { %v3062_v22 = vmax.f32 %v3057_v18, 0.0  ;;  %v3978_v23 = vpop.f32.mrb[111].mxu0 }
 0xa4c   :  { %v3063_v26 = vpack.c.bf16 %v3062_v22, %v3062_v22 }
 0xa4e   :  { %v3065_v30 = vsel %vm167_vm0, %v3063_v26, 0 }
 0xa4f   :  { %3980 = vmatpush3.bf16.msra.mxu1 %v3065_v30 }
 0xa50   :  { %3993 = vmatprep.subr.bf16.mxu1 %v4210_v8 }
 0xa52   :  { %3982 = vmatmul.mubr.msk.bf16.vlgmr.msra.gmra.mrb[112].mxu1 %vm961_vm6, %v5170_v20 }
 0xa53   :  { %3994 = vmatpush3.bf16.msra.mxu1 %v3154_v41  ;;  %3995 = vmatprep.mubr.msk.bf16.mxu1 %vm4214_vm2, %v4210_v8 }
 0xa5a   :  { %3996 = vmatmul.mubr.msk.bf16.vlgmr.msra.gmra.mrb[116].mxu1 %vm961_vm6, %v5182_v59 }
 0xb25   :  { %v3101_v42 = vpop.f32.mrb[112].mxu1 }
 0xb26   :  { %v3107_v31 = vpack.c.bf16 %v3101_v42, %v3101_v42  ;;  %v3983_v32 = vpop.f32.mrb[113].mxu1 }
 0xb27   :  { %v3104_v52 = vpop.f32.mrb[114].mxu1 }
 0xb28   :  { %v3984_v21 = vpop.f32.mrb[115].mxu1  ;;  %3990 = vmatmul.mubr.msk.bf16.vlgmr.msra.gmra.mrb[112].mxu0 %vm2537_vm8, %v3107_v31 }
 0xb29   :  { %4000 = vmatpush3.bf16.msra.mxu0 %v5204_v34  ;;  %4003 = vmatprep.mubr.msk.bf16.mxu0 %vm4214_vm2, %v4210_v8 }
 0xb2a   :  { %4001 = vmatprep.subr.bf16.mxu0 %v4210_v8 }
 0xb2d   :  { %v3190_v20 = vpop.f32.mrb[116].mxu1  ;;  %4002 = vmatpush3.bf16.msra.mxu0 %v5214_v15 }
 0xb2e   :  { %v3196_v39 = vpack.c.bf16 %v3190_v20, %v3190_v20  ;;  %v3997_v40 = vpop.f32.mrb[117].mxu1 }
 0xb2f   :  { %v3193_v59 = vpop.f32.mrb[118].mxu1 }
 0xb30   :  { %v3998_v63 = vpop.f32.mrb[119].mxu1  ;;  %4004 = vmatmul.mubr.msk.bf16.vlgmr.msra.gmra.mrb[116].mxu0 %vm2537_vm8, %v3196_v39 }
 0xb31   :  { %4125 = shalt.err (!%p4122_p4)
}
 0xb32   :  { %s4126_s2 = scalar_lea.hbm %s5362_s26, 128 }
 0xb33   :  { %p4127_p5 = scmp.ne.s32.totalorder %s5362_s26, %s4126_s2  ;;  %p4130_p6 = scmp.lt.u32.totalorder %s4126_s2, %s5362_s26 }
 0xb35   :  { %p4132_p7 = pnand %p4130_p6, %p4127_p5 }
 0xb37   :  { %4135 = shalt.err (!%p4132_p7)
}
 0xb38   :  { %3284 = dma.vmem_to_hbm [thread:$0]  %s3282_s22, 128, %s5362_s26, [#allocation8]  }
 0xb39   :  { %s4230_s1 = smov [#allocation2]  }
 0xb3a   :  { %s3251_s15 = sshll.u32 %s4230_s1, 4  ;;  %s3252_s15 = int_to_ptr.vmem [resolvable:$true] %s3251_s15 }
 0xb3b   :  { %s4136_s27 = scalar_lea.vmem %s3252_s15, 128  ;;  %p4141_p9 = scmp.lt.s32.totalorder %s3252_s15, %s3252_s15 }
 0xb3c   :  { %p4137_p8 = scmp.ne.s32.totalorder %s3252_s15, %s4136_s27  ;;  %p4142_p10 = scmp.lt.s32.totalorder %s4136_s27, %s4136_s27 }
 0xb3e   :  { %p4143_p11 = por %p4142_p10, %p4141_p9 }
 0xb40   :  { %p4144_p12 = pnand %p4143_p11, %p4137_p8 }
 0xbfb   :  { %v3145_v8 = vpop.f32.mrb[112].mxu0 }
 0xbfc   :  { %v3146_v34 = vadd.f32 %v5231_v10, %v3145_v8  ;;  %v3991_v45 = vpop.f32.mrb[113].mxu0 }
 0xbfd   :  { %v3148_v47 = vpop.f32.mrb[114].mxu0 }
 0xbfe   :  { %v3151_v15 = vmax.f32 %v3146_v34, 0.0  ;;  %v3992_v2 = vpop.f32.mrb[115].mxu0 }
 0xc00   :  { %3241 = vst.msk [vmem:[#allocation2] sm:$0xff] %vm2537_vm8, %v3151_v15 }
 0xc01   :  { %4147 = shalt.err (!%p4144_p12)
}
 0xc02   :  { %s4148_s12 = scalar_lea.hbm %s5359_s23, 128 }
 0xc03   :  { %p4149_p13 = scmp.ne.s32.totalorder %s5359_s23, %s4148_s12  ;;  %p4152_p0 = scmp.lt.u32.totalorder %s4148_s12, %s5359_s23 }
 0xc05   :  { %p4154_p1 = pnand %p4152_p0, %p4149_p13 }
 0xc07   :  { %4157 = shalt.err (!%p4154_p1)
}
 0xc08   :  { %3254 = dma.vmem_to_hbm [thread:$0]  %s3252_s15, 128, %s5359_s23, [#allocation3]   ;;  %v3234_v12 = vpop.f32.mrb[116].mxu0 }
 0xc09   :  { %s4231_s21 = smov [#allocation4]   ;;  %v3235_v49 = vadd.f32 %v5237_v62, %v3234_v12  ;;  %v4005_v51 = vpop.f32.mrb[117].mxu0  ;;  %s4232_s29 = smov [#allocation6]  }
 0xc0a   :  { %s3261_s17 = sshll.u32 %s4231_s21, 4  ;;  %s3271_s11 = sshll.u32 %s4232_s29, 4  ;;  %v3237_v55 = vpop.f32.mrb[118].mxu0  ;;  %s3262_s17 = int_to_ptr.vmem [resolvable:$true] %s3261_s17  ;;  %s3272_s11 = int_to_ptr.vmem [resolvable:$true] %s3271_s11 }
 0xc0b   :  { %v3240_v10 = vmax.f32 %v3235_v49, 0.0  ;;  %v4006_v56 = vpop.f32.mrb[119].mxu0  ;;  %s4158_s20 = scalar_lea.vmem %s3262_s17, 128  ;;  %p4163_p3 = scmp.lt.s32.totalorder %s3262_s17, %s3262_s17 }
 0xc0c   :  { %p4159_p2 = scmp.ne.s32.totalorder %s3262_s17, %s4158_s20  ;;  %p4164_p4 = scmp.lt.s32.totalorder %s4158_s20, %s4158_s20 }
 0xc0d   :  { %3242 = vst.msk [vmem:[#allocation4] sm:$0xff] %vm2537_vm8, %v3240_v10 }
 0xc0e   :  { %p4165_p5 = por %p4164_p4, %p4163_p3 }
 0xc10   :  { %p4166_p6 = pnand %p4165_p5, %p4159_p2 }
 0xc12   :  { %4169 = shalt.err (!%p4166_p6)
}
 0xc13   :  { %s4170_s0 = scalar_lea.hbm %s5360_s24, 128 }
 0xc14   :  { %p4171_p7 = scmp.ne.s32.totalorder %s5360_s24, %s4170_s0  ;;  %p4174_p8 = scmp.lt.u32.totalorder %s4170_s0, %s5360_s24 }
 0xc16   :  { %p4176_p9 = pnand %p4174_p8, %p4171_p7 }
 0xc18   :  { %4179 = shalt.err (!%p4176_p9)
}
 0xc19   :  { %3264 = dma.vmem_to_hbm [thread:$0]  %s3262_s17, 128, %s5360_s24, [#allocation5]  }
 0xc1a   :  { %s4180_s16 = scalar_lea.vmem %s3272_s11, 128  ;;  %p4185_p11 = scmp.lt.s32.totalorder %s3272_s11, %s3272_s11 }
 0xc1b   :  { %p4181_p10 = scmp.ne.s32.totalorder %s3272_s11, %s4180_s16  ;;  %p4186_p12 = scmp.lt.s32.totalorder %s4180_s16, %s4180_s16 }
 0xc1d   :  { %p4187_p13 = por %p4186_p12, %p4185_p11 }
 0xc1f   :  { %p4188_p0 = pnand %p4187_p13, %p4181_p10 }
 0xc21   :  { %4191 = shalt.err (!%p4188_p0)
}
 0xc22   :  { %s4192_s1 = scalar_lea.hbm %s5361_s25, 128 }
 0xc23   :  { %p4193_p1 = scmp.ne.s32.totalorder %s5361_s25, %s4192_s1  ;;  %p4196_p2 = scmp.lt.u32.totalorder %s4192_s1, %s5361_s25 }
 0xc25   :  { %p4198_p3 = pnand %p4196_p2, %p4193_p1 }
 0xc27   :  { %4201 = shalt.err (!%p4198_p3)
}
 0xc28   :  { %3274 = dma.vmem_to_hbm [thread:$0]  %s3272_s11, 128, %s5361_s25, [#allocation5]  }
 0xc29   :  { %4202 = dma.done.wait [#allocation3], 128  }
 0xc2a   :  { %4203 = vsyncadd [#allocation3], 4294967168 }
 0xc2b   :  { %4204 = dma.done.wait [#allocation5], 256  }
 0xc2c   :  { %4205 = vsyncadd [#allocation5], 4294967040 }
 0xc2d   :  { %4206 = dma.done.wait [#allocation8], 128  }
 0xc2e   :  { %4207 = vsyncadd [#allocation8], 4294967168 }
 0xc2f   :  { %3297 = vsyncpa [#allocation3], 1 }
 0xc30   :  { %3298 = vsyncpa [#allocation5], 1 }
 0xc31   :  { %3299 = vsyncpa [#allocation8], 1 }

</bundles_post_ra>
